<compile_context>
chip_gen: v7x
topology: tpu7x:2x2x1
jax: 0.10.0
libtpu: 0.0.40
codegen_flags: <defaults>
</compile_context>

<pallas_src>
import functools

import numpy as np
import jax
import jax.numpy as jnp
from jax import lax
from jax.experimental import pallas as pl
from jax.experimental.pallas import tpu as pltpu

K = 5    # Conv3d kernel size
PAD = 2  # replicate padding on every spatial side


# --------------------------------------------------------------------------
# Banded weight construction (host-side, done once per spatial width W).
#
# Row index of the banded matrix:  ((kd*K + kh) * W + w_in) * Cin + ci
# Col index:                        w_out * Cout + co
# Value: sum over kw with clamp(w_out + kw - PAD, 0, W-1) == w_in of
#        w[kd, kh, kw, ci, co]   (the clamp folds the replicate pad along W).
# --------------------------------------------------------------------------
def _banded_conv_weight(w, width):
    w = np.asarray(w, np.float32)           # (K, K, K, Cin, Cout)  (DHWIO)
    cin, cout = w.shape[3], w.shape[4]
    B = np.zeros((K * K, width * cin, width * cout), np.float32)
    for kd in range(K):
        for kh in range(K):
            g = kd * K + kh
            for kw in range(K):
                for wo in range(width):
                    wi = min(max(wo + kw - PAD, 0), width - 1)
                    B[g, wi * cin:(wi + 1) * cin,
                      wo * cout:(wo + 1) * cout] += w[kd, kh, kw]
    return jnp.asarray(B.reshape(K * K * width * cin, width * cout))


def _tiled_bias(b, width):
    b = np.asarray(b, np.float32)
    return jnp.asarray(np.tile(b, width).reshape(1, width * b.shape[0]))


# --------------------------------------------------------------------------
# Fused kernel: conv1 + bias + ReLU + replicate-pad(D,H) + conv2 + bias.
# One batch element per grid step; everything stays in VMEM.
# --------------------------------------------------------------------------
def _fused_refine_kernel(xp_ref, w1_ref, b1_ref, w2_ref, b2_ref, o_ref,
                         p1_ref, hp_ref, p2_ref, *, D, H, W, C1):
    lane1 = xp_ref.shape[-1]          # W * Cin  (w-major, c-minor on lanes)
    lane2 = W * C1
    taps = [(kd, kh) for kd in range(K) for kh in range(K)]

    # ---- layer 1: banded im2col over the 25 (kd,kh) slabs + ONE MXU matmul ----
    for g, (kd, kh) in enumerate(taps):
        slab = xp_ref[0, kd:kd + D, kh:kh + H, :]               # (D, H, W*Cin)
        p1_ref[:, g * lane1:(g + 1) * lane1] = slab.reshape(D * H, lane1)
    h = jnp.dot(p1_ref[...], w1_ref[...], preferred_element_type=jnp.float32)
    h = jnp.maximum(h + b1_ref[...], 0.0)                       # (D*H, W*C1)

    # ---- replicate-pad h along D and H into VMEM scratch (the W padding is
    #      already folded into the banded weights) ----
    hp_ref[PAD:PAD + D, PAD:PAD + H, :] = h.reshape(D, H, lane2)
    for p in range(PAD):
        hp_ref[p, PAD:PAD + H, :] = h[:H, :]                    # front D faces
        hp_ref[PAD + D + p, PAD:PAD + H, :] = h[(D - 1) * H:, :]  # back D faces
    for p in range(PAD):
        hp_ref[:, p, :] = hp_ref[:, PAD, :]                     # front H faces
        hp_ref[:, PAD + H + p, :] = hp_ref[:, PAD + H - 1, :]   # back H faces

    # ---- layer 2: same banded structure, ONE MXU matmul, no ReLU ----
    for g, (kd, kh) in enumerate(taps):
        slab = hp_ref[kd:kd + D, kh:kh + H, :]                  # (D, H, W*C1)
        p2_ref[:, g * lane2:(g + 1) * lane2] = slab.reshape(D * H, lane2)
    y = jnp.dot(p2_ref[...], w2_ref[...], preferred_element_type=jnp.float32)
    y = y + b2_ref[...]                                         # (D*H, W*Cout)
    o_ref[...] = y.reshape(o_ref.shape).astype(o_ref.dtype)


def _fused_conv_call(xp, w1b, b1t, w2b, b2t, *, D, H, W, C1, Cout):
    N, Dp, Hp, lane1 = xp.shape
    lane2 = W * C1
    KK = K * K
    kern = functools.partial(_fused_refine_kernel, D=D, H=H, W=W, C1=C1)
    return pl.pallas_call(
        kern,
        out_shape=jax.ShapeDtypeStruct((N, D * H, W * Cout), jnp.float32),
        grid_spec=pltpu.PrefetchScalarGridSpec(
            num_scalar_prefetch=0,
            grid=(N,),
            in_specs=[
                pl.BlockSpec((1, Dp, Hp, lane1), lambda n: (n, 0, 0, 0)),
                pl.BlockSpec((KK * lane1, W * C1), lambda n: (0, 0)),
                pl.BlockSpec((1, W * C1), lambda n: (0, 0)),
                pl.BlockSpec((KK * lane2, W * Cout), lambda n: (0, 0)),
                pl.BlockSpec((1, W * Cout), lambda n: (0, 0)),
            ],
            out_specs=pl.BlockSpec((1, D * H, W * Cout), lambda n: (n, 0, 0)),
            scratch_shapes=[
                pltpu.VMEM((D * H, KK * lane1), jnp.float32),   # layer-1 patches
                pltpu.VMEM((Dp, Hp, lane2), jnp.float32),       # padded h
                pltpu.VMEM((D * H, KK * lane2), jnp.float32),   # layer-2 patches
            ],
        ),
        compiler_params=pltpu.CompilerParams(
            dimension_semantics=("parallel",),
        ),
    )(xp, w1b, b1t, w2b, b2t)


def _forward(x_ncdhw, w1b, b1t, w2b, b2t):
    N, Cin, D, H, W = x_ncdhw.shape
    C1 = w1b.shape[1] // W
    Cout = w2b.shape[1] // W
    x = jnp.transpose(x_ncdhw, (0, 2, 3, 4, 1)).astype(jnp.float32)   # NDHWC
    # Replicate-pad D and H only; the W pad is folded into the banded weights.
    xp = jnp.pad(x, ((0, 0), (PAD, PAD), (PAD, PAD), (0, 0), (0, 0)), mode='edge')
    xp = xp.reshape(N, D + 2 * PAD, H + 2 * PAD, W * Cin)             # lane = W*Cin
    y = _fused_conv_call(xp, w1b, b1t, w2b, b2t, D=D, H=H, W=W, C1=C1, Cout=Cout)
    y = y.reshape(N, D, H, W, Cout)
    return jnp.transpose(y, (0, 4, 1, 2, 3))                          # NCDHW


_forward_jit = jax.jit(_forward)


class CnnRefinementNetPallas:
    """Deterministically initialized Pallas port of CnnRefinementNet."""

    def __init__(self, in_feats, out_classes, layer_sizes, key):
        k1, k2, k3, k4 = jax.random.split(key, 4)
        # PyTorch Conv3d default init: U(-1/sqrt(fan_in), 1/sqrt(fan_in)).
        lim1 = 1.0 / np.sqrt(in_feats * K ** 3)
        lim2 = 1.0 / np.sqrt(layer_sizes[0] * K ** 3)
        # Weights stored in DHWIO layout (K, K, K, Cin, Cout).
        self.w1 = jax.random.uniform(k1, (K, K, K, in_feats, layer_sizes[0]),
                                     jnp.float32, -lim1, lim1)
        self.b1 = jax.random.uniform(k2, (layer_sizes[0],), jnp.float32,
                                     -lim1, lim1)
        self.w2 = jax.random.uniform(k3, (K, K, K, layer_sizes[0], out_classes),
                                     jnp.float32, -lim2, lim2)
        self.b2 = jax.random.uniform(k4, (out_classes,), jnp.float32,
                                     -lim2, lim2)
        self.c1 = layer_sizes[0]
        self.cout = out_classes
        self._band_cache = {}

    def _banded_params(self, width):
        if width not in self._band_cache:
            self._band_cache[width] = (
                _banded_conv_weight(self.w1, width),
                _tiled_bias(self.b1, width),
                _banded_conv_weight(self.w2, width),
                _tiled_bias(self.b2, width),
            )
        return self._band_cache[width]

    def __call__(self, comb_img_logits_ncdhw):
        width = comb_img_logits_ncdhw.shape[-1]
        w1b, b1t, w2b, b2t = self._banded_params(width)
        return _forward_jit(comb_img_logits_ncdhw, w1b, b1t, w2b, b2t)


# --------------------------------------------------------------------------
# Pure-JAX reference (lax.conv on edge-padded input) for correctness check.
# --------------------------------------------------------------------------
def _conv3d_ref(x_ndhwc, w, b):
    xp = jnp.pad(x_ndhwc, ((0, 0), (PAD, PAD), (PAD, PAD), (PAD, PAD), (0, 0)),
                 mode='edge')
    y = lax.conv_general_dilated(xp, w, window_strides=(1, 1, 1), padding='VALID',
                                 dimension_numbers=('NDHWC', 'DHWIO', 'NDHWC'))
    return y + b


def _net_ref(x_ncdhw, net):
    x = jnp.transpose(x_ncdhw, (0, 2, 3, 4, 1)).astype(jnp.float32)
    h = jnp.maximum(_conv3d_ref(x, net.w1, net.b1), 0.0)
    h = _conv3d_ref(h, net.w2, net.b2)
    return jnp.transpose(h, (0, 4, 1, 2, 3))


if __name__ == "__main__":
    key = jax.random.PRNGKey(0)
    k_in, k_net = jax.random.split(key)

    # Small shapes implied by the module: batch=2, in_feats=4 channels,
    # 8^3 spatial volume, one hidden conv of 8 channels, 3 output classes.
    N, Cin, D, H, W = 2, 4, 8, 8, 8
    layer_sizes = [8]
    out_classes = 3

    x = jax.random.normal(k_in, (N, Cin, D, H, W), jnp.float32)  # NCDHW like PyTorch
    net = CnnRefinementNetPallas(Cin, out_classes, layer_sizes, k_net)

    out = jax.block_until_ready(net(x))
    ref = jax.block_until_ready(_net_ref(x, net))

    assert out.shape == (N, out_classes, D, H, W), out.shape
    err = float(jnp.max(jnp.abs(out - ref)))
    assert err < 2e-3, err

    print("KERNEL_OK")
</pallas_src>

<mosaic_0001>
module attributes {stable_mosaic.version = 11 : i64} {
  func.func @_fused_refine_kernel(%arg0: i32, %arg1: memref<1x12x12x32xf32, #tpu.memory_space<vmem>>, %arg2: memref<800x64xf32, #tpu.memory_space<vmem>>, %arg3: memref<1x64xf32, #tpu.memory_space<vmem>>, %arg4: memref<1600x24xf32, #tpu.memory_space<vmem>>, %arg5: memref<1x24xf32, #tpu.memory_space<vmem>>, %arg6: memref<1x64x24xf32, #tpu.memory_space<vmem>>, %arg7: memref<64x800xf32, #tpu.memory_space<vmem>>, %arg8: memref<12x12x64xf32, #tpu.memory_space<vmem>>, %arg9: memref<64x1600xf32, #tpu.memory_space<vmem>>) attributes {dimension_semantics = [#tpu.dimension_semantics<parallel>], iteration_bounds = array<i64: 2>, scalar_prefetch = 0 : i64, scratch_operands = 3 : i64, tpu.core_type = #tpu.core_type<tc>, window_params = [{transform_indices = @transform_0, window_bounds = array<i64: 1, 12, 12, 32>}, {pipeline_mode = #tpu.pipeline_mode<synchronous>, transform_indices = @transform_1, window_bounds = array<i64: 800, 64>}, {pipeline_mode = #tpu.pipeline_mode<synchronous>, transform_indices = @transform_2, window_bounds = array<i64: 1, 64>}, {pipeline_mode = #tpu.pipeline_mode<synchronous>, transform_indices = @transform_3, window_bounds = array<i64: 1600, 24>}, {pipeline_mode = #tpu.pipeline_mode<synchronous>, transform_indices = @transform_4, window_bounds = array<i64: 1, 24>}, {transform_indices = @transform_5, window_bounds = array<i64: 1, 64, 24>}]} {
    %c0 = arith.constant 0 : index
    %c0_0 = arith.constant 0 : index
    %c0_1 = arith.constant 0 : index
    %c0_2 = arith.constant 0 : index
    %0 = vector.load %arg1[%c0, %c0_0, %c0_1, %c0_2] : memref<1x12x12x32xf32, #tpu.memory_space<vmem>>, vector<1x8x8x32xf32>
    %1 = vector.shape_cast %0 : vector<1x8x8x32xf32> to vector<8x8x32xf32>
    %2 = vector.shape_cast %1 : vector<8x8x32xf32> to vector<64x32xf32>
    %c0_3 = arith.constant 0 : index
    %c0_4 = arith.constant 0 : index
    %3 = vector.load %arg7[%c0_3, %c0_4] : memref<64x800xf32, #tpu.memory_space<vmem>>, vector<64x32xf32>
    tpu.vector_store %arg7[%c0_3, %c0_4], %2 {strides = array<i32>} : memref<64x800xf32, #tpu.memory_space<vmem>>, vector<64x32xf32>,
    %c0_5 = arith.constant 0 : index
    %c0_6 = arith.constant 0 : index
    %c1 = arith.constant 1 : index
    %c0_7 = arith.constant 0 : index
    %4 = vector.load %arg1[%c0_5, %c0_6, %c1, %c0_7] : memref<1x12x12x32xf32, #tpu.memory_space<vmem>>, vector<1x8x8x32xf32>
    %5 = vector.shape_cast %4 : vector<1x8x8x32xf32> to vector<8x8x32xf32>
    %6 = vector.shape_cast %5 : vector<8x8x32xf32> to vector<64x32xf32>
    %c0_8 = arith.constant 0 : index
    %c32 = arith.constant 32 : index
    %7 = vector.load %arg7[%c0_8, %c32] : memref<64x800xf32, #tpu.memory_space<vmem>>, vector<64x32xf32>
    tpu.vector_store %arg7[%c0_8, %c32], %6 {strides = array<i32>} : memref<64x800xf32, #tpu.memory_space<vmem>>, vector<64x32xf32>,
    %c0_9 = arith.constant 0 : index
    %c0_10 = arith.constant 0 : index
    %c2 = arith.constant 2 : index
    %c0_11 = arith.constant 0 : index
    %8 = vector.load %arg1[%c0_9, %c0_10, %c2, %c0_11] : memref<1x12x12x32xf32, #tpu.memory_space<vmem>>, vector<1x8x8x32xf32>
    %9 = vector.shape_cast %8 : vector<1x8x8x32xf32> to vector<8x8x32xf32>
    %10 = vector.shape_cast %9 : vector<8x8x32xf32> to vector<64x32xf32>
    %c0_12 = arith.constant 0 : index
    %c64 = arith.constant 64 : index
    %11 = vector.load %arg7[%c0_12, %c64] : memref<64x800xf32, #tpu.memory_space<vmem>>, vector<64x32xf32>
    tpu.vector_store %arg7[%c0_12, %c64], %10 {strides = array<i32>} : memref<64x800xf32, #tpu.memory_space<vmem>>, vector<64x32xf32>,
    %c0_13 = arith.constant 0 : index
    %c0_14 = arith.constant 0 : index
    %c3 = arith.constant 3 : index
    %c0_15 = arith.constant 0 : index
    %12 = vector.load %arg1[%c0_13, %c0_14, %c3, %c0_15] : memref<1x12x12x32xf32, #tpu.memory_space<vmem>>, vector<1x8x8x32xf32>
    %13 = vector.shape_cast %12 : vector<1x8x8x32xf32> to vector<8x8x32xf32>
    %14 = vector.shape_cast %13 : vector<8x8x32xf32> to vector<64x32xf32>
    %c0_16 = arith.constant 0 : index
    %c96 = arith.constant 96 : index
    %15 = vector.load %arg7[%c0_16, %c96] : memref<64x800xf32, #tpu.memory_space<vmem>>, vector<64x32xf32>
    tpu.vector_store %arg7[%c0_16, %c96], %14 {strides = array<i32>} : memref<64x800xf32, #tpu.memory_space<vmem>>, vector<64x32xf32>,
    %c0_17 = arith.constant 0 : index
    %c0_18 = arith.constant 0 : index
    %c4 = arith.constant 4 : index
    %c0_19 = arith.constant 0 : index
    %16 = vector.load %arg1[%c0_17, %c0_18, %c4, %c0_19] : memref<1x12x12x32xf32, #tpu.memory_space<vmem>>, vector<1x8x8x32xf32>
    %17 = vector.shape_cast %16 : vector<1x8x8x32xf32> to vector<8x8x32xf32>
    %18 = vector.shape_cast %17 : vector<8x8x32xf32> to vector<64x32xf32>
    %c0_20 = arith.constant 0 : index
    %c128 = arith.constant 128 : index
    %19 = vector.load %arg7[%c0_20, %c128] : memref<64x800xf32, #tpu.memory_space<vmem>>, vector<64x32xf32>
    tpu.vector_store %arg7[%c0_20, %c128], %18 {strides = array<i32>} : memref<64x800xf32, #tpu.memory_space<vmem>>, vector<64x32xf32>,
    %c0_21 = arith.constant 0 : index
    %c1_22 = arith.constant 1 : index
    %c0_23 = arith.constant 0 : index
    %c0_24 = arith.constant 0 : index
    %20 = vector.load %arg1[%c0_21, %c1_22, %c0_23, %c0_24] : memref<1x12x12x32xf32, #tpu.memory_space<vmem>>, vector<1x8x8x32xf32>
    %21 = vector.shape_cast %20 : vector<1x8x8x32xf32> to vector<8x8x32xf32>
    %22 = vector.shape_cast %21 : vector<8x8x32xf32> to vector<64x32xf32>
    %c0_25 = arith.constant 0 : index
    %c160 = arith.constant 160 : index
    %23 = vector.load %arg7[%c0_25, %c160] : memref<64x800xf32, #tpu.memory_space<vmem>>, vector<64x32xf32>
    tpu.vector_store %arg7[%c0_25, %c160], %22 {strides = array<i32>} : memref<64x800xf32, #tpu.memory_space<vmem>>, vector<64x32xf32>,
    %c0_26 = arith.constant 0 : index
    %c1_27 = arith.constant 1 : index
    %c1_28 = arith.constant 1 : index
    %c0_29 = arith.constant 0 : index
    %24 = vector.load %arg1[%c0_26, %c1_27, %c1_28, %c0_29] : memref<1x12x12x32xf32, #tpu.memory_space<vmem>>, vector<1x8x8x32xf32>
    %25 = vector.shape_cast %24 : vector<1x8x8x32xf32> to vector<8x8x32xf32>
    %26 = vector.shape_cast %25 : vector<8x8x32xf32> to vector<64x32xf32>
    %c0_30 = arith.constant 0 : index
    %c192 = arith.constant 192 : index
    %27 = vector.load %arg7[%c0_30, %c192] : memref<64x800xf32, #tpu.memory_space<vmem>>, vector<64x32xf32>
    tpu.vector_store %arg7[%c0_30, %c192], %26 {strides = array<i32>} : memref<64x800xf32, #tpu.memory_space<vmem>>, vector<64x32xf32>,
    %c0_31 = arith.constant 0 : index
    %c1_32 = arith.constant 1 : index
    %c2_33 = arith.constant 2 : index
    %c0_34 = arith.constant 0 : index
    %28 = vector.load %arg1[%c0_31, %c1_32, %c2_33, %c0_34] : memref<1x12x12x32xf32, #tpu.memory_space<vmem>>, vector<1x8x8x32xf32>
    %29 = vector.shape_cast %28 : vector<1x8x8x32xf32> to vector<8x8x32xf32>
    %30 = vector.shape_cast %29 : vector<8x8x32xf32> to vector<64x32xf32>
    %c0_35 = arith.constant 0 : index
    %c224 = arith.constant 224 : index
    %31 = vector.load %arg7[%c0_35, %c224] : memref<64x800xf32, #tpu.memory_space<vmem>>, vector<64x32xf32>
    tpu.vector_store %arg7[%c0_35, %c224], %30 {strides = array<i32>} : memref<64x800xf32, #tpu.memory_space<vmem>>, vector<64x32xf32>,
    %c0_36 = arith.constant 0 : index
    %c1_37 = arith.constant 1 : index
    %c3_38 = arith.constant 3 : index
    %c0_39 = arith.constant 0 : index
    %32 = vector.load %arg1[%c0_36, %c1_37, %c3_38, %c0_39] : memref<1x12x12x32xf32, #tpu.memory_space<vmem>>, vector<1x8x8x32xf32>
    %33 = vector.shape_cast %32 : vector<1x8x8x32xf32> to vector<8x8x32xf32>
    %34 = vector.shape_cast %33 : vector<8x8x32xf32> to vector<64x32xf32>
    %c0_40 = arith.constant 0 : index
    %c256 = arith.constant 256 : index
    %35 = vector.load %arg7[%c0_40, %c256] : memref<64x800xf32, #tpu.memory_space<vmem>>, vector<64x32xf32>
    tpu.vector_store %arg7[%c0_40, %c256], %34 {strides = array<i32>} : memref<64x800xf32, #tpu.memory_space<vmem>>, vector<64x32xf32>,
    %c0_41 = arith.constant 0 : index
    %c1_42 = arith.constant 1 : index
    %c4_43 = arith.constant 4 : index
    %c0_44 = arith.constant 0 : index
    %36 = vector.load %arg1[%c0_41, %c1_42, %c4_43, %c0_44] : memref<1x12x12x32xf32, #tpu.memory_space<vmem>>, vector<1x8x8x32xf32>
    %37 = vector.shape_cast %36 : vector<1x8x8x32xf32> to vector<8x8x32xf32>
    %38 = vector.shape_cast %37 : vector<8x8x32xf32> to vector<64x32xf32>
    %c0_45 = arith.constant 0 : index
    %c288 = arith.constant 288 : index
    %39 = vector.load %arg7[%c0_45, %c288] : memref<64x800xf32, #tpu.memory_space<vmem>>, vector<64x32xf32>
    tpu.vector_store %arg7[%c0_45, %c288], %38 {strides = array<i32>} : memref<64x800xf32, #tpu.memory_space<vmem>>, vector<64x32xf32>,
    %c0_46 = arith.constant 0 : index
    %c2_47 = arith.constant 2 : index
    %c0_48 = arith.constant 0 : index
    %c0_49 = arith.constant 0 : index
    %40 = vector.load %arg1[%c0_46, %c2_47, %c0_48, %c0_49] : memref<1x12x12x32xf32, #tpu.memory_space<vmem>>, vector<1x8x8x32xf32>
    %41 = vector.shape_cast %40 : vector<1x8x8x32xf32> to vector<8x8x32xf32>
    %42 = vector.shape_cast %41 : vector<8x8x32xf32> to vector<64x32xf32>
    %c0_50 = arith.constant 0 : index
    %c320 = arith.constant 320 : index
    %43 = vector.load %arg7[%c0_50, %c320] : memref<64x800xf32, #tpu.memory_space<vmem>>, vector<64x32xf32>
    tpu.vector_store %arg7[%c0_50, %c320], %42 {strides = array<i32>} : memref<64x800xf32, #tpu.memory_space<vmem>>, vector<64x32xf32>,
    %c0_51 = arith.constant 0 : index
    %c2_52 = arith.constant 2 : index
    %c1_53 = arith.constant 1 : index
    %c0_54 = arith.constant 0 : index
    %44 = vector.load %arg1[%c0_51, %c2_52, %c1_53, %c0_54] : memref<1x12x12x32xf32, #tpu.memory_space<vmem>>, vector<1x8x8x32xf32>
    %45 = vector.shape_cast %44 : vector<1x8x8x32xf32> to vector<8x8x32xf32>
    %46 = vector.shape_cast %45 : vector<8x8x32xf32> to vector<64x32xf32>
    %c0_55 = arith.constant 0 : index
    %c352 = arith.constant 352 : index
    %47 = vector.load %arg7[%c0_55, %c352] : memref<64x800xf32, #tpu.memory_space<vmem>>, vector<64x32xf32>
    tpu.vector_store %arg7[%c0_55, %c352], %46 {strides = array<i32>} : memref<64x800xf32, #tpu.memory_space<vmem>>, vector<64x32xf32>,
    %c0_56 = arith.constant 0 : index
    %c2_57 = arith.constant 2 : index
    %c2_58 = arith.constant 2 : index
    %c0_59 = arith.constant 0 : index
    %48 = vector.load %arg1[%c0_56, %c2_57, %c2_58, %c0_59] : memref<1x12x12x32xf32, #tpu.memory_space<vmem>>, vector<1x8x8x32xf32>
    %49 = vector.shape_cast %48 : vector<1x8x8x32xf32> to vector<8x8x32xf32>
    %50 = vector.shape_cast %49 : vector<8x8x32xf32> to vector<64x32xf32>
    %c0_60 = arith.constant 0 : index
    %c384 = arith.constant 384 : index
    %51 = vector.load %arg7[%c0_60, %c384] : memref<64x800xf32, #tpu.memory_space<vmem>>, vector<64x32xf32>
    tpu.vector_store %arg7[%c0_60, %c384], %50 {strides = array<i32>} : memref<64x800xf32, #tpu.memory_space<vmem>>, vector<64x32xf32>,
    %c0_61 = arith.constant 0 : index
    %c2_62 = arith.constant 2 : index
    %c3_63 = arith.constant 3 : index
    %c0_64 = arith.constant 0 : index
    %52 = vector.load %arg1[%c0_61, %c2_62, %c3_63, %c0_64] : memref<1x12x12x32xf32, #tpu.memory_space<vmem>>, vector<1x8x8x32xf32>
    %53 = vector.shape_cast %52 : vector<1x8x8x32xf32> to vector<8x8x32xf32>
    %54 = vector.shape_cast %53 : vector<8x8x32xf32> to vector<64x32xf32>
    %c0_65 = arith.constant 0 : index
    %c416 = arith.constant 416 : index
    %55 = vector.load %arg7[%c0_65, %c416] : memref<64x800xf32, #tpu.memory_space<vmem>>, vector<64x32xf32>
    tpu.vector_store %arg7[%c0_65, %c416], %54 {strides = array<i32>} : memref<64x800xf32, #tpu.memory_space<vmem>>, vector<64x32xf32>,
    %c0_66 = arith.constant 0 : index
    %c2_67 = arith.constant 2 : index
    %c4_68 = arith.constant 4 : index
    %c0_69 = arith.constant 0 : index
    %56 = vector.load %arg1[%c0_66, %c2_67, %c4_68, %c0_69] : memref<1x12x12x32xf32, #tpu.memory_space<vmem>>, vector<1x8x8x32xf32>
    %57 = vector.shape_cast %56 : vector<1x8x8x32xf32> to vector<8x8x32xf32>
    %58 = vector.shape_cast %57 : vector<8x8x32xf32> to vector<64x32xf32>
    %c0_70 = arith.constant 0 : index
    %c448 = arith.constant 448 : index
    %59 = vector.load %arg7[%c0_70, %c448] : memref<64x800xf32, #tpu.memory_space<vmem>>, vector<64x32xf32>
    tpu.vector_store %arg7[%c0_70, %c448], %58 {strides = array<i32>} : memref<64x800xf32, #tpu.memory_space<vmem>>, vector<64x32xf32>,
    %c0_71 = arith.constant 0 : index
    %c3_72 = arith.constant 3 : index
    %c0_73 = arith.constant 0 : index
    %c0_74 = arith.constant 0 : index
    %60 = vector.load %arg1[%c0_71, %c3_72, %c0_73, %c0_74] : memref<1x12x12x32xf32, #tpu.memory_space<vmem>>, vector<1x8x8x32xf32>
    %61 = vector.shape_cast %60 : vector<1x8x8x32xf32> to vector<8x8x32xf32>
    %62 = vector.shape_cast %61 : vector<8x8x32xf32> to vector<64x32xf32>
    %c0_75 = arith.constant 0 : index
    %c480 = arith.constant 480 : index
    %63 = vector.load %arg7[%c0_75, %c480] : memref<64x800xf32, #tpu.memory_space<vmem>>, vector<64x32xf32>
    tpu.vector_store %arg7[%c0_75, %c480], %62 {strides = array<i32>} : memref<64x800xf32, #tpu.memory_space<vmem>>, vector<64x32xf32>,
    %c0_76 = arith.constant 0 : index
    %c3_77 = arith.constant 3 : index
    %c1_78 = arith.constant 1 : index
    %c0_79 = arith.constant 0 : index
    %64 = vector.load %arg1[%c0_76, %c3_77, %c1_78, %c0_79] : memref<1x12x12x32xf32, #tpu.memory_space<vmem>>, vector<1x8x8x32xf32>
    %65 = vector.shape_cast %64 : vector<1x8x8x32xf32> to vector<8x8x32xf32>
    %66 = vector.shape_cast %65 : vector<8x8x32xf32> to vector<64x32xf32>
    %c0_80 = arith.constant 0 : index
    %c512 = arith.constant 512 : index
    %67 = vector.load %arg7[%c0_80, %c512] : memref<64x800xf32, #tpu.memory_space<vmem>>, vector<64x32xf32>
    tpu.vector_store %arg7[%c0_80, %c512], %66 {strides = array<i32>} : memref<64x800xf32, #tpu.memory_space<vmem>>, vector<64x32xf32>,
    %c0_81 = arith.constant 0 : index
    %c3_82 = arith.constant 3 : index
    %c2_83 = arith.constant 2 : index
    %c0_84 = arith.constant 0 : index
    %68 = vector.load %arg1[%c0_81, %c3_82, %c2_83, %c0_84] : memref<1x12x12x32xf32, #tpu.memory_space<vmem>>, vector<1x8x8x32xf32>
    %69 = vector.shape_cast %68 : vector<1x8x8x32xf32> to vector<8x8x32xf32>
    %70 = vector.shape_cast %69 : vector<8x8x32xf32> to vector<64x32xf32>
    %c0_85 = arith.constant 0 : index
    %c544 = arith.constant 544 : index
    %71 = vector.load %arg7[%c0_85, %c544] : memref<64x800xf32, #tpu.memory_space<vmem>>, vector<64x32xf32>
    tpu.vector_store %arg7[%c0_85, %c544], %70 {strides = array<i32>} : memref<64x800xf32, #tpu.memory_space<vmem>>, vector<64x32xf32>,
    %c0_86 = arith.constant 0 : index
    %c3_87 = arith.constant 3 : index
    %c3_88 = arith.constant 3 : index
    %c0_89 = arith.constant 0 : index
    %72 = vector.load %arg1[%c0_86, %c3_87, %c3_88, %c0_89] : memref<1x12x12x32xf32, #tpu.memory_space<vmem>>, vector<1x8x8x32xf32>
    %73 = vector.shape_cast %72 : vector<1x8x8x32xf32> to vector<8x8x32xf32>
    %74 = vector.shape_cast %73 : vector<8x8x32xf32> to vector<64x32xf32>
    %c0_90 = arith.constant 0 : index
    %c576 = arith.constant 576 : index
    %75 = vector.load %arg7[%c0_90, %c576] : memref<64x800xf32, #tpu.memory_space<vmem>>, vector<64x32xf32>
    tpu.vector_store %arg7[%c0_90, %c576], %74 {strides = array<i32>} : memref<64x800xf32, #tpu.memory_space<vmem>>, vector<64x32xf32>,
    %c0_91 = arith.constant 0 : index
    %c3_92 = arith.constant 3 : index
    %c4_93 = arith.constant 4 : index
    %c0_94 = arith.constant 0 : index
    %76 = vector.load %arg1[%c0_91, %c3_92, %c4_93, %c0_94] : memref<1x12x12x32xf32, #tpu.memory_space<vmem>>, vector<1x8x8x32xf32>
    %77 = vector.shape_cast %76 : vector<1x8x8x32xf32> to vector<8x8x32xf32>
    %78 = vector.shape_cast %77 : vector<8x8x32xf32> to vector<64x32xf32>
    %c0_95 = arith.constant 0 : index
    %c608 = arith.constant 608 : index
    %79 = vector.load %arg7[%c0_95, %c608] : memref<64x800xf32, #tpu.memory_space<vmem>>, vector<64x32xf32>
    tpu.vector_store %arg7[%c0_95, %c608], %78 {strides = array<i32>} : memref<64x800xf32, #tpu.memory_space<vmem>>, vector<64x32xf32>,
    %c0_96 = arith.constant 0 : index
    %c4_97 = arith.constant 4 : index
    %c0_98 = arith.constant 0 : index
    %c0_99 = arith.constant 0 : index
    %80 = vector.load %arg1[%c0_96, %c4_97, %c0_98, %c0_99] : memref<1x12x12x32xf32, #tpu.memory_space<vmem>>, vector<1x8x8x32xf32>
    %81 = vector.shape_cast %80 : vector<1x8x8x32xf32> to vector<8x8x32xf32>
    %82 = vector.shape_cast %81 : vector<8x8x32xf32> to vector<64x32xf32>
    %c0_100 = arith.constant 0 : index
    %c640 = arith.constant 640 : index
    %83 = vector.load %arg7[%c0_100, %c640] : memref<64x800xf32, #tpu.memory_space<vmem>>, vector<64x32xf32>
    tpu.vector_store %arg7[%c0_100, %c640], %82 {strides = array<i32>} : memref<64x800xf32, #tpu.memory_space<vmem>>, vector<64x32xf32>,
    %c0_101 = arith.constant 0 : index
    %c4_102 = arith.constant 4 : index
    %c1_103 = arith.constant 1 : index
    %c0_104 = arith.constant 0 : index
    %84 = vector.load %arg1[%c0_101, %c4_102, %c1_103, %c0_104] : memref<1x12x12x32xf32, #tpu.memory_space<vmem>>, vector<1x8x8x32xf32>
    %85 = vector.shape_cast %84 : vector<1x8x8x32xf32> to vector<8x8x32xf32>
    %86 = vector.shape_cast %85 : vector<8x8x32xf32> to vector<64x32xf32>
    %c0_105 = arith.constant 0 : index
    %c672 = arith.constant 672 : index
    %87 = vector.load %arg7[%c0_105, %c672] : memref<64x800xf32, #tpu.memory_space<vmem>>, vector<64x32xf32>
    tpu.vector_store %arg7[%c0_105, %c672], %86 {strides = array<i32>} : memref<64x800xf32, #tpu.memory_space<vmem>>, vector<64x32xf32>,
    %c0_106 = arith.constant 0 : index
    %c4_107 = arith.constant 4 : index
    %c2_108 = arith.constant 2 : index
    %c0_109 = arith.constant 0 : index
    %88 = vector.load %arg1[%c0_106, %c4_107, %c2_108, %c0_109] : memref<1x12x12x32xf32, #tpu.memory_space<vmem>>, vector<1x8x8x32xf32>
    %89 = vector.shape_cast %88 : vector<1x8x8x32xf32> to vector<8x8x32xf32>
    %90 = vector.shape_cast %89 : vector<8x8x32xf32> to vector<64x32xf32>
    %c0_110 = arith.constant 0 : index
    %c704 = arith.constant 704 : index
    %91 = vector.load %arg7[%c0_110, %c704] : memref<64x800xf32, #tpu.memory_space<vmem>>, vector<64x32xf32>
    tpu.vector_store %arg7[%c0_110, %c704], %90 {strides = array<i32>} : memref<64x800xf32, #tpu.memory_space<vmem>>, vector<64x32xf32>,
    %c0_111 = arith.constant 0 : index
    %c4_112 = arith.constant 4 : index
    %c3_113 = arith.constant 3 : index
    %c0_114 = arith.constant 0 : index
    %92 = vector.load %arg1[%c0_111, %c4_112, %c3_113, %c0_114] : memref<1x12x12x32xf32, #tpu.memory_space<vmem>>, vector<1x8x8x32xf32>
    %93 = vector.shape_cast %92 : vector<1x8x8x32xf32> to vector<8x8x32xf32>
    %94 = vector.shape_cast %93 : vector<8x8x32xf32> to vector<64x32xf32>
    %c0_115 = arith.constant 0 : index
    %c736 = arith.constant 736 : index
    %95 = vector.load %arg7[%c0_115, %c736] : memref<64x800xf32, #tpu.memory_space<vmem>>, vector<64x32xf32>
    tpu.vector_store %arg7[%c0_115, %c736], %94 {strides = array<i32>} : memref<64x800xf32, #tpu.memory_space<vmem>>, vector<64x32xf32>,
    %c0_116 = arith.constant 0 : index
    %c4_117 = arith.constant 4 : index
    %c4_118 = arith.constant 4 : index
    %c0_119 = arith.constant 0 : index
    %96 = vector.load %arg1[%c0_116, %c4_117, %c4_118, %c0_119] : memref<1x12x12x32xf32, #tpu.memory_space<vmem>>, vector<1x8x8x32xf32>
    %97 = vector.shape_cast %96 : vector<1x8x8x32xf32> to vector<8x8x32xf32>
    %98 = vector.shape_cast %97 : vector<8x8x32xf32> to vector<64x32xf32>
    %c0_120 = arith.constant 0 : index
    %c768 = arith.constant 768 : index
    %99 = vector.load %arg7[%c0_120, %c768] : memref<64x800xf32, #tpu.memory_space<vmem>>, vector<64x32xf32>
    tpu.vector_store %arg7[%c0_120, %c768], %98 {strides = array<i32>} : memref<64x800xf32, #tpu.memory_space<vmem>>, vector<64x32xf32>,
    %c0_121 = arith.constant 0 : index
    %c0_122 = arith.constant 0 : index
    %100 = vector.load %arg7[%c0_121, %c0_122] : memref<64x800xf32, #tpu.memory_space<vmem>>, vector<64x800xf32>
    %c0_123 = arith.constant 0 : index
    %c0_124 = arith.constant 0 : index
    %101 = vector.load %arg2[%c0_123, %c0_124] : memref<800x64xf32, #tpu.memory_space<vmem>>, vector<800x64xf32>
    %cst = arith.constant dense<0.000000e+00> : vector<64x64xf32>
    %102 = tpu.matmul %100, %101, %cst {dimension_numbers = #tpu.dot_dimension_numbers<[1], [0], [0], [1], [0, 0, 1, 1], [], []>} : vector<64x800xf32>, vector<800x64xf32>, vector<64x64xf32> -> vector<64x64xf32>
    %c0_125 = arith.constant 0 : index
    %c0_126 = arith.constant 0 : index
    %103 = vector.load %arg3[%c0_125, %c0_126] : memref<1x64xf32, #tpu.memory_space<vmem>>, vector<1x64xf32>
    %104 = vector.broadcast %103 : vector<1x64xf32> to vector<64x64xf32>
    %105 = arith.addf %102, %104 : vector<64x64xf32>
    %cst_127 = arith.constant 0.000000e+00 : f32
    %106 = vector.broadcast %cst_127 : f32 to vector<64x64xf32>
    %107 = arith.maximumf %105, %106 : vector<64x64xf32>
    %108 = vector.shape_cast %107 : vector<64x64xf32> to vector<8x8x64xf32>
    %c2_128 = arith.constant 2 : index
    %c2_129 = arith.constant 2 : index
    %c0_130 = arith.constant 0 : index
    %109 = vector.load %arg8[%c2_128, %c2_129, %c0_130] : memref<12x12x64xf32, #tpu.memory_space<vmem>>, vector<8x8x64xf32>
    tpu.vector_store %arg8[%c2_128, %c2_129, %c0_130], %108 {strides = array<i32>} : memref<12x12x64xf32, #tpu.memory_space<vmem>>, vector<8x8x64xf32>,
    %110 = vector.extract_strided_slice %107 {offsets = [0, 0], sizes = [8, 64], strides = [1, 1]} : vector<64x64xf32> to vector<8x64xf32>
    %c0_131 = arith.constant 0 : index
    %c2_132 = arith.constant 2 : index
    %c0_133 = arith.constant 0 : index
    %111 = vector.load %arg8[%c0_131, %c2_132, %c0_133] : memref<12x12x64xf32, #tpu.memory_space<vmem>>, vector<1x8x64xf32>
    %112 = vector.shape_cast %111 : vector<1x8x64xf32> to vector<8x64xf32>
    %113 = vector.shape_cast %110 : vector<8x64xf32> to vector<1x8x64xf32>
    tpu.vector_store %arg8[%c0_131, %c2_132, %c0_133], %113 {strides = array<i32>} : memref<12x12x64xf32, #tpu.memory_space<vmem>>, vector<1x8x64xf32>,
    %114 = vector.extract_strided_slice %107 {offsets = [56, 0], sizes = [8, 64], strides = [1, 1]} : vector<64x64xf32> to vector<8x64xf32>
    %c10 = arith.constant 10 : index
    %c2_134 = arith.constant 2 : index
    %c0_135 = arith.constant 0 : index
    %115 = vector.load %arg8[%c10, %c2_134, %c0_135] : memref<12x12x64xf32, #tpu.memory_space<vmem>>, vector<1x8x64xf32>
    %116 = vector.shape_cast %115 : vector<1x8x64xf32> to vector<8x64xf32>
    %117 = vector.shape_cast %114 : vector<8x64xf32> to vector<1x8x64xf32>
    tpu.vector_store %arg8[%c10, %c2_134, %c0_135], %117 {strides = array<i32>} : memref<12x12x64xf32, #tpu.memory_space<vmem>>, vector<1x8x64xf32>,
    %118 = vector.extract_strided_slice %107 {offsets = [0, 0], sizes = [8, 64], strides = [1, 1]} : vector<64x64xf32> to vector<8x64xf32>
    %c1_136 = arith.constant 1 : index
    %c2_137 = arith.constant 2 : index
    %c0_138 = arith.constant 0 : index
    %119 = vector.load %arg8[%c1_136, %c2_137, %c0_138] : memref<12x12x64xf32, #tpu.memory_space<vmem>>, vector<1x8x64xf32>
    %120 = vector.shape_cast %119 : vector<1x8x64xf32> to vector<8x64xf32>
    %121 = vector.shape_cast %118 : vector<8x64xf32> to vector<1x8x64xf32>
    tpu.vector_store %arg8[%c1_136, %c2_137, %c0_138], %121 {strides = array<i32>} : memref<12x12x64xf32, #tpu.memory_space<vmem>>, vector<1x8x64xf32>,
    %122 = vector.extract_strided_slice %107 {offsets = [56, 0], sizes = [8, 64], strides = [1, 1]} : vector<64x64xf32> to vector<8x64xf32>
    %c11 = arith.constant 11 : index
    %c2_139 = arith.constant 2 : index
    %c0_140 = arith.constant 0 : index
    %123 = vector.load %arg8[%c11, %c2_139, %c0_140] : memref<12x12x64xf32, #tpu.memory_space<vmem>>, vector<1x8x64xf32>
    %124 = vector.shape_cast %123 : vector<1x8x64xf32> to vector<8x64xf32>
    %125 = vector.shape_cast %122 : vector<8x64xf32> to vector<1x8x64xf32>
    tpu.vector_store %arg8[%c11, %c2_139, %c0_140], %125 {strides = array<i32>} : memref<12x12x64xf32, #tpu.memory_space<vmem>>, vector<1x8x64xf32>,
    %c0_141 = arith.constant 0 : index
    %c2_142 = arith.constant 2 : index
    %c0_143 = arith.constant 0 : index
    %126 = vector.load %arg8[%c0_141, %c2_142, %c0_143] : memref<12x12x64xf32, #tpu.memory_space<vmem>>, vector<12x1x64xf32>
    %127 = vector.shape_cast %126 : vector<12x1x64xf32> to vector<12x64xf32>
    %c0_144 = arith.constant 0 : index
    %c0_145 = arith.constant 0 : index
    %c0_146 = arith.constant 0 : index
    %128 = vector.load %arg8[%c0_144, %c0_145, %c0_146] : memref<12x12x64xf32, #tpu.memory_space<vmem>>, vector<12x1x64xf32>
    %129 = vector.shape_cast %128 : vector<12x1x64xf32> to vector<12x64xf32>
    %130 = vector.shape_cast %127 : vector<12x64xf32> to vector<12x1x64xf32>
    tpu.vector_store %arg8[%c0_144, %c0_145, %c0_146], %130 {strides = array<i32>} : memref<12x12x64xf32, #tpu.memory_space<vmem>>, vector<12x1x64xf32>,
    %c0_147 = arith.constant 0 : index
    %c9 = arith.constant 9 : index
    %c0_148 = arith.constant 0 : index
    %131 = vector.load %arg8[%c0_147, %c9, %c0_148] : memref<12x12x64xf32, #tpu.memory_space<vmem>>, vector<12x1x64xf32>
    %132 = vector.shape_cast %131 : vector<12x1x64xf32> to vector<12x64xf32>
    %c0_149 = arith.constant 0 : index
    %c10_150 = arith.constant 10 : index
    %c0_151 = arith.constant 0 : index
    %133 = vector.load %arg8[%c0_149, %c10_150, %c0_151] : memref<12x12x64xf32, #tpu.memory_space<vmem>>, vector<12x1x64xf32>
    %134 = vector.shape_cast %133 : vector<12x1x64xf32> to vector<12x64xf32>
    %135 = vector.shape_cast %132 : vector<12x64xf32> to vector<12x1x64xf32>
    tpu.vector_store %arg8[%c0_149, %c10_150, %c0_151], %135 {strides = array<i32>} : memref<12x12x64xf32, #tpu.memory_space<vmem>>, vector<12x1x64xf32>,
    %c0_152 = arith.constant 0 : index
    %c2_153 = arith.constant 2 : index
    %c0_154 = arith.constant 0 : index
    %136 = vector.load %arg8[%c0_152, %c2_153, %c0_154] : memref<12x12x64xf32, #tpu.memory_space<vmem>>, vector<12x1x64xf32>
    %137 = vector.shape_cast %136 : vector<12x1x64xf32> to vector<12x64xf32>
    %c0_155 = arith.constant 0 : index
    %c1_156 = arith.constant 1 : index
    %c0_157 = arith.constant 0 : index
    %138 = vector.load %arg8[%c0_155, %c1_156, %c0_157] : memref<12x12x64xf32, #tpu.memory_space<vmem>>, vector<12x1x64xf32>
    %139 = vector.shape_cast %138 : vector<12x1x64xf32> to vector<12x64xf32>
    %140 = vector.shape_cast %137 : vector<12x64xf32> to vector<12x1x64xf32>
    tpu.vector_store %arg8[%c0_155, %c1_156, %c0_157], %140 {strides = array<i32>} : memref<12x12x64xf32, #tpu.memory_space<vmem>>, vector<12x1x64xf32>,
    %c0_158 = arith.constant 0 : index
    %c9_159 = arith.constant 9 : index
    %c0_160 = arith.constant 0 : index
    %141 = vector.load %arg8[%c0_158, %c9_159, %c0_160] : memref<12x12x64xf32, #tpu.memory_space<vmem>>, vector<12x1x64xf32>
    %142 = vector.shape_cast %141 : vector<12x1x64xf32> to vector<12x64xf32>
    %c0_161 = arith.constant 0 : index
    %c11_162 = arith.constant 11 : index
    %c0_163 = arith.constant 0 : index
    %143 = vector.load %arg8[%c0_161, %c11_162, %c0_163] : memref<12x12x64xf32, #tpu.memory_space<vmem>>, vector<12x1x64xf32>
    %144 = vector.shape_cast %143 : vector<12x1x64xf32> to vector<12x64xf32>
    %145 = vector.shape_cast %142 : vector<12x64xf32> to vector<12x1x64xf32>
    tpu.vector_store %arg8[%c0_161, %c11_162, %c0_163], %145 {strides = array<i32>} : memref<12x12x64xf32, #tpu.memory_space<vmem>>, vector<12x1x64xf32>,
    %c0_164 = arith.constant 0 : index
    %c0_165 = arith.constant 0 : index
    %c0_166 = arith.constant 0 : index
    %146 = vector.load %arg8[%c0_164, %c0_165, %c0_166] : memref<12x12x64xf32, #tpu.memory_space<vmem>>, vector<8x8x64xf32>
    %147 = vector.shape_cast %146 : vector<8x8x64xf32> to vector<64x64xf32>
    %c0_167 = arith.constant 0 : index
    %c0_168 = arith.constant 0 : index
    %148 = vector.load %arg9[%c0_167, %c0_168] : memref<64x1600xf32, #tpu.memory_space<vmem>>, vector<64x64xf32>
    tpu.vector_store %arg9[%c0_167, %c0_168], %147 {strides = array<i32>} : memref<64x1600xf32, #tpu.memory_space<vmem>>, vector<64x64xf32>,
    %c0_169 = arith.constant 0 : index
    %c1_170 = arith.constant 1 : index
    %c0_171 = arith.constant 0 : index
    %149 = vector.load %arg8[%c0_169, %c1_170, %c0_171] : memref<12x12x64xf32, #tpu.memory_space<vmem>>, vector<8x8x64xf32>
    %150 = vector.shape_cast %149 : vector<8x8x64xf32> to vector<64x64xf32>
    %c0_172 = arith.constant 0 : index
    %c64_173 = arith.constant 64 : index
    %151 = vector.load %arg9[%c0_172, %c64_173] : memref<64x1600xf32, #tpu.memory_space<vmem>>, vector<64x64xf32>
    tpu.vector_store %arg9[%c0_172, %c64_173], %150 {strides = array<i32>} : memref<64x1600xf32, #tpu.memory_space<vmem>>, vector<64x64xf32>,
    %c0_174 = arith.constant 0 : index
    %c2_175 = arith.constant 2 : index
    %c0_176 = arith.constant 0 : index
    %152 = vector.load %arg8[%c0_174, %c2_175, %c0_176] : memref<12x12x64xf32, #tpu.memory_space<vmem>>, vector<8x8x64xf32>
    %153 = vector.shape_cast %152 : vector<8x8x64xf32> to vector<64x64xf32>
    %c0_177 = arith.constant 0 : index
    %c128_178 = arith.constant 128 : index
    %154 = vector.load %arg9[%c0_177, %c128_178] : memref<64x1600xf32, #tpu.memory_space<vmem>>, vector<64x64xf32>
    tpu.vector_store %arg9[%c0_177, %c128_178], %153 {strides = array<i32>} : memref<64x1600xf32, #tpu.memory_space<vmem>>, vector<64x64xf32>,
    %c0_179 = arith.constant 0 : index
    %c3_180 = arith.constant 3 : index
    %c0_181 = arith.constant 0 : index
    %155 = vector.load %arg8[%c0_179, %c3_180, %c0_181] : memref<12x12x64xf32, #tpu.memory_space<vmem>>, vector<8x8x64xf32>
    %156 = vector.shape_cast %155 : vector<8x8x64xf32> to vector<64x64xf32>
    %c0_182 = arith.constant 0 : index
    %c192_183 = arith.constant 192 : index
    %157 = vector.load %arg9[%c0_182, %c192_183] : memref<64x1600xf32, #tpu.memory_space<vmem>>, vector<64x64xf32>
    tpu.vector_store %arg9[%c0_182, %c192_183], %156 {strides = array<i32>} : memref<64x1600xf32, #tpu.memory_space<vmem>>, vector<64x64xf32>,
    %c0_184 = arith.constant 0 : index
    %c4_185 = arith.constant 4 : index
    %c0_186 = arith.constant 0 : index
    %158 = vector.load %arg8[%c0_184, %c4_185, %c0_186] : memref<12x12x64xf32, #tpu.memory_space<vmem>>, vector<8x8x64xf32>
    %159 = vector.shape_cast %158 : vector<8x8x64xf32> to vector<64x64xf32>
    %c0_187 = arith.constant 0 : index
    %c256_188 = arith.constant 256 : index
    %160 = vector.load %arg9[%c0_187, %c256_188] : memref<64x1600xf32, #tpu.memory_space<vmem>>, vector<64x64xf32>
    tpu.vector_store %arg9[%c0_187, %c256_188], %159 {strides = array<i32>} : memref<64x1600xf32, #tpu.memory_space<vmem>>, vector<64x64xf32>,
    %c1_189 = arith.constant 1 : index
    %c0_190 = arith.constant 0 : index
    %c0_191 = arith.constant 0 : index
    %161 = vector.load %arg8[%c1_189, %c0_190, %c0_191] : memref<12x12x64xf32, #tpu.memory_space<vmem>>, vector<8x8x64xf32>
    %162 = vector.shape_cast %161 : vector<8x8x64xf32> to vector<64x64xf32>
    %c0_192 = arith.constant 0 : index
    %c320_193 = arith.constant 320 : index
    %163 = vector.load %arg9[%c0_192, %c320_193] : memref<64x1600xf32, #tpu.memory_space<vmem>>, vector<64x64xf32>
    tpu.vector_store %arg9[%c0_192, %c320_193], %162 {strides = array<i32>} : memref<64x1600xf32, #tpu.memory_space<vmem>>, vector<64x64xf32>,
    %c1_194 = arith.constant 1 : index
    %c1_195 = arith.constant 1 : index
    %c0_196 = arith.constant 0 : index
    %164 = vector.load %arg8[%c1_194, %c1_195, %c0_196] : memref<12x12x64xf32, #tpu.memory_space<vmem>>, vector<8x8x64xf32>
    %165 = vector.shape_cast %164 : vector<8x8x64xf32> to vector<64x64xf32>
    %c0_197 = arith.constant 0 : index
    %c384_198 = arith.constant 384 : index
    %166 = vector.load %arg9[%c0_197, %c384_198] : memref<64x1600xf32, #tpu.memory_space<vmem>>, vector<64x64xf32>
    tpu.vector_store %arg9[%c0_197, %c384_198], %165 {strides = array<i32>} : memref<64x1600xf32, #tpu.memory_space<vmem>>, vector<64x64xf32>,
    %c1_199 = arith.constant 1 : index
    %c2_200 = arith.constant 2 : index
    %c0_201 = arith.constant 0 : index
    %167 = vector.load %arg8[%c1_199, %c2_200, %c0_201] : memref<12x12x64xf32, #tpu.memory_space<vmem>>, vector<8x8x64xf32>
    %168 = vector.shape_cast %167 : vector<8x8x64xf32> to vector<64x64xf32>
    %c0_202 = arith.constant 0 : index
    %c448_203 = arith.constant 448 : index
    %169 = vector.load %arg9[%c0_202, %c448_203] : memref<64x1600xf32, #tpu.memory_space<vmem>>, vector<64x64xf32>
    tpu.vector_store %arg9[%c0_202, %c448_203], %168 {strides = array<i32>} : memref<64x1600xf32, #tpu.memory_space<vmem>>, vector<64x64xf32>,
    %c1_204 = arith.constant 1 : index
    %c3_205 = arith.constant 3 : index
    %c0_206 = arith.constant 0 : index
    %170 = vector.load %arg8[%c1_204, %c3_205, %c0_206] : memref<12x12x64xf32, #tpu.memory_space<vmem>>, vector<8x8x64xf32>
    %171 = vector.shape_cast %170 : vector<8x8x64xf32> to vector<64x64xf32>
    %c0_207 = arith.constant 0 : index
    %c512_208 = arith.constant 512 : index
    %172 = vector.load %arg9[%c0_207, %c512_208] : memref<64x1600xf32, #tpu.memory_space<vmem>>, vector<64x64xf32>
    tpu.vector_store %arg9[%c0_207, %c512_208], %171 {strides = array<i32>} : memref<64x1600xf32, #tpu.memory_space<vmem>>, vector<64x64xf32>,
    %c1_209 = arith.constant 1 : index
    %c4_210 = arith.constant 4 : index
    %c0_211 = arith.constant 0 : index
    %173 = vector.load %arg8[%c1_209, %c4_210, %c0_211] : memref<12x12x64xf32, #tpu.memory_space<vmem>>, vector<8x8x64xf32>
    %174 = vector.shape_cast %173 : vector<8x8x64xf32> to vector<64x64xf32>
    %c0_212 = arith.constant 0 : index
    %c576_213 = arith.constant 576 : index
    %175 = vector.load %arg9[%c0_212, %c576_213] : memref<64x1600xf32, #tpu.memory_space<vmem>>, vector<64x64xf32>
    tpu.vector_store %arg9[%c0_212, %c576_213], %174 {strides = array<i32>} : memref<64x1600xf32, #tpu.memory_space<vmem>>, vector<64x64xf32>,
    %c2_214 = arith.constant 2 : index
    %c0_215 = arith.constant 0 : index
    %c0_216 = arith.constant 0 : index
    %176 = vector.load %arg8[%c2_214, %c0_215, %c0_216] : memref<12x12x64xf32, #tpu.memory_space<vmem>>, vector<8x8x64xf32>
    %177 = vector.shape_cast %176 : vector<8x8x64xf32> to vector<64x64xf32>
    %c0_217 = arith.constant 0 : index
    %c640_218 = arith.constant 640 : index
    %178 = vector.load %arg9[%c0_217, %c640_218] : memref<64x1600xf32, #tpu.memory_space<vmem>>, vector<64x64xf32>
    tpu.vector_store %arg9[%c0_217, %c640_218], %177 {strides = array<i32>} : memref<64x1600xf32, #tpu.memory_space<vmem>>, vector<64x64xf32>,
    %c2_219 = arith.constant 2 : index
    %c1_220 = arith.constant 1 : index
    %c0_221 = arith.constant 0 : index
    %179 = vector.load %arg8[%c2_219, %c1_220, %c0_221] : memref<12x12x64xf32, #tpu.memory_space<vmem>>, vector<8x8x64xf32>
    %180 = vector.shape_cast %179 : vector<8x8x64xf32> to vector<64x64xf32>
    %c0_222 = arith.constant 0 : index
    %c704_223 = arith.constant 704 : index
    %181 = vector.load %arg9[%c0_222, %c704_223] : memref<64x1600xf32, #tpu.memory_space<vmem>>, vector<64x64xf32>
    tpu.vector_store %arg9[%c0_222, %c704_223], %180 {strides = array<i32>} : memref<64x1600xf32, #tpu.memory_space<vmem>>, vector<64x64xf32>,
    %c2_224 = arith.constant 2 : index
    %c2_225 = arith.constant 2 : index
    %c0_226 = arith.constant 0 : index
    %182 = vector.load %arg8[%c2_224, %c2_225, %c0_226] : memref<12x12x64xf32, #tpu.memory_space<vmem>>, vector<8x8x64xf32>
    %183 = vector.shape_cast %182 : vector<8x8x64xf32> to vector<64x64xf32>
    %c0_227 = arith.constant 0 : index
    %c768_228 = arith.constant 768 : index
    %184 = vector.load %arg9[%c0_227, %c768_228] : memref<64x1600xf32, #tpu.memory_space<vmem>>, vector<64x64xf32>
    tpu.vector_store %arg9[%c0_227, %c768_228], %183 {strides = array<i32>} : memref<64x1600xf32, #tpu.memory_space<vmem>>, vector<64x64xf32>,
    %c2_229 = arith.constant 2 : index
    %c3_230 = arith.constant 3 : index
    %c0_231 = arith.constant 0 : index
    %185 = vector.load %arg8[%c2_229, %c3_230, %c0_231] : memref<12x12x64xf32, #tpu.memory_space<vmem>>, vector<8x8x64xf32>
    %186 = vector.shape_cast %185 : vector<8x8x64xf32> to vector<64x64xf32>
    %c0_232 = arith.constant 0 : index
    %c832 = arith.constant 832 : index
    %187 = vector.load %arg9[%c0_232, %c832] : memref<64x1600xf32, #tpu.memory_space<vmem>>, vector<64x64xf32>
    tpu.vector_store %arg9[%c0_232, %c832], %186 {strides = array<i32>} : memref<64x1600xf32, #tpu.memory_space<vmem>>, vector<64x64xf32>,
    %c2_233 = arith.constant 2 : index
    %c4_234 = arith.constant 4 : index
    %c0_235 = arith.constant 0 : index
    %188 = vector.load %arg8[%c2_233, %c4_234, %c0_235] : memref<12x12x64xf32, #tpu.memory_space<vmem>>, vector<8x8x64xf32>
    %189 = vector.shape_cast %188 : vector<8x8x64xf32> to vector<64x64xf32>
    %c0_236 = arith.constant 0 : index
    %c896 = arith.constant 896 : index
    %190 = vector.load %arg9[%c0_236, %c896] : memref<64x1600xf32, #tpu.memory_space<vmem>>, vector<64x64xf32>
    tpu.vector_store %arg9[%c0_236, %c896], %189 {strides = array<i32>} : memref<64x1600xf32, #tpu.memory_space<vmem>>, vector<64x64xf32>,
    %c3_237 = arith.constant 3 : index
    %c0_238 = arith.constant 0 : index
    %c0_239 = arith.constant 0 : index
    %191 = vector.load %arg8[%c3_237, %c0_238, %c0_239] : memref<12x12x64xf32, #tpu.memory_space<vmem>>, vector<8x8x64xf32>
    %192 = vector.shape_cast %191 : vector<8x8x64xf32> to vector<64x64xf32>
    %c0_240 = arith.constant 0 : index
    %c960 = arith.constant 960 : index
    %193 = vector.load %arg9[%c0_240, %c960] : memref<64x1600xf32, #tpu.memory_space<vmem>>, vector<64x64xf32>
    tpu.vector_store %arg9[%c0_240, %c960], %192 {strides = array<i32>} : memref<64x1600xf32, #tpu.memory_space<vmem>>, vector<64x64xf32>,
    %c3_241 = arith.constant 3 : index
    %c1_242 = arith.constant 1 : index
    %c0_243 = arith.constant 0 : index
    %194 = vector.load %arg8[%c3_241, %c1_242, %c0_243] : memref<12x12x64xf32, #tpu.memory_space<vmem>>, vector<8x8x64xf32>
    %195 = vector.shape_cast %194 : vector<8x8x64xf32> to vector<64x64xf32>
    %c0_244 = arith.constant 0 : index
    %c1024 = arith.constant 1024 : index
    %196 = vector.load %arg9[%c0_244, %c1024] : memref<64x1600xf32, #tpu.memory_space<vmem>>, vector<64x64xf32>
    tpu.vector_store %arg9[%c0_244, %c1024], %195 {strides = array<i32>} : memref<64x1600xf32, #tpu.memory_space<vmem>>, vector<64x64xf32>,
    %c3_245 = arith.constant 3 : index
    %c2_246 = arith.constant 2 : index
    %c0_247 = arith.constant 0 : index
    %197 = vector.load %arg8[%c3_245, %c2_246, %c0_247] : memref<12x12x64xf32, #tpu.memory_space<vmem>>, vector<8x8x64xf32>
    %198 = vector.shape_cast %197 : vector<8x8x64xf32> to vector<64x64xf32>
    %c0_248 = arith.constant 0 : index
    %c1088 = arith.constant 1088 : index
    %199 = vector.load %arg9[%c0_248, %c1088] : memref<64x1600xf32, #tpu.memory_space<vmem>>, vector<64x64xf32>
    tpu.vector_store %arg9[%c0_248, %c1088], %198 {strides = array<i32>} : memref<64x1600xf32, #tpu.memory_space<vmem>>, vector<64x64xf32>,
    %c3_249 = arith.constant 3 : index
    %c3_250 = arith.constant 3 : index
    %c0_251 = arith.constant 0 : index
    %200 = vector.load %arg8[%c3_249, %c3_250, %c0_251] : memref<12x12x64xf32, #tpu.memory_space<vmem>>, vector<8x8x64xf32>
    %201 = vector.shape_cast %200 : vector<8x8x64xf32> to vector<64x64xf32>
    %c0_252 = arith.constant 0 : index
    %c1152 = arith.constant 1152 : index
    %202 = vector.load %arg9[%c0_252, %c1152] : memref<64x1600xf32, #tpu.memory_space<vmem>>, vector<64x64xf32>
    tpu.vector_store %arg9[%c0_252, %c1152], %201 {strides = array<i32>} : memref<64x1600xf32, #tpu.memory_space<vmem>>, vector<64x64xf32>,
    %c3_253 = arith.constant 3 : index
    %c4_254 = arith.constant 4 : index
    %c0_255 = arith.constant 0 : index
    %203 = vector.load %arg8[%c3_253, %c4_254, %c0_255] : memref<12x12x64xf32, #tpu.memory_space<vmem>>, vector<8x8x64xf32>
    %204 = vector.shape_cast %203 : vector<8x8x64xf32> to vector<64x64xf32>
    %c0_256 = arith.constant 0 : index
    %c1216 = arith.constant 1216 : index
    %205 = vector.load %arg9[%c0_256, %c1216] : memref<64x1600xf32, #tpu.memory_space<vmem>>, vector<64x64xf32>
    tpu.vector_store %arg9[%c0_256, %c1216], %204 {strides = array<i32>} : memref<64x1600xf32, #tpu.memory_space<vmem>>, vector<64x64xf32>,
    %c4_257 = arith.constant 4 : index
    %c0_258 = arith.constant 0 : index
    %c0_259 = arith.constant 0 : index
    %206 = vector.load %arg8[%c4_257, %c0_258, %c0_259] : memref<12x12x64xf32, #tpu.memory_space<vmem>>, vector<8x8x64xf32>
    %207 = vector.shape_cast %206 : vector<8x8x64xf32> to vector<64x64xf32>
    %c0_260 = arith.constant 0 : index
    %c1280 = arith.constant 1280 : index
    %208 = vector.load %arg9[%c0_260, %c1280] : memref<64x1600xf32, #tpu.memory_space<vmem>>, vector<64x64xf32>
    tpu.vector_store %arg9[%c0_260, %c1280], %207 {strides = array<i32>} : memref<64x1600xf32, #tpu.memory_space<vmem>>, vector<64x64xf32>,
    %c4_261 = arith.constant 4 : index
    %c1_262 = arith.constant 1 : index
    %c0_263 = arith.constant 0 : index
    %209 = vector.load %arg8[%c4_261, %c1_262, %c0_263] : memref<12x12x64xf32, #tpu.memory_space<vmem>>, vector<8x8x64xf32>
    %210 = vector.shape_cast %209 : vector<8x8x64xf32> to vector<64x64xf32>
    %c0_264 = arith.constant 0 : index
    %c1344 = arith.constant 1344 : index
    %211 = vector.load %arg9[%c0_264, %c1344] : memref<64x1600xf32, #tpu.memory_space<vmem>>, vector<64x64xf32>
    tpu.vector_store %arg9[%c0_264, %c1344], %210 {strides = array<i32>} : memref<64x1600xf32, #tpu.memory_space<vmem>>, vector<64x64xf32>,
    %c4_265 = arith.constant 4 : index
    %c2_266 = arith.constant 2 : index
    %c0_267 = arith.constant 0 : index
    %212 = vector.load %arg8[%c4_265, %c2_266, %c0_267] : memref<12x12x64xf32, #tpu.memory_space<vmem>>, vector<8x8x64xf32>
    %213 = vector.shape_cast %212 : vector<8x8x64xf32> to vector<64x64xf32>
    %c0_268 = arith.constant 0 : index
    %c1408 = arith.constant 1408 : index
    %214 = vector.load %arg9[%c0_268, %c1408] : memref<64x1600xf32, #tpu.memory_space<vmem>>, vector<64x64xf32>
    tpu.vector_store %arg9[%c0_268, %c1408], %213 {strides = array<i32>} : memref<64x1600xf32, #tpu.memory_space<vmem>>, vector<64x64xf32>,
    %c4_269 = arith.constant 4 : index
    %c3_270 = arith.constant 3 : index
    %c0_271 = arith.constant 0 : index
    %215 = vector.load %arg8[%c4_269, %c3_270, %c0_271] : memref<12x12x64xf32, #tpu.memory_space<vmem>>, vector<8x8x64xf32>
    %216 = vector.shape_cast %215 : vector<8x8x64xf32> to vector<64x64xf32>
    %c0_272 = arith.constant 0 : index
    %c1472 = arith.constant 1472 : index
    %217 = vector.load %arg9[%c0_272, %c1472] : memref<64x1600xf32, #tpu.memory_space<vmem>>, vector<64x64xf32>
    tpu.vector_store %arg9[%c0_272, %c1472], %216 {strides = array<i32>} : memref<64x1600xf32, #tpu.memory_space<vmem>>, vector<64x64xf32>,
    %c4_273 = arith.constant 4 : index
    %c4_274 = arith.constant 4 : index
    %c0_275 = arith.constant 0 : index
    %218 = vector.load %arg8[%c4_273, %c4_274, %c0_275] : memref<12x12x64xf32, #tpu.memory_space<vmem>>, vector<8x8x64xf32>
    %219 = vector.shape_cast %218 : vector<8x8x64xf32> to vector<64x64xf32>
    %c0_276 = arith.constant 0 : index
    %c1536 = arith.constant 1536 : index
    %220 = vector.load %arg9[%c0_276, %c1536] : memref<64x1600xf32, #tpu.memory_space<vmem>>, vector<64x64xf32>
    tpu.vector_store %arg9[%c0_276, %c1536], %219 {strides = array<i32>} : memref<64x1600xf32, #tpu.memory_space<vmem>>, vector<64x64xf32>,
    %c0_277 = arith.constant 0 : index
    %c0_278 = arith.constant 0 : index
    %221 = vector.load %arg9[%c0_277, %c0_278] : memref<64x1600xf32, #tpu.memory_space<vmem>>, vector<64x1600xf32>
    %c0_279 = arith.constant 0 : index
    %c0_280 = arith.constant 0 : index
    %222 = vector.load %arg4[%c0_279, %c0_280] : memref<1600x24xf32, #tpu.memory_space<vmem>>, vector<1600x24xf32>
    %cst_281 = arith.constant dense<0.000000e+00> : vector<64x24xf32>
    %223 = tpu.matmul %221, %222, %cst_281 {dimension_numbers = #tpu.dot_dimension_numbers<[1], [0], [0], [1], [0, 0, 1, 1], [], []>} : vector<64x1600xf32>, vector<1600x24xf32>, vector<64x24xf32> -> vector<64x24xf32>
    %c0_282 = arith.constant 0 : index
    %c0_283 = arith.constant 0 : index
    %224 = vector.load %arg5[%c0_282, %c0_283] : memref<1x24xf32, #tpu.memory_space<vmem>>, vector<1x24xf32>
    %225 = vector.broadcast %224 : vector<1x24xf32> to vector<64x24xf32>
    %226 = arith.addf %223, %225 : vector<64x24xf32>
    %227 = vector.shape_cast %226 : vector<64x24xf32> to vector<1x64x24xf32>
    %c0_284 = arith.constant 0 : index
    %c0_285 = arith.constant 0 : index
    %c0_286 = arith.constant 0 : index
    %228 = vector.load %arg6[%c0_284, %c0_285, %c0_286] : memref<1x64x24xf32, #tpu.memory_space<vmem>>, vector<1x64x24xf32>
    tpu.vector_store %arg6[%c0_284, %c0_285, %c0_286], %227 {strides = array<i32>} : memref<1x64x24xf32, #tpu.memory_space<vmem>>, vector<1x64x24xf32>,
    return
  }
  func.func @transform_0(%arg0: i32) -> (i32, i32, i32, i32) {
    %c0_i32 = arith.constant 0 : i32
    %c0_i32_0 = arith.constant 0 : i32
    %c0_i32_1 = arith.constant 0 : i32
    %c0_i32_2 = arith.constant 0 : i32
    return %arg0, %c0_i32, %c0_i32_0, %c0_i32_1 : i32, i32, i32, i32
  }
  func.func @transform_1(%arg0: i32) -> (i32, i32) {
    %c0_i32 = arith.constant 0 : i32
    %c0_i32_0 = arith.constant 0 : i32
    %c0_i32_1 = arith.constant 0 : i32
    return %c0_i32, %c0_i32_0 : i32, i32
  }
  func.func @transform_2(%arg0: i32) -> (i32, i32) {
    %c0_i32 = arith.constant 0 : i32
    %c0_i32_0 = arith.constant 0 : i32
    %c0_i32_1 = arith.constant 0 : i32
    return %c0_i32, %c0_i32_0 : i32, i32
  }
  func.func @transform_3(%arg0: i32) -> (i32, i32) {
    %c0_i32 = arith.constant 0 : i32
    %c0_i32_0 = arith.constant 0 : i32
    %c0_i32_1 = arith.constant 0 : i32
    return %c0_i32, %c0_i32_0 : i32, i32
  }
  func.func @transform_4(%arg0: i32) -> (i32, i32) {
    %c0_i32 = arith.constant 0 : i32
    %c0_i32_0 = arith.constant 0 : i32
    %c0_i32_1 = arith.constant 0 : i32
    return %c0_i32, %c0_i32_0 : i32, i32
  }
  func.func @transform_5(%arg0: i32) -> (i32, i32, i32) {
    %c0_i32 = arith.constant 0 : i32
    %c0_i32_0 = arith.constant 0 : i32
    %c0_i32_1 = arith.constant 0 : i32
    return %arg0, %c0_i32, %c0_i32_0 : i32, i32, i32
  }
}

</mosaic_0001>

<bundles_post_ra>
// kernel: _forward.1
= control target key start
LH: loop header
LB: loop body
LE: loop exit
PB: predicated region body
PF: predicated region fallthrough
CT: control target
= control target key end

     0   :  { %s5001_s18 = smov 0   ;;  %s7262_s0 = inlined_call_operand.vmem [shape: f32[2,12,12,32], index: 0, kind: input, shape index: {}]   ;;  %s7263_s1 = inlined_call_operand.vmem [shape: f32[800,64], index: 1, kind: input, shape index: {}]   ;;  %s7264_s2 = inlined_call_operand.vmem [shape: f32[1,64], index: 2, kind: input, shape index: {}]   ;;  %s7265_s3 = inlined_call_operand.vmem [shape: f32[1600,24], index: 3, kind: input, shape index: {}]   ;;  %s7266_s4 = inlined_call_operand.vmem [shape: f32[1,24], index: 4, kind: input, shape index: {}]   ;;  %s7267_s5 = inlined_call_operand.vmem [shape: f32[2,64,24], index: 5, kind: output, shape index: {}]  }
   0x1 LB: > { %s3859_s19 = sadd.s32 4294967295, %s4966_s18   ;;  %p3863_p0 = scmp.ge.s32.totalorder %s4966_s18, 1  ;;  %s4966_s18 = sphi %s5001_s18, %s15_s18  }
   0x2   : > { %p187_p1 = scmp.lt.s32.totalorder %s4966_s18, 3 }
   0x4   : > { %p188_p2 = pnand %p3863_p0, %p187_p1 }
   0x5   : > { %p215_p3 = scmp.lt.s32.totalorder (!%p188_p2), %s3859_s19, 1  ;;  %v1281_v0 = vld [vmem:[%s7263_s1 + $0x80] sm:$0xff] (!%p188_p2)  ;;  %v1282_v1 = vld [vmem:[%s7263_s1 + $0x88] sm:$0xff] (!%p188_p2)  ;;  %v1283_v5 = vld [vmem:[%s7263_s1 + $0x90] sm:$0xff] (!%p188_p2)  ;;  %vm233_vm0 = vcmask (!%p188_p2), 261120   ;;  %s4968_s29 = smov (!%p188_p2), 64  }
   0x6   : > { %191 = sbr.rel (%p188_p2) target bundleno = 1124 (0x464), region = 40  ;;  %v1265_v2 = vld [vmem:[%s7263_s1] sm:$0xff] (!%p188_p2)  ;;  %v4628_v3 = vpack.c.bf16 (!%p188_p2), %v1282_v1, %v1281_v0  ;;  %v1266_v4 = vld [vmem:[%s7263_s1 + $0x8] sm:$0xff] (!%p188_p2)  ;;  %v1284_v6 = vld [vmem:[%s7263_s1 + $0x98] sm:$0xff] (!%p188_p2)  ;;  %s4969_s30 = smov (!%p188_p2), 32   ;;  %vm282_vm1 = vcmask (!%p188_p2), 523520  }
   0x7   : > { %v4630_v7 = vpack.c.bf16 (!%p188_p2), %v1266_v4, %v1265_v2  ;;  %v4632_v8 = vpack.c.bf16 (!%p188_p2), %v1284_v6, %v1283_v5  ;;  %v1267_v9 = vld [vmem:[%s7263_s1 + $0x10] sm:$0xff] (!%p188_p2)  ;;  %v1268_v10 = vld [vmem:[%s7263_s1 + $0x18] sm:$0xff] (!%p188_p2)  ;;  %v1285_v11 = vld [vmem:[%s7263_s1 + $0xa0] sm:$0xff] (!%p188_p2)  ;;  %s4970_s21 = smov (!%p188_p2), 96   ;;  %vm331_vm2 = vcmask (!%p188_p2), 785920   ;;  %vm380_vm3 = vcmask (!%p188_p2), 1048320  }
   0x8   : > { %4629 = vmatprep.subr.bf16.mxu0 (!%p188_p2), %v4628_v3  ;;  %v1286_v12 = vld [vmem:[%s7263_s1 + $0xa8] sm:$0xff] (!%p188_p2)  ;;  %v4634_v13 = vpack.c.bf16 (!%p188_p2), %v1268_v10, %v1267_v9  ;;  %v1269_v15 = vld [vmem:[%s7263_s1 + $0x20] sm:$0xff] (!%p188_p2)  ;;  %v1287_v17 = vld [vmem:[%s7263_s1 + $0xb0] sm:$0xff] (!%p188_p2)  ;;  %vm1825_vm4 = vcmask (!%p188_p2), 523264   ;;  %vm1853_vm5 = vcmask (!%p188_p2), 516096   ;;  %vm1994_vm6 = vcmask (!%p188_p2), 1048064  }
   0x9   : > { %4631 = vmatpush3.bf16.msra.mxu0 (!%p188_p2), %v4630_v7  ;;  %v4636_v14 = vpack.c.bf16 (!%p188_p2), %v1286_v12, %v1285_v11  ;;  %v1270_v16 = vld [vmem:[%s7263_s1 + $0x28] sm:$0xff] (!%p188_p2)  ;;  %v1288_v20 = vld [vmem:[%s7263_s1 + $0xb8] sm:$0xff] (!%p188_p2)  ;;  %v1271_v22 = vld [vmem:[%s7263_s1 + $0x30] sm:$0xff] (!%p188_p2)  ;;  %vm3795_vm7 = vcmask (!%p188_p2), 195584  }
   0xa   : > { %4633 = vmatprep.subr.bf16.mxu0 (!%p188_p2), %v4632_v8  ;;  %v1272_v23 = vld [vmem:[%s7263_s1 + $0x38] sm:$0xff] (!%p188_p2)  ;;  %v4638_v27 = vpack.c.bf16 (!%p188_p2), %v1270_v16, %v1269_v15  ;;  %v1289_v28 = vld [vmem:[%s7263_s1 + $0xc0] sm:$0xff] (!%p188_p2)  ;;  %v4640_v31 = vpack.c.bf16 (!%p188_p2), %v1288_v20, %v1287_v17  ;;  %v1290_v32 = vld [vmem:[%s7263_s1 + $0xc8] sm:$0xff] (!%p188_p2) }
   0xb   : > { %v1273_v39 = vld [vmem:[%s7263_s1 + $0x40] sm:$0xff] (!%p188_p2)  ;;  %v4642_v43 = vpack.c.bf16 (!%p188_p2), %v1272_v23, %v1271_v22  ;;  %v4644_v46 = vpack.c.bf16 (!%p188_p2), %v1290_v32, %v1289_v28  ;;  %v1274_v47 = vld [vmem:[%s7263_s1 + $0x48] sm:$0xff] (!%p188_p2)  ;;  %v1291_v52 = vld [vmem:[%s7263_s1 + $0xd0] sm:$0xff] (!%p188_p2) }
   0xc   : > { %v4646_v56 = vpack.c.bf16 (!%p188_p2), %v1274_v47, %v1273_v39  ;;  %v1292_v61 = vld [vmem:[%s7263_s1 + $0xd8] sm:$0xff] (!%p188_p2)  ;;  %v1275_v0 = vld [vmem:[%s7263_s1 + $0x50] sm:$0xff] (!%p188_p2)  ;;  %v1313_v3 = vld [vmem:[%s7263_s1 + $0x180] sm:$0xff] (!%p188_p2) }
   0xd   : > { %s7269_s19 = smov (!%p215_p3, %s3859_s19), 1  ;;  %4635 = vmatpush3.bf16.msra.mxu0 %v4634_v13  ;;  %v4648_v63 = vpack.c.bf16 %v1292_v61, %v1291_v52  ;;  %v1276_v1 = vld [vmem:[%s7263_s1 + $0x58] sm:$0xff]  ;;  %v1314_v4 = vld [vmem:[%s7263_s1 + $0x188] sm:$0xff]  ;;  %v1293_v5 = vld [vmem:[%s7263_s1 + $0xe0] sm:$0xff] }
   0xe   : > { %s4948_s15 = smul.u32 192, %s7269_s19  ;;  %4637 = vmatprep.subr.bf16.mxu0 %v4636_v14  ;;  %v4650_v2 = vpack.c.bf16 %v1276_v1, %v1275_v0  ;;  %v4660_v6 = vpack.c.bf16 %v1314_v4, %v1313_v3  ;;  %v1294_v7 = vld [vmem:[%s7263_s1 + $0xe8] sm:$0xff]  ;;  %v1297_v8 = vld [vmem:[%s7263_s1 + $0x100] sm:$0xff]  ;;  %v1315_v15 = vld [vmem:[%s7263_s1 + $0x190] sm:$0xff] }
   0xf   : > { %v1298_v9 = vld [vmem:[%s7263_s1 + $0x108] sm:$0xff]  ;;  %v4652_v10 = vpack.c.bf16 %v1294_v7, %v1293_v5  ;;  %v1277_v13 = vld [vmem:[%s7263_s1 + $0x60] sm:$0xff]  ;;  %v1316_v16 = vld [vmem:[%s7263_s1 + $0x198] sm:$0xff] }
  0x10   : > { %s5045_s20 = scalar_lea.vmem %s7262_s0, %s4948_s15  ;;  %v4662_v11 = vpack.c.bf16 %v1298_v9, %v1297_v8  ;;  %v1278_v14 = vld [vmem:[%s7263_s1 + $0x68] sm:$0xff]  ;;  %4661 = vmatprep.subr.bf16.mxu1 %v4660_v6  ;;  %v1295_v20 = vld [vmem:[%s7263_s1 + $0xf0] sm:$0xff]  ;;  %v1300_v23 = vld [vmem:[%s7263_s1 + $0x118] sm:$0xff] }
  0x11   : > { %v5057_v18 = vld [vmem:[%s5045_s20 + $0x11] sm:$0xff]  ;;  %v291_v21 = vld [vmem:[%s5045_s20 + $0x2] sm:$0xff]  ;;  %4639 = vmatpush3.bf16.msra.mxu0 %v4638_v27  ;;  %v4654_v17 = vpack.c.bf16 %v1278_v14, %v1277_v13 }
  0x12   : > { %v3867_v19 = vld [vmem:[%s5045_s20 + $0x10] sm:$0xff]  ;;  %470 = vrot.lane.b32.xlu1 %v5057_v18, %s4968_s29  ;;  %v242_v24 = vld [vmem:[%s5045_s20 + $0x1] sm:$0xff]  ;;  %4641 = vmatprep.subr.bf16.mxu0 %v4640_v31  ;;  %v1280_v27 = vld [vmem:[%s7263_s1 + $0x78] sm:$0xff] }
  0x13   : > { %422 = vrot.lane.b32.xlu0 %v3867_v19, %s4969_s30  ;;  %235 = vst.msk [vmem:[#allocation2 + $0x38] sm:$0xff] %vm233_vm0, %v3867_v19  ;;  %v5076_v25 = vld [vmem:[%s5045_s20 + $0x23] sm:$0xff]  ;;  %v5088_v30 = vld [vmem:[%s5045_s20 + $0x14] sm:$0xff]  ;;  %v4664_v19 = vpack.c.bf16 %v1316_v16, %v1315_v15  ;;  %4663 = vmatpush3.bf16.msra.mxu1 %v4662_v11 }
  0x14   : > { %v5079_v26 = vld [vmem:[%s5045_s20 + $0x20] sm:$0xff]  ;;  %559 = vst.msk [vmem:[#allocation2 + $0x48] sm:$0xff] %vm233_vm0, %v5076_v25  ;;  %v5102_v35 = vld [vmem:[%s5045_s20 + $0x30] sm:$0xff]  ;;  %398 = vst.msk [vmem:[#allocation2 + $0x40] sm:$0xff] %vm233_vm0, %v5088_v30 }
  0x15   : > { %v5085_v29 = vld [vmem:[%s5045_s20 + $0x24] sm:$0xff]  ;;  %236 = vst.msk [vmem:[#allocation2 + $0x70] sm:$0xff] %vm233_vm0, %v5079_v26  ;;  %v5105_v36 = vld [vmem:[%s5045_s20 + $0x13] sm:$0xff]  ;;  %237 = vst.msk [vmem:[#allocation2 + $0xa8] sm:$0xff] %vm233_vm0, %v5102_v35  ;;  %4643 = vmatpush3.bf16.msra.mxu0 %v4642_v43  ;;  %4665 = vmatprep.subr.bf16.mxu1 %v4664_v19 }
  0x16   : > { %v340_v33 = vld [vmem:[%s5045_s20 + $0x3] sm:$0xff]  ;;  %399 = vst.msk [vmem:[#allocation2 + $0x78] sm:$0xff] %vm233_vm0, %v5085_v29  ;;  %307 = vrot.lane.b32.xlu1 %v291_v21, %s4968_s29  ;;  %v5114_v37 = vld [vmem:[%s5045_s20 + $0x12] sm:$0xff]  ;;  %558 = vst.msk [vmem:[#allocation2 + $0x10] sm:$0xff] %vm233_vm0, %v5105_v36  ;;  %4645 = vmatprep.subr.bf16.mxu0 %v4644_v46 }
  0x17   : > { %v5099_v34 = vld [vmem:[%s5045_s20 + $0x22] sm:$0xff]  ;;  %258 = vrot.lane.b32.xlu0 %v242_v24, %s4969_s30  ;;  %v5117_v38 = vld [vmem:[%s5045_s20 + $0x33] sm:$0xff] }
  0x18   : > { %719 = vst.msk [vmem:[#allocation2 + $0x18] sm:$0xff] %vm233_vm0, %v5099_v34  ;;  %v5129_v40 = vld [vmem:[%s5045_s20 + $0x34] sm:$0xff]  ;;  %v5135_v42 = vld [vmem:[%s5045_s20 + $0x40] sm:$0xff]  ;;  %560 = vst.msk [vmem:[#allocation2 + $0x80] sm:$0xff] %vm233_vm0, %v5117_v38 }
  0x19   : > { %v5132_v41 = vld [vmem:[%s5045_s20 + $0x32] sm:$0xff]  ;;  %v5140_v44 = vld [vmem:[%s5045_s20 + $0x43] sm:$0xff]  ;;  %400 = vst.msk [vmem:[#allocation2 + $0xb0] sm:$0xff] %vm233_vm0, %v5129_v40  ;;  %238 = vst.msk [vmem:[#allocation2 + $0xe0] sm:$0xff] %vm233_vm0, %v5135_v42  ;;  %4647 = vmatpush3.bf16.msra.mxu0 %v4646_v56 }
  0x1a   : > { %v5143_v45 = vld [vmem:[%s5045_s20 + $0x44] sm:$0xff]  ;;  %720 = vst.msk [vmem:[#allocation2 + $0x50] sm:$0xff] %vm233_vm0, %v5132_v41  ;;  %v5158_v49 = vld [vmem:[%s5045_s20 + $0x50] sm:$0xff]  ;;  %561 = vst.msk [vmem:[#allocation2 + $0xb8] sm:$0xff] %vm233_vm0, %v5140_v44  ;;  %356 = vrot.lane.b32.xlu1 %v340_v33, %s4970_s21  ;;  %4649 = vmatprep.subr.bf16.mxu0 %v4648_v63 }
  0x1b   : > { %v5155_v48 = vld [vmem:[%s5045_s20 + $0x42] sm:$0xff]  ;;  %v5161_v50 = vld [vmem:[%s5045_s20 + $0x53] sm:$0xff]  ;;  %401 = vst.msk [vmem:[#allocation2 + $0xe8] sm:$0xff] %vm233_vm0, %v5143_v45  ;;  %518 = vrot.lane.b32.xlu0 %v5114_v37, %s4970_s21  ;;  %239 = vst.msk [vmem:[#allocation2 + $0x118] sm:$0xff] %vm233_vm0, %v5158_v49 }
  0x1c   : > { %v5171_v51 = vld [vmem:[%s5045_s20 + $0x54] sm:$0xff]  ;;  %721 = vst.msk [vmem:[#allocation2 + $0x88] sm:$0xff] %vm233_vm0, %v5155_v48  ;;  %562 = vst.msk [vmem:[#allocation2 + $0xf0] sm:$0xff] %vm233_vm0, %v5161_v50  ;;  %v5186_v54 = vld [vmem:[%s5045_s20 + $0x60] sm:$0xff] }
  0x1d   : > { %v5183_v53 = vld [vmem:[%s5045_s20 + $0x52] sm:$0xff]  ;;  %v5189_v55 = vld [vmem:[%s5045_s20 + $0x63] sm:$0xff]  ;;  %402 = vst.msk [vmem:[#allocation2 + $0x120] sm:$0xff] %vm233_vm0, %v5171_v51  ;;  %240 = vst.msk [vmem:[#allocation2 + $0x150] sm:$0xff] %vm233_vm0, %v5186_v54  ;;  %4651 = vmatpush3.bf16.msra.mxu0 %v4650_v2 }
  0x1e   : > { %v389_v57 = vld [vmem:[%s5045_s20 + $0x4] sm:$0xff]  ;;  %722 = vst.msk [vmem:[#allocation2 + $0xc0] sm:$0xff] %vm233_vm0, %v5183_v53  ;;  %563 = vst.msk [vmem:[#allocation2 + $0x128] sm:$0xff] %vm233_vm0, %v5189_v55  ;;  %743 = vrot.lane.b32.xlu1 %v5076_v25, %s4969_s30  ;;  %v5248_v12 = vld [vmem:[%s5045_s20 + $0x70] sm:$0xff]  ;;  %4653 = vmatprep.subr.bf16.mxu0 %v4652_v10 }
  0x1f   : > { %v5195_v58 = vld [vmem:[%s5045_s20 + $0x64] sm:$0xff]  ;;  %397 = vst.msk [vmem:[#allocation2 + $0x8] sm:$0xff] %vm233_vm0, %v389_v57  ;;  %424 = vrot.lane.b32.xlu0 %v5079_v26, %s4969_s30  ;;  %241 = vst.msk [vmem:[#allocation2 + $0x188] sm:$0xff] %vm233_vm0, %v5248_v12  ;;  %v1299_v21 = vld [vmem:[%s7263_s1 + $0x110] sm:$0xff] }
  0x20   : > { %v5204_v59 = vld [vmem:[%s5045_s20 + $0x21] sm:$0xff]  ;;  %403 = vst.msk [vmem:[#allocation2 + $0x158] sm:$0xff] %vm233_vm0, %v5195_v58  ;;  %v1279_v24 = vld [vmem:[%s7263_s1 + $0x70] sm:$0xff]  ;;  %v4666_v28 = vpack.c.bf16 %v1300_v23, %v1299_v21  ;;  %v1320_v56 = vld [vmem:[%s7263_s1 + $0x1b8] sm:$0xff] }
  0x21   : > { %v225_v60 = vld [vmem:[%s5045_s20] sm:$0xff]  ;;  %v1318_v32 = vld [vmem:[%s7263_s1 + $0x1a8] sm:$0xff]  ;;  %v5303_v46 = vld [vmem:[%s5045_s20 + $0x73] sm:$0xff]  ;;  %4655 = vmatpush3.bf16.msra.mxu0 %v4654_v17  ;;  %v4658_v47 = vpack.c.bf16 %v1280_v27, %v1279_v24 }
  0x22   : > { %v5212_v62 = vld [vmem:[%s5045_s20 + $0x62] sm:$0xff]  ;;  %234 = vst.msk [vmem:[#allocation2] sm:$0xff] %vm233_vm0, %v225_v60  ;;  %472 = vrot.lane.b32.xlu1 %v5204_v59, %s4968_s29  ;;  %v1319_v52 = vld [vmem:[%s7263_s1 + $0x1b0] sm:$0xff]  ;;  %564 = vst.msk [vmem:[#allocation2 + $0x160] sm:$0xff] %vm233_vm0, %v5303_v46  ;;  %4667 = vmatpush3.bf16.msra.mxu1 %v4666_v28 }
  0x23   : > { %723 = vst.msk [vmem:[#allocation2 + $0xf8] sm:$0xff] %vm233_vm0, %v5212_v62  ;;  %260 = vrot.lane.b32.xlu0 %v5057_v18, %s4969_s30  ;;  %v1296_v18 = vld [vmem:[%s7263_s1 + $0xf8] sm:$0xff]  ;;  %v1317_v31 = vld [vmem:[%s7263_s1 + $0x1a0] sm:$0xff]  ;;  %v1302_v43 = vld [vmem:[%s7263_s1 + $0x128] sm:$0xff]  ;;  %v4672_v57 = vpack.c.bf16 %v1320_v56, %v1319_v52 }
  0x24   : > { %v4656_v22 = vpack.c.bf16 %v1296_v18, %v1295_v20  ;;  %v1301_v33 = vld [vmem:[%s7263_s1 + $0x120] sm:$0xff]  ;;  %v4668_v39 = vpack.c.bf16 %v1318_v32, %v1317_v31  ;;  %v1303_v60 = vld [vmem:[%s7263_s1 + $0x130] sm:$0xff]  ;;  %v1304_v61 = vld [vmem:[%s7263_s1 + $0x138] sm:$0xff] }
  0x25   : > { %v1321_v63 = vld [vmem:[%s7263_s1 + $0x1c0] sm:$0xff]  ;;  %v1322_v0 = vld [vmem:[%s7263_s1 + $0x1c8] sm:$0xff]  ;;  %v5330_v1 = vld [vmem:[%s5045_s20 + $0x74] sm:$0xff]  ;;  %v4674_v2 = vpack.c.bf16 %v1304_v61, %v1303_v60 }
  0x26   : > { %791 = vrot.lane.b32.xlu1 %v5085_v29, %s4968_s29  ;;  %4657 = vmatprep.subr.bf16.mxu0 %v4656_v22  ;;  %404 = vst.msk [vmem:[#allocation2 + $0x190] sm:$0xff] %vm233_vm0, %v5330_v1  ;;  %v5335_v3 = vld [vmem:[%s5045_s20 + $0x72] sm:$0xff]  ;;  %v4676_v4 = vpack.c.bf16 %v1322_v0, %v1321_v63  ;;  %v1306_v5 = vld [vmem:[%s7263_s1 + $0x148] sm:$0xff]  ;;  %v1325_v13 = vld [vmem:[%s7263_s1 + $0x1e0] sm:$0xff] }
  0x27   : > { %582 = vrot.lane.b32.xlu0 %v5088_v30, %s4969_s30  ;;  %v4670_v30 = vpack.c.bf16 %v1302_v43, %v1301_v33  ;;  %4669 = vmatprep.subr.bf16.mxu1 %v4668_v39  ;;  %724 = vst.msk [vmem:[#allocation2 + $0x130] sm:$0xff] %vm233_vm0, %v5335_v3  ;;  %v1323_v6 = vld [vmem:[%s7263_s1 + $0x1d0] sm:$0xff]  ;;  %v1324_v7 = vld [vmem:[%s7263_s1 + $0x1d8] sm:$0xff]  ;;  %v5356_v8 = vld [vmem:[%s5045_s20 + $0x83] sm:$0xff] }
  0x28   : > { %4659 = vmatpush3.bf16.msra.mxu0 %v4658_v47  ;;  %565 = vst.msk [vmem:[#allocation2 + $0x198] sm:$0xff] %vm233_vm0, %v5356_v8  ;;  %v4680_v10 = vpack.c.bf16 %v1324_v7, %v1323_v6  ;;  %v1308_v11 = vld [vmem:[%s7263_s1 + $0x158] sm:$0xff]  ;;  %v1326_v14 = vld [vmem:[%s7263_s1 + $0x1e8] sm:$0xff]  ;;  %v1309_v17 = vld [vmem:[%s7263_s1 + $0x160] sm:$0xff] }
  0x29   : > { %4671 = vmatpush3.bf16.msra.mxu1 %v4670_v30  ;;  %v4684_v16 = vpack.c.bf16 %v1326_v14, %v1325_v13  ;;  %v1327_v19 = vld [vmem:[%s7263_s1 + $0x1f0] sm:$0xff]  ;;  %v1328_v20 = vld [vmem:[%s7263_s1 + $0x1f8] sm:$0xff]  ;;  %v5400_v27 = vld [vmem:[%s5045_s20 + $0x82] sm:$0xff] }
  0x2a   : > { %520 = vrot.lane.b32.xlu1 %v5099_v34, %s4970_s21  ;;  %4673 = vmatprep.subr.bf16.mxu1 %v4672_v57  ;;  %v3877_v18 = vld [vmem:[%s5045_s20 + $0x31] sm:$0xff]  ;;  %v4688_v22 = vpack.c.bf16 %v1328_v20, %v1327_v19  ;;  %725 = vst.msk [vmem:[#allocation2 + $0x168] sm:$0xff] %vm233_vm0, %v5400_v27  ;;  %v5532_v63 = vld [vmem:[%s5045_s20 + $0xa1] sm:$0xff] }
  0x2b   : > { %309 = vrot.lane.b32.xlu0 %v5114_v37, %s4968_s29  ;;  %v1305_v37 = vld [vmem:[%s7263_s1 + $0x140] sm:$0xff]  ;;  %v1311_v23 = vld [vmem:[%s7263_s1 + $0x170] sm:$0xff]  ;;  %v1312_v24 = vld [vmem:[%s7263_s1 + $0x178] sm:$0xff]  ;;  %887 = vst.msk [vmem:[#allocation2 + $0x1a8] sm:$0xff] %vm233_vm0, %v5532_v63 }
  0x2c   : > { %v4678_v9 = vpack.c.bf16 %v1306_v5, %v1305_v37  ;;  %v4690_v28 = vpack.c.bf16 %v1312_v24, %v1311_v23  ;;  %v5512_v47 = vld [vmem:[%s5045_s20 + $0x92] sm:$0xff]  ;;  %v5553_v5 = vld [vmem:[%s5045_s20 + $0x80] sm:$0xff] }
  0x2d   : > { %4675 = vmatpush3.bf16.msra.mxu1 %v4674_v2  ;;  %726 = vst.msk [vmem:[#allocation2 + $0x1a0] sm:$0xff] %vm233_vm0, %v5512_v47  ;;  %v5527_v57 = vld [vmem:[%s5045_s20 + $0x71] sm:$0xff]  ;;  %v5588_v20 = vld [vmem:[%s5045_s20 + $0x84] sm:$0xff] }
  0x2e   : > { %840 = vrot.lane.b32.xlu1 %v5102_v35, %s4970_s21  ;;  %4677 = vmatprep.subr.bf16.mxu1 %v4676_v4 }
  0x2f   : > { %631 = vrot.lane.b32.xlu0 %v5079_v26, %s4968_s29  ;;  %v1307_v26 = vld [vmem:[%s7263_s1 + $0x150] sm:$0xff] }
  0x30   : > { %v4682_v15 = vpack.c.bf16 %v1308_v11, %v1307_v26 }
  0x31   : > { %4679 = vmatpush3.bf16.msra.mxu1 %v4678_v9 }
  0x32   : > { %679 = vrot.lane.b32.xlu1 %v5204_v59, %s4970_s21  ;;  %4681 = vmatprep.subr.bf16.mxu1 %v4680_v10 }
  0x33   : > { %358 = vrot.lane.b32.xlu0 %v5105_v36, %s4970_s21  ;;  %v1310_v36 = vld [vmem:[%s7263_s1 + $0x168] sm:$0xff] }
  0x34   : > { %v4686_v21 = vpack.c.bf16 %v1310_v36, %v1309_v17  ;;  %v5577_v17 = vld [vmem:[%s5045_s20 + $0x81] sm:$0xff] }
  0x35   : > { %4683 = vmatpush3.bf16.msra.mxu1 %v4682_v15 }
  0x36   : > { %745 = vrot.lane.b32.xlu1 %v5117_v38, %s4969_s30  ;;  %4685 = vmatprep.subr.bf16.mxu1 %v4684_v16  ;;  %v5574_v16 = vld [vmem:[%s5045_s20 + $0xa4] sm:$0xff] }
  0x37   : > { %426 = vrot.lane.b32.xlu0 %v5102_v35, %s4969_s30  ;;  %1207 = vst.msk [vmem:[#allocation2 + $0x180] sm:$0xff] %vm233_vm0, %v5574_v16 }
  0x39   : > { %4687 = vmatpush3.bf16.msra.mxu1 %v4686_v21  ;;  %v1346_v21 = vld [vmem:[%s7263_s1 + $0x288] sm:$0xff] }
  0x3a   : > { %474 = vrot.lane.b32.xlu1 %v3877_v18, %s4968_s29  ;;  %4689 = vmatprep.subr.bf16.mxu1 %v4688_v22 }
  0x3b   : > { %262 = vrot.lane.b32.xlu0 %v5204_v59, %s4969_s30 }
  0x3d   : > { %4691 = vmatpush3.bf16.msra.mxu1 %v4690_v28  ;;  %v1329_v28 = vld [vmem:[%s7263_s1 + $0x200] sm:$0xff] }
  0x3e   : > { %793 = vrot.lane.b32.xlu1 %v5129_v40, %s4968_s29 }
  0x3f   : > { %584 = vrot.lane.b32.xlu0 %v5085_v29, %s4969_s30  ;;  %v5427_v29 = vld [vmem:[%s5045_s20 + $0x41] sm:$0xff] }
  0x42   : > { %522 = vrot.lane.b32.xlu1 %v5132_v41, %s4970_s21 }
  0x43   : > { %311 = vrot.lane.b32.xlu0 %v5099_v34, %s4968_s29  ;;  %v5458_v34 = vld [vmem:[%s5045_s20 + $0x51] sm:$0xff] }
  0x46   : > { %842 = vrot.lane.b32.xlu1 %v5135_v42, %s4970_s21 }
  0x47   : > { %633 = vrot.lane.b32.xlu0 %v5102_v35, %s4968_s29  ;;  %v5485_v35 = vld [vmem:[%s5045_s20 + $0x61] sm:$0xff] }
  0x4a   : > { %681 = vrot.lane.b32.xlu1 %v3877_v18, %s4970_s21 }
  0x4b   : > { %360 = vrot.lane.b32.xlu0 %v5076_v25, %s4970_s21  ;;  %v5441_v25 = vld [vmem:[%s5045_s20 + $0x91] sm:$0xff] }
  0x4c   : > { %886 = vst.msk [vmem:[#allocation2 + $0x170] sm:$0xff] %vm233_vm0, %v5441_v25 }
  0x4e   : > { %747 = vrot.lane.b32.xlu1 %v5140_v44, %s4969_s30 }
  0x4f   : > { %428 = vrot.lane.b32.xlu0 %v5135_v42, %s4969_s30 }
  0x52   : > { %476 = vrot.lane.b32.xlu1 %v5427_v29, %s4968_s29 }
  0x53   : > { %264 = vrot.lane.b32.xlu0 %v3877_v18, %s4969_s30  ;;  %v1345_v18 = vld [vmem:[%s7263_s1 + $0x280] sm:$0xff] }
  0x54   : > { %v4692_v24 = vpack.c.bf16 %v1346_v21, %v1345_v18  ;;  %v1336_v18 = vld [vmem:[%s7263_s1 + $0x238] sm:$0xff] }
  0x56   : > { %795 = vrot.lane.b32.xlu1 %v5143_v45, %s4968_s29  ;;  %4693 = vmatprep.subr.bf16.mxu0 %v4692_v24  ;;  %v1353_v24 = vld [vmem:[%s7263_s1 + $0x2c0] sm:$0xff] }
  0x57   : > { %586 = vrot.lane.b32.xlu0 %v5129_v40, %s4969_s30 }
  0x5a   : > { %524 = vrot.lane.b32.xlu1 %v5155_v48, %s4970_s21 }
  0x5b   : > { %313 = vrot.lane.b32.xlu0 %v5132_v41, %s4968_s29 }
  0x5e   : > { %844 = vrot.lane.b32.xlu1 %v5158_v49, %s4970_s21 }
  0x5f   : > { %635 = vrot.lane.b32.xlu0 %v5135_v42, %s4968_s29 }
  0x62   : > { %683 = vrot.lane.b32.xlu1 %v5427_v29, %s4970_s21 }
  0x63   : > { %362 = vrot.lane.b32.xlu0 %v5117_v38, %s4970_s21 }
  0x66   : > { %749 = vrot.lane.b32.xlu1 %v5161_v50, %s4969_s30 }
  0x67   : > { %430 = vrot.lane.b32.xlu0 %v5158_v49, %s4969_s30 }
  0x6a   : > { %478 = vrot.lane.b32.xlu1 %v5458_v34, %s4968_s29 }
  0x6b   : > { %266 = vrot.lane.b32.xlu0 %v5427_v29, %s4969_s30 }
  0x6e   : > { %797 = vrot.lane.b32.xlu1 %v5171_v51, %s4968_s29 }
  0x6f   : > { %588 = vrot.lane.b32.xlu0 %v5143_v45, %s4969_s30 }
  0x72   : > { %526 = vrot.lane.b32.xlu1 %v5183_v53, %s4970_s21 }
  0x73   : > { %315 = vrot.lane.b32.xlu0 %v5155_v48, %s4968_s29 }
  0x76   : > { %846 = vrot.lane.b32.xlu1 %v5186_v54, %s4970_s21 }
  0x77   : > { %637 = vrot.lane.b32.xlu0 %v5158_v49, %s4968_s29 }
  0x7a   : > { %685 = vrot.lane.b32.xlu1 %v5458_v34, %s4970_s21 }
  0x7b   : > { %364 = vrot.lane.b32.xlu0 %v5140_v44, %s4970_s21 }
  0x7e   : > { %751 = vrot.lane.b32.xlu1 %v5189_v55, %s4969_s30 }
  0x7f   : > { %432 = vrot.lane.b32.xlu0 %v5186_v54, %s4969_s30 }
  0x82   : > { %480 = vrot.lane.b32.xlu1 %v5485_v35, %s4968_s29 }
  0x83   : > { %268 = vrot.lane.b32.xlu0 %v5458_v34, %s4969_s30 }
  0x84   : > { %v471_v42 = vpop.permute.xlu1 %470 }
  0x85   : > { %v423_v49 = vpop.permute.xlu0 %422 }
  0x86   : > { %446 = vst.msk [vmem:[#allocation2 + $0x8] sm:$0xff] %vm282_vm1, %v423_v49  ;;  %799 = vrot.lane.b32.xlu1 %v5195_v58, %s4968_s29 }
  0x87   : > { %590 = vrot.lane.b32.xlu0 %v5171_v51, %s4969_s30  ;;  %494 = vst.msk [vmem:[#allocation2 + $0x8] sm:$0xff] %vm331_vm2, %v471_v42  ;;  %v1330_v42 = vld [vmem:[%s7263_s1 + $0x208] sm:$0xff] }
  0x88   : > { %v308_v59 = vpop.permute.xlu1 %307  ;;  %v4694_v49 = vpack.c.bf16 %v1330_v42, %v1329_v28  ;;  %v1354_v28 = vld [vmem:[%s7263_s1 + $0x2c8] sm:$0xff] }
  0x89   : > { %v259_v31 = vpop.permute.xlu0 %258 }
  0x8a   : > { %283 = vst.msk [vmem:[#allocation2] sm:$0xff] %vm282_vm1, %v259_v31  ;;  %528 = vrot.lane.b32.xlu1 %v5212_v62, %s4970_s21  ;;  %v1347_v31 = vld [vmem:[%s7263_s1 + $0x290] sm:$0xff] }
  0x8b   : > { %317 = vrot.lane.b32.xlu0 %v5183_v53, %s4968_s29  ;;  %332 = vst.msk [vmem:[#allocation2] sm:$0xff] %vm331_vm2, %v308_v59  ;;  %v3987_v59 = vld [vmem:[%s5045_s20 + $0x40] sm:$0xff] }
  0x8c   : > { %v357_v32 = vpop.permute.xlu1 %356  ;;  %1041 = vst.msk [vmem:[#allocation2 + $0x28] sm:$0xff] %vm233_vm0, %v3987_v59 }
  0x8d   : > { %v519_v33 = vpop.permute.xlu0 %518  ;;  %381 = vst.msk [vmem:[#allocation2] sm:$0xff] %vm380_vm3, %v357_v32  ;;  %v1348_v32 = vld [vmem:[%s7263_s1 + $0x298] sm:$0xff] }
  0x8e   : > { %542 = vst.msk [vmem:[#allocation2 + $0x8] sm:$0xff] %vm380_vm3, %v519_v33  ;;  %848 = vrot.lane.b32.xlu1 %v5248_v12, %s4970_s21 }
  0x8f   : > { %639 = vrot.lane.b32.xlu0 %v5186_v54, %s4968_s29 }
  0x90   : > { %v744_v39 = vpop.permute.xlu1 %743 }
  0x91   : > { %v425_v43 = vpop.permute.xlu0 %424  ;;  %767 = vst.msk [vmem:[#allocation2 + $0x18] sm:$0xff] %vm282_vm1, %v744_v39 }
  0x92   : > { %447 = vst.msk [vmem:[#allocation2 + $0x40] sm:$0xff] %vm282_vm1, %v425_v43  ;;  %687 = vrot.lane.b32.xlu1 %v5485_v35, %s4970_s21  ;;  %v4696_v43 = vpack.c.bf16 %v1348_v32, %v1347_v31  ;;  %v4708_v32 = vpack.c.bf16 %v1354_v28, %v1353_v24  ;;  %v3956_v24 = vld [vmem:[%s5045_s20 + $0x41] sm:$0xff]  ;;  %v1363_v28 = vld [vmem:[%s7263_s1 + $0x310] sm:$0xff] }
  0x93   : > { %366 = vrot.lane.b32.xlu0 %v5161_v50, %s4970_s21  ;;  %881 = vst.msk [vmem:[#allocation2 + $0x58] sm:$0xff] %vm233_vm0, %v3956_v24 }
  0x94   : > { %v473_v54 = vpop.permute.xlu1 %472  ;;  %v1209_v30 = vld [vmem:[#allocation2] sm:$0xff] }
  0x95   : > { %v261_v52 = vpop.permute.xlu0 %260  ;;  %v1210_v56 = vld [vmem:[#allocation2 + $0x8] sm:$0xff]  ;;  %495 = vst.msk [vmem:[#allocation2 + $0x40] sm:$0xff] %vm331_vm2, %v473_v54  ;;  %v1331_v54 = vld [vmem:[%s7263_s1 + $0x210] sm:$0xff] }
  0x96   : > { %284 = vst.msk [vmem:[#allocation2 + $0x38] sm:$0xff] %vm282_vm1, %v261_v52  ;;  %1460 = vmatprep.mubr.f32.mxu0 %v1210_v56  ;;  %753 = vrot.lane.b32.xlu1 %v5303_v46, %s4969_s30  ;;  %v1332_v52 = vld [vmem:[%s7263_s1 + $0x218] sm:$0xff] }
  0x97   : > { %434 = vrot.lane.b32.xlu0 %v5248_v12, %s4969_s30  ;;  %1461 = vmatmul.mubr.f32.vlgmr.msra.gmra.mrb[0].mxu0 %v1209_v30  ;;  %v4698_v56 = vpack.c.bf16 %v1332_v52, %v1331_v54  ;;  %v5629_v30 = vld [vmem:[%s5045_s20 + $0x90] sm:$0xff] }
  0x98   : > { %v792_v60 = vpop.permute.xlu1 %791  ;;  %4695 = vmatpush3.bf16.msra.mxu0 %v4694_v49  ;;  %v5697_v54 = vld [vmem:[%s5045_s20 + $0x94] sm:$0xff] }
  0x99   : > { %v583_v61 = vpop.permute.xlu0 %582  ;;  %815 = vst.msk [vmem:[#allocation2 + $0x18] sm:$0xff] %vm331_vm2, %v792_v60  ;;  %4697 = vmatprep.subr.bf16.mxu0 %v4696_v43  ;;  %v1349_v60 = vld [vmem:[%s7263_s1 + $0x2a0] sm:$0xff]  ;;  %v1355_v52 = vld [vmem:[%s7263_s1 + $0x2d0] sm:$0xff] }
  0x9a   : > { %606 = vst.msk [vmem:[#allocation2 + $0x10] sm:$0xff] %vm282_vm1, %v583_v61  ;;  %482 = vrot.lane.b32.xlu1 %v5527_v57, %s4968_s29  ;;  %v1350_v61 = vld [vmem:[%s7263_s1 + $0x2a8] sm:$0xff] }
  0x9b   : > { %270 = vrot.lane.b32.xlu0 %v5485_v35, %s4969_s30 }
  0x9c   : > { %v521_v0 = vpop.permute.xlu1 %520  ;;  %4699 = vmatpush3.bf16.msra.mxu0 %v4698_v56  ;;  %v1356_v56 = vld [vmem:[%s7263_s1 + $0x2d8] sm:$0xff] }
  0x9d   : > { %v310_v2 = vpop.permute.xlu0 %309  ;;  %543 = vst.msk [vmem:[#allocation2 + $0x40] sm:$0xff] %vm380_vm3, %v521_v0 }
  0x9e   : > { %333 = vst.msk [vmem:[#allocation2 + $0x38] sm:$0xff] %vm331_vm2, %v310_v2  ;;  %801 = vrot.lane.b32.xlu1 %v5330_v1, %s4968_s29 }
  0x9f   : > { %592 = vrot.lane.b32.xlu0 %v5195_v58, %s4969_s30 }
  0xa0   : > { %v841_v4 = vpop.permute.xlu1 %840 }
  0xa1   : > { %v632_v37 = vpop.permute.xlu0 %631  ;;  %864 = vst.msk [vmem:[#allocation2 + $0x18] sm:$0xff] %vm380_vm3, %v841_v4 }
  0xa2   : > { %655 = vst.msk [vmem:[#allocation2 + $0x10] sm:$0xff] %vm331_vm2, %v632_v37  ;;  %530 = vrot.lane.b32.xlu1 %v5335_v3, %s4970_s21  ;;  %v4700_v37 = vpack.c.bf16 %v1350_v61, %v1349_v60 }
  0xa3   : > { %319 = vrot.lane.b32.xlu0 %v5212_v62, %s4968_s29 }
  0xa4   : > { %v680_v6 = vpop.permute.xlu1 %679  ;;  %v1217_v9 = vld [vmem:[#allocation2 + $0x40] sm:$0xff]  ;;  %4701 = vmatprep.subr.bf16.mxu0 %v4700_v37 }
  0xa5   : > { %v359_v7 = vpop.permute.xlu0 %358  ;;  %703 = vst.msk [vmem:[#allocation2 + $0x10] sm:$0xff] %vm380_vm3, %v680_v6  ;;  %1465 = vmatprep.mubr.f32.mxu0 %v1217_v9  ;;  %v1333_v6 = vld [vmem:[%s7263_s1 + $0x220] sm:$0xff] }
  0xa6   : > { %382 = vst.msk [vmem:[#allocation2 + $0x38] sm:$0xff] %vm380_vm3, %v359_v7  ;;  %850 = vrot.lane.b32.xlu1 %v5553_v5, %s4970_s21  ;;  %v1334_v7 = vld [vmem:[%s7263_s1 + $0x228] sm:$0xff]  ;;  %v1357_v37 = vld [vmem:[%s7263_s1 + $0x2e0] sm:$0xff] }
  0xa7   : > { %641 = vrot.lane.b32.xlu0 %v5248_v12, %s4968_s29  ;;  %v4702_v9 = vpack.c.bf16 %v1334_v7, %v1333_v6  ;;  %v1358_v6 = vld [vmem:[%s7263_s1 + $0x2e8] sm:$0xff] }
  0xa8   : > { %v746_v10 = vpop.permute.xlu1 %745  ;;  %v1212_v11 = vld [vmem:[#allocation2 + $0x18] sm:$0xff] }
  0xa9   : > { %v427_v26 = vpop.permute.xlu0 %426  ;;  %768 = vst.msk [vmem:[#allocation2 + $0x50] sm:$0xff] %vm282_vm1, %v746_v10  ;;  %1565 = vmatprep.mubr.f32.mxu1 %v1212_v11  ;;  %v1351_v10 = vld [vmem:[%s7263_s1 + $0x2b0] sm:$0xff]  ;;  %4703 = vmatpush3.bf16.msra.mxu0 %v4702_v9 }
  0xaa   : > { %448 = vst.msk [vmem:[#allocation2 + $0x78] sm:$0xff] %vm282_vm1, %v427_v26  ;;  %689 = vrot.lane.b32.xlu1 %v5527_v57, %s4970_s21  ;;  %v1352_v26 = vld [vmem:[%s7263_s1 + $0x2b8] sm:$0xff] }
  0xab   : > { %368 = vrot.lane.b32.xlu0 %v5189_v55, %s4970_s21 }
  0xac   : > { %v475_v13 = vpop.permute.xlu1 %474  ;;  %v1211_v12 = vld [vmem:[#allocation2 + $0x10] sm:$0xff] }
  0xad   : > { %v263_v14 = vpop.permute.xlu0 %262  ;;  %v1216_v15 = vld [vmem:[#allocation2 + $0x38] sm:$0xff]  ;;  %496 = vst.msk [vmem:[#allocation2 + $0x78] sm:$0xff] %vm331_vm2, %v475_v13  ;;  %1566 = vmatmul.mubr.f32.vlgmr.msra.gmra.mrb[0].mxu1 %v1211_v12  ;;  %v4704_v12 = vpack.c.bf16 %v1352_v26, %v1351_v10  ;;  %v4716_v10 = vpack.c.bf16 %v1358_v6, %v1357_v37  ;;  %v1341_v26 = vld [vmem:[%s7263_s1 + $0x260] sm:$0xff] }
  0xae   : > { %285 = vst.msk [vmem:[#allocation2 + $0x70] sm:$0xff] %vm282_vm1, %v263_v14  ;;  %1466 = vmatmul.mubr.f32.gmra.mrb[2].mxu0 %v1216_v15  ;;  %755 = vrot.lane.b32.xlu1 %v5356_v8, %s4969_s30  ;;  %v3955_v15 = vld [vmem:[%s5045_s20 + $0x31] sm:$0xff] }
  0xaf   : > { %436 = vrot.lane.b32.xlu0 %v5553_v5, %s4969_s30  ;;  %880 = vst.msk [vmem:[#allocation2 + $0x20] sm:$0xff] %vm233_vm0, %v3955_v15  ;;  %4705 = vmatprep.subr.bf16.mxu0 %v4704_v12  ;;  %v3954_v15 = vld [vmem:[%s5045_s20 + $0xa0] sm:$0xff]  ;;  %v1359_v12 = vld [vmem:[%s7263_s1 + $0x2f0] sm:$0xff] }
  0xb0   : > { %v794_v36 = vpop.permute.xlu1 %793 }
  0xb1   : > { %v585_v19 = vpop.permute.xlu0 %584  ;;  %816 = vst.msk [vmem:[#allocation2 + $0x50] sm:$0xff] %vm331_vm2, %v794_v36  ;;  %v1361_v36 = vld [vmem:[%s7263_s1 + $0x300] sm:$0xff] }
  0xb2   : > { %607 = vst.msk [vmem:[#allocation2 + $0x48] sm:$0xff] %vm282_vm1, %v585_v19  ;;  %484 = vrot.lane.b32.xlu1 %v5577_v17, %s4968_s29  ;;  %v1362_v19 = vld [vmem:[%s7263_s1 + $0x308] sm:$0xff] }
  0xb3   : > { %272 = vrot.lane.b32.xlu0 %v5527_v57, %s4969_s30  ;;  %v4724_v21 = vpack.c.bf16 %v1362_v19, %v1361_v36 }
  0xb4   : > { %v523_v22 = vpop.permute.xlu1 %522 }
  0xb5   : > { %v312_v23 = vpop.permute.xlu0 %311  ;;  %544 = vst.msk [vmem:[#allocation2 + $0x78] sm:$0xff] %vm380_vm3, %v523_v22  ;;  %4725 = vmatprep.subr.bf16.mxu1 %v4724_v21 }
  0xb6   : > { %334 = vst.msk [vmem:[#allocation2 + $0x70] sm:$0xff] %vm331_vm2, %v312_v23  ;;  %803 = vrot.lane.b32.xlu1 %v5588_v20, %s4968_s29  ;;  %v5676_v23 = vld [vmem:[%s5045_s20 + $0x93] sm:$0xff]  ;;  %4727 = vmatpush3.bf16.msra.mxu1 %v4724_v21 }
  0xb7   : > { %594 = vrot.lane.b32.xlu0 %v5330_v1, %s4969_s30  ;;  %v1344_v21 = vld [vmem:[%s7263_s1 + $0x278] sm:$0xff] }
  0xb8   : > { %v843_v33 = vpop.permute.xlu1 %842 }
  0xb9   : > { %v634_v39 = vpop.permute.xlu0 %633  ;;  %865 = vst.msk [vmem:[#allocation2 + $0x50] sm:$0xff] %vm380_vm3, %v843_v33  ;;  %v1337_v33 = vld [vmem:[%s7263_s1 + $0x240] sm:$0xff] }
  0xba   : > { %656 = vst.msk [vmem:[#allocation2 + $0x48] sm:$0xff] %vm331_vm2, %v634_v39  ;;  %532 = vrot.lane.b32.xlu1 %v5400_v27, %s4970_s21  ;;  %v1338_v39 = vld [vmem:[%s7263_s1 + $0x248] sm:$0xff] }
  0xbb   : > { %321 = vrot.lane.b32.xlu0 %v5335_v3, %s4968_s29  ;;  %v4710_v43 = vpack.c.bf16 %v1338_v39, %v1337_v33 }
  0xbc   : > { %v682_v0 = vpop.permute.xlu1 %681  ;;  %v1224_v4 = vld [vmem:[#allocation2 + $0x78] sm:$0xff] }
  0xbd   : > { %v361_v2 = vpop.permute.xlu0 %360  ;;  %704 = vst.msk [vmem:[#allocation2 + $0x48] sm:$0xff] %vm380_vm3, %v682_v0  ;;  %1470 = vmatprep.mubr.f32.mxu0 %v1224_v4  ;;  %v1339_v0 = vld [vmem:[%s7263_s1 + $0x250] sm:$0xff] }
  0xbe   : > { %383 = vst.msk [vmem:[#allocation2 + $0x70] sm:$0xff] %vm380_vm3, %v361_v2  ;;  %852 = vrot.lane.b32.xlu1 %v5629_v30, %s4970_s21  ;;  %v1340_v2 = vld [vmem:[%s7263_s1 + $0x258] sm:$0xff] }
  0xbf   : > { %643 = vrot.lane.b32.xlu0 %v5553_v5, %s4968_s29  ;;  %v1335_v5 = vld [vmem:[%s7263_s1 + $0x230] sm:$0xff]  ;;  %v4714_v4 = vpack.c.bf16 %v1340_v2, %v1339_v0 }
  0xc0   : > { %v748_v11 = vpop.permute.xlu1 %747  ;;  %v1219_v14 = vld [vmem:[#allocation2 + $0x50] sm:$0xff]  ;;  %v4706_v22 = vpack.c.bf16 %v1336_v18, %v1335_v5  ;;  %v1360_v5 = vld [vmem:[%s7263_s1 + $0x2f8] sm:$0xff] }
  0xc1   : > { %v429_v13 = vpop.permute.xlu0 %428  ;;  %769 = vst.msk [vmem:[#allocation2 + $0x88] sm:$0xff] %vm282_vm1, %v748_v11  ;;  %1570 = vmatprep.mubr.f32.mxu1 %v1219_v14  ;;  %v1342_v11 = vld [vmem:[%s7263_s1 + $0x268] sm:$0xff]  ;;  %v3988_v14 = vld [vmem:[%s5045_s20 + $0x50] sm:$0xff]  ;;  %v4720_v18 = vpack.c.bf16 %v1360_v5, %v1359_v12 }
  0xc2   : > { %449 = vst.msk [vmem:[#allocation2 + $0xb0] sm:$0xff] %vm282_vm1, %v429_v13  ;;  %691 = vrot.lane.b32.xlu1 %v5577_v17, %s4970_s21  ;;  %4707 = vmatpush3.bf16.msra.mxu0 %v4706_v22  ;;  %v4718_v13 = vpack.c.bf16 %v1342_v11, %v1341_v26  ;;  %v4019_v22 = vld [vmem:[%s5045_s20 + $0x44] sm:$0xff]  ;;  %v3957_v0 = vld [vmem:[%s5045_s20 + $0x51] sm:$0xff] }
  0xc3   : > { %370 = vrot.lane.b32.xlu0 %v5303_v46, %s4970_s21  ;;  %4709 = vmatprep.subr.bf16.mxu0 %v4708_v32  ;;  %1042 = vst.msk [vmem:[#allocation2 + $0x60] sm:$0xff] %vm233_vm0, %v3988_v14  ;;  %1201 = vst.msk [vmem:[#allocation2 + $0x30] sm:$0xff] %vm233_vm0, %v4019_v22  ;;  %v3959_v5 = vld [vmem:[%s5045_s20 + $0x71] sm:$0xff] }
  0xc4   : > { %v477_v42 = vpop.permute.xlu1 %476  ;;  %v1218_v31 = vld [vmem:[#allocation2 + $0x48] sm:$0xff]  ;;  %882 = vst.msk [vmem:[#allocation2 + $0x90] sm:$0xff] %vm233_vm0, %v3957_v0  ;;  %884 = vst.msk [vmem:[#allocation2 + $0x100] sm:$0xff] %vm233_vm0, %v3959_v5 }
  0xc5   : > { %v265_v49 = vpop.permute.xlu0 %264  ;;  %v1223_v59 = vld [vmem:[#allocation2 + $0x70] sm:$0xff]  ;;  %497 = vst.msk [vmem:[#allocation2 + $0xb0] sm:$0xff] %vm331_vm2, %v477_v42  ;;  %1571 = vmatmul.mubr.f32.gmra.mrb[2].mxu1 %v1218_v31  ;;  %v1364_v42 = vld [vmem:[%s7263_s1 + $0x318] sm:$0xff] }
  0xc6   : > { %286 = vst.msk [vmem:[#allocation2 + $0xa8] sm:$0xff] %vm282_vm1, %v265_v49  ;;  %1471 = vmatmul.mubr.f32.gmra.mrb[4].mxu0 %v1223_v59  ;;  %1065 = vrot.lane.b32.xlu1 %v5427_v29, %s4969_s30  ;;  %v4712_v29 = vpack.c.bf16 %v1356_v56, %v1355_v52  ;;  %v4728_v59 = vpack.c.bf16 %v1364_v42, %v1363_v28  ;;  %v4020_v31 = vld [vmem:[%s5045_s20 + $0x54] sm:$0xff]  ;;  %v3989_v56 = vld [vmem:[%s5045_s20 + $0x60] sm:$0xff] }
  0xc7   : > { %757 = vrot.lane.b32.xlu0 %v5676_v23, %s4969_s30  ;;  %4711 = vmatpush3.bf16.msra.mxu0 %v4710_v43  ;;  %1202 = vst.msk [vmem:[#allocation2 + $0x68] sm:$0xff] %vm233_vm0, %v4020_v31  ;;  %1043 = vst.msk [vmem:[#allocation2 + $0x98] sm:$0xff] %vm233_vm0, %v3989_v56 }
  0xc8   : > { %v796_v60 = vpop.permute.xlu1 %795  ;;  %4713 = vmatprep.subr.bf16.mxu0 %v4712_v29  ;;  %4729 = vmatprep.subr.bf16.mxu1 %v4728_v59 }
  0xc9   : > { %v587_v61 = vpop.permute.xlu0 %586  ;;  %817 = vst.msk [vmem:[#allocation2 + $0x88] sm:$0xff] %vm331_vm2, %v796_v60  ;;  %4731 = vmatpush3.bf16.msra.mxu1 %v4728_v59 }
  0xca   : > { %608 = vst.msk [vmem:[#allocation2 + $0x80] sm:$0xff] %vm282_vm1, %v587_v61  ;;  %805 = vrot.lane.b32.xlu1 %v5697_v54, %s4968_s29 }
  0xcb   : > { %596 = vrot.lane.b32.xlu0 %v5588_v20, %s4969_s30  ;;  %4715 = vmatpush3.bf16.msra.mxu0 %v4714_v4 }
  0xcc   : > { %v525_v7 = vpop.permute.xlu1 %524  ;;  %4717 = vmatprep.subr.bf16.mxu0 %v4716_v10 }
  0xcd   : > { %v314_v9 = vpop.permute.xlu0 %313  ;;  %545 = vst.msk [vmem:[#allocation2 + $0xb0] sm:$0xff] %vm380_vm3, %v525_v7  ;;  %v4021_v7 = vld [vmem:[%s5045_s20 + $0x64] sm:$0xff] }
  0xce   : > { %335 = vst.msk [vmem:[#allocation2 + $0xa8] sm:$0xff] %vm331_vm2, %v314_v9  ;;  %1113 = vrot.lane.b32.xlu1 %v5155_v48, %s4968_s29 }
  0xcf   : > { %904 = vrot.lane.b32.xlu0 %v5132_v41, %s4969_s30  ;;  %4719 = vmatpush3.bf16.msra.mxu0 %v4718_v13  ;;  %v1343_v41 = vld [vmem:[%s7263_s1 + $0x270] sm:$0xff]  ;;  %1203 = vst.msk [vmem:[#allocation2 + $0xa0] sm:$0xff] %vm233_vm0, %v4021_v7  ;;  %v3991_v13 = vld [vmem:[%s5045_s20 + $0x80] sm:$0xff] }
  0xd0   : > { %v845_v36 = vpop.permute.xlu1 %844  ;;  %v4722_v49 = vpack.c.bf16 %v1344_v21, %v1343_v41  ;;  %4721 = vmatprep.subr.bf16.mxu0 %v4720_v18  ;;  %1045 = vst.msk [vmem:[#allocation2 + $0x108] sm:$0xff] %vm233_vm0, %v3991_v13  ;;  %v3992_v41 = vld [vmem:[%s5045_s20 + $0x90] sm:$0xff]  ;;  %v4023_v21 = vld [vmem:[%s5045_s20 + $0x84] sm:$0xff] }
  0xd1   : > { %v636_v19 = vpop.permute.xlu0 %635  ;;  %866 = vst.msk [vmem:[#allocation2 + $0x88] sm:$0xff] %vm380_vm3, %v845_v36 }
  0xd2   : > { %657 = vst.msk [vmem:[#allocation2 + $0x80] sm:$0xff] %vm331_vm2, %v636_v19  ;;  %854 = vrot.lane.b32.xlu1 %v3954_v15, %s4970_s21 }
  0xd3   : > { %645 = vrot.lane.b32.xlu0 %v5629_v30, %s4968_s29  ;;  %4723 = vmatpush3.bf16.msra.mxu0 %v4722_v49  ;;  %1046 = vst.msk [vmem:[#allocation2 + $0x140] sm:$0xff] %vm233_vm0, %v3992_v41  ;;  %1205 = vst.msk [vmem:[#allocation2 + $0x110] sm:$0xff] %vm233_vm0, %v4023_v21  ;;  %v3993_v49 = vld [vmem:[%s5045_s20 + $0xa0] sm:$0xff]  ;;  %v1215_v21 = vld [vmem:[#allocation2 + $0x30] sm:$0xff] }
  0xd4   : > { %v684_v32 = vpop.permute.xlu1 %683  ;;  %v1231_v39 = vld [vmem:[#allocation2 + $0xb0] sm:$0xff]  ;;  %1047 = vst.msk [vmem:[#allocation2 + $0x178] sm:$0xff] %vm233_vm0, %v3993_v49 }
  0xd5   : > { %v363_v33 = vpop.permute.xlu0 %362  ;;  %705 = vst.msk [vmem:[#allocation2 + $0x80] sm:$0xff] %vm380_vm3, %v684_v32  ;;  %1475 = vmatprep.mubr.f32.mxu0 %v1231_v39 }
  0xd6   : > { %384 = vst.msk [vmem:[#allocation2 + $0xa8] sm:$0xff] %vm380_vm3, %v363_v33  ;;  %1161 = vrot.lane.b32.xlu1 %v5140_v44, %s4970_s21 }
  0xd7   : > { %952 = vrot.lane.b32.xlu0 %v5117_v38, %s4968_s29 }
  0xd8   : > { %v750_v30 = vpop.permute.xlu1 %749  ;;  %v1226_v52 = vld [vmem:[#allocation2 + $0x88] sm:$0xff] }
  0xd9   : > { %v431_v43 = vpop.permute.xlu0 %430  ;;  %770 = vst.msk [vmem:[#allocation2 + $0xc0] sm:$0xff] %vm282_vm1, %v750_v30  ;;  %1575 = vmatprep.mubr.f32.mxu1 %v1226_v52  ;;  %v4009_v52 = vld [vmem:[%s5045_s20 + $0xa2] sm:$0xff] }
  0xda   : > { %450 = vst.msk [vmem:[#allocation2 + $0xe8] sm:$0xff] %vm282_vm1, %v431_v43  ;;  %1000 = vrot.lane.b32.xlu1 %v5129_v40, %s4970_s21  ;;  %v3994_v43 = vld [vmem:[%s5045_s20 + $0xb0] sm:$0xff] }
  0xdb   : > { %693 = vrot.lane.b32.xlu0 %v5441_v25, %s4970_s21  ;;  %1048 = vst.msk [vmem:[#allocation2 + $0x1b0] sm:$0xff] %vm233_vm0, %v3994_v43 }
  0xdc   : > { %v479_v60 = vpop.permute.xlu1 %478  ;;  %v1225_v29 = vld [vmem:[#allocation2 + $0x80] sm:$0xff] }
  0xdd   : > { %v267_v38 = vpop.permute.xlu0 %266  ;;  %v1230_v61 = vld [vmem:[#allocation2 + $0xa8] sm:$0xff]  ;;  %498 = vst.msk [vmem:[#allocation2 + $0xe8] sm:$0xff] %vm331_vm2, %v479_v60  ;;  %1576 = vmatmul.mubr.f32.gmra.mrb[4].mxu1 %v1225_v29  ;;  %v4002_v29 = vld [vmem:[%s5045_s20 + $0xb1] sm:$0xff] }
  0xde   : > { %287 = vst.msk [vmem:[#allocation2 + $0xe0] sm:$0xff] %vm282_vm1, %v267_v38  ;;  %1476 = vmatmul.mubr.f32.gmra.mrb[6].mxu0 %v1230_v61  ;;  %906 = vrot.lane.b32.xlu1 %v5155_v48, %s4969_s30  ;;  %v3990_v48 = vld [vmem:[%s5045_s20 + $0x70] sm:$0xff] }
  0xdf   : > { %1067 = vrot.lane.b32.xlu0 %v5458_v34, %s4969_s30  ;;  %1044 = vst.msk [vmem:[#allocation2 + $0xd0] sm:$0xff] %vm233_vm0, %v3990_v48 }
  0xe0   : > { %v798_v40 = vpop.permute.xlu1 %797 }
  0xe1   : > { %v589_v2 = vpop.permute.xlu0 %588  ;;  %818 = vst.msk [vmem:[#allocation2 + $0xc0] sm:$0xff] %vm331_vm2, %v798_v40 }
  0xe2   : > { %609 = vst.msk [vmem:[#allocation2 + $0xb8] sm:$0xff] %vm282_vm1, %v589_v2  ;;  %954 = vrot.lane.b32.xlu1 %v5140_v44, %s4968_s29  ;;  %v3958_v44 = vld [vmem:[%s5045_s20 + $0x61] sm:$0xff] }
  0xe3   : > { %1115 = vrot.lane.b32.xlu0 %v5183_v53, %s4968_s29  ;;  %883 = vst.msk [vmem:[#allocation2 + $0xc8] sm:$0xff] %vm233_vm0, %v3958_v44 }
  0xe4   : > { %v527_v34 = vpop.permute.xlu1 %526 }
  0xe5   : > { %v316_v4 = vpop.permute.xlu0 %315  ;;  %546 = vst.msk [vmem:[#allocation2 + $0xe8] sm:$0xff] %vm380_vm3, %v527_v34  ;;  %v4010_v34 = vld [vmem:[%s5045_s20 + $0xb2] sm:$0xff] }
  0xe6   : > { %336 = vst.msk [vmem:[#allocation2 + $0xe0] sm:$0xff] %vm331_vm2, %v316_v4  ;;  %1002 = vrot.lane.b32.xlu1 %v5143_v45, %s4970_s21  ;;  %v4022_v45 = vld [vmem:[%s5045_s20 + $0x74] sm:$0xff] }
  0xe7   : > { %1163 = vrot.lane.b32.xlu0 %v5161_v50, %s4970_s21  ;;  %1204 = vst.msk [vmem:[#allocation2 + $0xd8] sm:$0xff] %vm233_vm0, %v4022_v45 }
  0xe8   : > { %v847_v37 = vpop.permute.xlu1 %846 }
  0xe9   : > { %v638_v6 = vpop.permute.xlu0 %637  ;;  %867 = vst.msk [vmem:[#allocation2 + $0xc0] sm:$0xff] %vm380_vm3, %v847_v37 }
  0xea   : > { %658 = vst.msk [vmem:[#allocation2 + $0xb8] sm:$0xff] %vm331_vm2, %v638_v6  ;;  %908 = vrot.lane.b32.xlu1 %v5183_v53, %s4969_s30 }
  0xeb   : > { %1069 = vrot.lane.b32.xlu0 %v5485_v35, %s4969_s30 }
  0xec   : > { %v686_v9 = vpop.permute.xlu1 %685  ;;  %v1238_v26 = vld [vmem:[#allocation2 + $0xe8] sm:$0xff] }
  0xed   : > { %v365_v10 = vpop.permute.xlu0 %364  ;;  %706 = vst.msk [vmem:[#allocation2 + $0xb8] sm:$0xff] %vm380_vm3, %v686_v9  ;;  %1480 = vmatprep.mubr.f32.mxu0 %v1238_v26 }
  0xee   : > { %385 = vst.msk [vmem:[#allocation2 + $0xe0] sm:$0xff] %vm380_vm3, %v365_v10  ;;  %956 = vrot.lane.b32.xlu1 %v5161_v50, %s4968_s29 }
  0xef   : > { %1117 = vrot.lane.b32.xlu0 %v5212_v62, %s4968_s29 }
  0xf0   : > { %v752_v53 = vpop.permute.xlu1 %751  ;;  %v1233_v11 = vld [vmem:[#allocation2 + $0xc0] sm:$0xff] }
  0xf1   : > { %v433_v35 = vpop.permute.xlu0 %432  ;;  %771 = vst.msk [vmem:[#allocation2 + $0xf8] sm:$0xff] %vm282_vm1, %v752_v53  ;;  %1580 = vmatprep.mubr.f32.mxu1 %v1233_v11 }
  0xf2   : > { %451 = vst.msk [vmem:[#allocation2 + $0x120] sm:$0xff] %vm282_vm1, %v433_v35  ;;  %1004 = vrot.lane.b32.xlu1 %v5171_v51, %s4970_s21 }
  0xf3   : > { %1165 = vrot.lane.b32.xlu0 %v5189_v55, %s4970_s21 }
  0xf4   : > { %v481_v14 = vpop.permute.xlu1 %480  ;;  %v1232_v12 = vld [vmem:[#allocation2 + $0xb8] sm:$0xff] }
  0xf5   : > { %v269_v50 = vpop.permute.xlu0 %268  ;;  %v1237_v15 = vld [vmem:[#allocation2 + $0xe0] sm:$0xff]  ;;  %499 = vst.msk [vmem:[#allocation2 + $0x120] sm:$0xff] %vm331_vm2, %v481_v14  ;;  %1581 = vmatmul.mubr.f32.gmra.mrb[6].mxu1 %v1232_v12 }
  0xf6   : > { %288 = vst.msk [vmem:[#allocation2 + $0x118] sm:$0xff] %vm282_vm1, %v269_v50  ;;  %1481 = vmatmul.mubr.f32.gmra.mrb[8].mxu0 %v1237_v15  ;;  %910 = vrot.lane.b32.xlu1 %v5212_v62, %s4969_s30 }
  0xf7   : > { %1071 = vrot.lane.b32.xlu0 %v5527_v57, %s4969_s30 }
  0xf8   : > { %v800_v51 = vpop.permute.xlu1 %799 }
  0xf9   : > { %v591_v36 = vpop.permute.xlu0 %590  ;;  %819 = vst.msk [vmem:[#allocation2 + $0xf8] sm:$0xff] %vm331_vm2, %v800_v51 }
  0xfa   : > { %610 = vst.msk [vmem:[#allocation2 + $0xf0] sm:$0xff] %vm282_vm1, %v591_v36  ;;  %958 = vrot.lane.b32.xlu1 %v5189_v55, %s4968_s29  ;;  %v3960_v55 = vld [vmem:[%s5045_s20 + $0x81] sm:$0xff] }
  0xfb   : > { %1119 = vrot.lane.b32.xlu0 %v5335_v3, %s4968_s29  ;;  %885 = vst.msk [vmem:[#allocation2 + $0x138] sm:$0xff] %vm233_vm0, %v3960_v55 }
  0xfc   : > { %v529_v57 = vpop.permute.xlu1 %528 }
  0xfd   : > { %v318_v19 = vpop.permute.xlu0 %317  ;;  %547 = vst.msk [vmem:[#allocation2 + $0x120] sm:$0xff] %vm380_vm3, %v529_v57 }
  0xfe   : > { %337 = vst.msk [vmem:[#allocation2 + $0x118] sm:$0xff] %vm331_vm2, %v318_v19  ;;  %1006 = vrot.lane.b32.xlu1 %v5195_v58, %s4970_s21  ;;  %v4024_v58 = vld [vmem:[%s5045_s20 + $0x94] sm:$0xff] }
  0xff   : > { %1167 = vrot.lane.b32.xlu0 %v5303_v46, %s4970_s21  ;;  %1206 = vst.msk [vmem:[#allocation2 + $0x148] sm:$0xff] %vm233_vm0, %v4024_v58 }
 0x100   : > { %v849_v62 = vpop.permute.xlu1 %848 }
 0x101   : > { %v640_v18 = vpop.permute.xlu0 %639  ;;  %868 = vst.msk [vmem:[#allocation2 + $0xf8] sm:$0xff] %vm380_vm3, %v849_v62 }
 0x102   : > { %659 = vst.msk [vmem:[#allocation2 + $0xf0] sm:$0xff] %vm331_vm2, %v640_v18  ;;  %912 = vrot.lane.b32.xlu1 %v5335_v3, %s4969_s30 }
 0x103   : > { %1073 = vrot.lane.b32.xlu0 %v5577_v17, %s4969_s30 }
 0x104   : > { %v688_v22 = vpop.permute.xlu1 %687  ;;  %v1245_v28 = vld [vmem:[#allocation2 + $0x120] sm:$0xff] }
 0x105   : > { %v367_v24 = vpop.permute.xlu0 %366  ;;  %707 = vst.msk [vmem:[#allocation2 + $0xf0] sm:$0xff] %vm380_vm3, %v688_v22  ;;  %1485 = vmatprep.mubr.f32.mxu0 %v1245_v28 }
 0x106   : > { %386 = vst.msk [vmem:[#allocation2 + $0x118] sm:$0xff] %vm380_vm3, %v367_v24  ;;  %960 = vrot.lane.b32.xlu1 %v5303_v46, %s4968_s29 }
 0x107   : > { %1121 = vrot.lane.b32.xlu0 %v5400_v27, %s4968_s29 }
 0x108   : > { %v754_v3 = vpop.permute.xlu1 %753  ;;  %v1240_v42 = vld [vmem:[#allocation2 + $0xf8] sm:$0xff] }
 0x109   : > { %v435_v17 = vpop.permute.xlu0 %434  ;;  %772 = vst.msk [vmem:[#allocation2 + $0x130] sm:$0xff] %vm282_vm1, %v754_v3  ;;  %1585 = vmatprep.mubr.f32.mxu1 %v1240_v42  ;;  %v1222_v3 = vld [vmem:[#allocation2 + $0x68] sm:$0xff] }
 0x10a   : > { %452 = vst.msk [vmem:[#allocation2 + $0x158] sm:$0xff] %vm282_vm1, %v435_v17  ;;  %1008 = vrot.lane.b32.xlu1 %v5330_v1, %s4970_s21  ;;  %v1229_v17 = vld [vmem:[#allocation2 + $0xa0] sm:$0xff] }
 0x10b   : > { %1169 = vrot.lane.b32.xlu0 %v5356_v8, %s4970_s21 }
 0x10c   : > { %v483_v59 = vpop.permute.xlu1 %482  ;;  %v1239_v32 = vld [vmem:[#allocation2 + $0xf0] sm:$0xff] }
 0x10d   : > { %v271_v31 = vpop.permute.xlu0 %270  ;;  %v1244_v46 = vld [vmem:[#allocation2 + $0x118] sm:$0xff]  ;;  %500 = vst.msk [vmem:[#allocation2 + $0x158] sm:$0xff] %vm331_vm2, %v483_v59  ;;  %1586 = vmatmul.mubr.f32.gmra.mrb[8].mxu1 %v1239_v32 }
 0x10e   : > { %289 = vst.msk [vmem:[#allocation2 + $0x150] sm:$0xff] %vm282_vm1, %v271_v31  ;;  %1486 = vmatmul.mubr.f32.gmra.mrb[10].mxu0 %v1244_v46  ;;  %914 = vrot.lane.b32.xlu1 %v5400_v27, %s4969_s30  ;;  %v1236_v59 = vld [vmem:[#allocation2 + $0xd8] sm:$0xff]  ;;  %v1243_v31 = vld [vmem:[#allocation2 + $0x110] sm:$0xff] }
 0x10f   : > { %1075 = vrot.lane.b32.xlu0 %v5441_v25, %s4969_s30 }
 0x110   : > { %v802_v1 = vpop.permute.xlu1 %801 }
 0x111   : > { %v593_v33 = vpop.permute.xlu0 %592  ;;  %820 = vst.msk [vmem:[#allocation2 + $0x130] sm:$0xff] %vm331_vm2, %v802_v1  ;;  %v1250_v1 = vld [vmem:[#allocation2 + $0x148] sm:$0xff] }
 0x112   : > { %611 = vst.msk [vmem:[#allocation2 + $0x128] sm:$0xff] %vm282_vm1, %v593_v33  ;;  %962 = vrot.lane.b32.xlu1 %v5356_v8, %s4968_s29  ;;  %v4026_v8 = vld [vmem:[%s5045_s20 + $0xb4] sm:$0xff]  ;;  %v1257_v33 = vld [vmem:[#allocation2 + $0x180] sm:$0xff] }
 0x113   : > { %1123 = vrot.lane.b32.xlu0 %v5512_v47, %s4968_s29  ;;  %1208 = vst.msk [vmem:[#allocation2 + $0x1b8] sm:$0xff] %vm233_vm0, %v4026_v8 }
 0x114   : > { %v531_v39 = vpop.permute.xlu1 %530 }
 0x115   : > { %v320_v25 = vpop.permute.xlu0 %319  ;;  %548 = vst.msk [vmem:[#allocation2 + $0x158] sm:$0xff] %vm380_vm3, %v531_v39 }
 0x116   : > { %338 = vst.msk [vmem:[#allocation2 + $0x150] sm:$0xff] %vm331_vm2, %v320_v25  ;;  %1010 = vrot.lane.b32.xlu1 %v5588_v20, %s4970_s21 }
 0x117   : > { %1171 = vrot.lane.b32.xlu0 %v5676_v23, %s4970_s21 }
 0x118   : > { %v851_v27 = vpop.permute.xlu1 %850 }
 0x119   : > { %v642_v30 = vpop.permute.xlu0 %641  ;;  %869 = vst.msk [vmem:[#allocation2 + $0x130] sm:$0xff] %vm380_vm3, %v851_v27 }
 0x11a   : > { %660 = vst.msk [vmem:[#allocation2 + $0x128] sm:$0xff] %vm331_vm2, %v642_v30  ;;  %916 = vrot.lane.b32.xlu1 %v5512_v47, %s4969_s30  ;;  %v1264_v43 = vld [vmem:[#allocation2 + $0x1b8] sm:$0xff] }
 0x11b   : > { %1077 = vrot.lane.b32.xlu0 %v5532_v63, %s4969_s30  ;;  %v4017_v63 = vld [vmem:[%s5045_s20 + $0xa3] sm:$0xff] }
 0x11c   : > { %v690_v20 = vpop.permute.xlu1 %689  ;;  %v1252_v60 = vld [vmem:[#allocation2 + $0x158] sm:$0xff] }
 0x11d   : > { %v369_v56 = vpop.permute.xlu0 %368  ;;  %708 = vst.msk [vmem:[#allocation2 + $0x128] sm:$0xff] %vm380_vm3, %v690_v20  ;;  %1490 = vmatprep.mubr.f32.mxu0 %v1252_v60 }
 0x11e   : > { %387 = vst.msk [vmem:[#allocation2 + $0x150] sm:$0xff] %vm380_vm3, %v369_v56  ;;  %964 = vrot.lane.b32.xlu1 %v5676_v23, %s4968_s29 }
 0x11f   : > { %1125 = vrot.lane.b32.xlu0 %v4009_v52, %s4968_s29 }
 0x120   : > { %v756_v47 = vpop.permute.xlu1 %755  ;;  %v1247_v61 = vld [vmem:[#allocation2 + $0x130] sm:$0xff] }
 0x121   : > { %v437_v38 = vpop.permute.xlu0 %436  ;;  %773 = vst.msk [vmem:[#allocation2 + $0x168] sm:$0xff] %vm282_vm1, %v756_v47  ;;  %1590 = vmatprep.mubr.f32.mxu1 %v1247_v61 }
 0x122   : > { %453 = vst.msk [vmem:[#allocation2 + $0x190] sm:$0xff] %vm282_vm1, %v437_v38  ;;  %1012 = vrot.lane.b32.xlu1 %v5697_v54, %s4970_s21  ;;  %v4018_v54 = vld [vmem:[%s5045_s20 + $0xb3] sm:$0xff] }
 0x123   : > { %1173 = vrot.lane.b32.xlu0 %v4017_v63, %s4970_s21 }
 0x124   : > { %v485_v0 = vpop.permute.xlu1 %484  ;;  %v1246_v2 = vld [vmem:[#allocation2 + $0x128] sm:$0xff] }
 0x125   : > { %v273_v40 = vpop.permute.xlu0 %272  ;;  %v1251_v23 = vld [vmem:[#allocation2 + $0x150] sm:$0xff]  ;;  %501 = vst.msk [vmem:[#allocation2 + $0x190] sm:$0xff] %vm331_vm2, %v485_v0  ;;  %1591 = vmatmul.mubr.f32.gmra.mrb[10].mxu1 %v1246_v2 }
 0x126   : > { %290 = vst.msk [vmem:[#allocation2 + $0x188] sm:$0xff] %vm282_vm1, %v273_v40  ;;  %1491 = vmatmul.mubr.f32.gmra.mrb[12].mxu0 %v1251_v23  ;;  %918 = vrot.lane.b32.xlu1 %v4009_v52, %s4969_s30 }
 0x127   : > { %1079 = vrot.lane.b32.xlu0 %v4002_v29, %s4969_s30 }
 0x128   : > { %v804_v4 = vpop.permute.xlu1 %803 }
 0x129   : > { %v595_v48 = vpop.permute.xlu0 %594  ;;  %821 = vst.msk [vmem:[#allocation2 + $0x168] sm:$0xff] %vm331_vm2, %v804_v4 }
 0x12a   : > { %612 = vst.msk [vmem:[#allocation2 + $0x160] sm:$0xff] %vm282_vm1, %v595_v48  ;;  %966 = vrot.lane.b32.xlu1 %v4017_v63, %s4968_s29 }
 0x12b   : > { %1127 = vrot.lane.b32.xlu0 %v4010_v34, %s4968_s29 }
 0x12c   : > { %v533_v37 = vpop.permute.xlu1 %532 }
 0x12d   : > { %v322_v6 = vpop.permute.xlu0 %321  ;;  %549 = vst.msk [vmem:[#allocation2 + $0x190] sm:$0xff] %vm380_vm3, %v533_v37 }
 0x12e   : > { %339 = vst.msk [vmem:[#allocation2 + $0x188] sm:$0xff] %vm331_vm2, %v322_v6  ;;  %1014 = vrot.lane.b32.xlu1 %v5574_v16, %s4970_s21 }
 0x12f   : > { %1175 = vrot.lane.b32.xlu0 %v4018_v54, %s4970_s21 }
 0x130   : > { %v853_v44 = vpop.permute.xlu1 %852 }
 0x131   : > { %v644_v7 = vpop.permute.xlu0 %643  ;;  %870 = vst.msk [vmem:[#allocation2 + $0x168] sm:$0xff] %vm380_vm3, %v853_v44 }
 0x132   : > { %661 = vst.msk [vmem:[#allocation2 + $0x160] sm:$0xff] %vm331_vm2, %v644_v7  ;;  %v5984_v7 = vld [vmem:[%s7264_s2] ss:$0 sm:$0xff] }
 0x134   : > { %v692_v45 = vpop.permute.xlu1 %691  ;;  %v1259_v10 = vld [vmem:[#allocation2 + $0x190] sm:$0xff] }
 0x135   : > { %v371_v9 = vpop.permute.xlu0 %370  ;;  %709 = vst.msk [vmem:[#allocation2 + $0x160] sm:$0xff] %vm380_vm3, %v692_v45  ;;  %1495 = vmatprep.mubr.f32.mxu0 %v1259_v10 }
 0x136   : > { %388 = vst.msk [vmem:[#allocation2 + $0x188] sm:$0xff] %vm380_vm3, %v371_v9 }
 0x138   : > { %v1066_v26 = vpop.permute.xlu1 %1065  ;;  %v1254_v35 = vld [vmem:[#allocation2 + $0x168] sm:$0xff] }
 0x139   : > { %v758_v53 = vpop.permute.xlu0 %757  ;;  %1089 = vst.msk [vmem:[#allocation2 + $0x28] sm:$0xff] %vm282_vm1, %v1066_v26  ;;  %1595 = vmatprep.mubr.f32.mxu1 %v1254_v35 }
 0x13a   : > { %774 = vst.msk [vmem:[#allocation2 + $0x1a0] sm:$0xff] %vm282_vm1, %v758_v53 }
 0x13c   : > { %v806_v16 = vpop.permute.xlu1 %805  ;;  %v1253_v14 = vld [vmem:[#allocation2 + $0x160] sm:$0xff] }
 0x13d   : > { %v597_v11 = vpop.permute.xlu0 %596  ;;  %v1258_v13 = vld [vmem:[#allocation2 + $0x188] sm:$0xff]  ;;  %822 = vst.msk [vmem:[#allocation2 + $0x1a0] sm:$0xff] %vm331_vm2, %v806_v16  ;;  %1596 = vmatmul.mubr.f32.gmra.mrb[12].mxu1 %v1253_v14 }
 0x13e   : > { %613 = vst.msk [vmem:[#allocation2 + $0x198] sm:$0xff] %vm282_vm1, %v597_v11  ;;  %1496 = vmatmul.mubr.f32.gmra.mrb[14].mxu0 %v1258_v13 }
 0x140   : > { %v1114_v50 = vpop.permute.xlu1 %1113 }
 0x141   : > { %v905_v15 = vpop.permute.xlu0 %904  ;;  %1137 = vst.msk [vmem:[#allocation2 + $0x28] sm:$0xff] %vm331_vm2, %v1114_v50 }
 0x142   : > { %928 = vst.msk [vmem:[#allocation2 + $0x20] sm:$0xff] %vm282_vm1, %v905_v15 }
 0x144   : > { %v855_v12 = vpop.permute.xlu1 %854 }
 0x145   : > { %v646_v5 = vpop.permute.xlu0 %645  ;;  %871 = vst.msk [vmem:[#allocation2 + $0x1a0] sm:$0xff] %vm380_vm3, %v855_v12 }
 0x146   : > { %662 = vst.msk [vmem:[#allocation2 + $0x198] sm:$0xff] %vm331_vm2, %v646_v5 }
 0x148   : > { %v1162_v51 = vpop.permute.xlu1 %1161 }
 0x149   : > { %v953_v36 = vpop.permute.xlu0 %952  ;;  %1185 = vst.msk [vmem:[#allocation2 + $0x28] sm:$0xff] %vm380_vm3, %v1162_v51 }
 0x14a   : > { %976 = vst.msk [vmem:[#allocation2 + $0x20] sm:$0xff] %vm331_vm2, %v953_v36 }
 0x14c   : > { %v1001_v57 = vpop.permute.xlu1 %1000  ;;  %v1261_v62 = vld [vmem:[#allocation2 + $0x1a0] sm:$0xff] }
 0x14d   : > { %v694_v19 = vpop.permute.xlu0 %693  ;;  %1024 = vst.msk [vmem:[#allocation2 + $0x20] sm:$0xff] %vm380_vm3, %v1001_v57  ;;  %1600 = vmatprep.mubr.f32.mxu1 %v1261_v62 }
 0x14e   : > { %710 = vst.msk [vmem:[#allocation2 + $0x198] sm:$0xff] %vm380_vm3, %v694_v19 }
 0x150   : > { %v907_v41 = vpop.permute.xlu1 %906  ;;  %v1214_v55 = vld [vmem:[#allocation2 + $0x28] sm:$0xff] }
 0x151   : > { %v1068_v18 = vpop.permute.xlu0 %1067  ;;  %929 = vst.msk [vmem:[#allocation2 + $0x58] sm:$0xff] %vm282_vm1, %v907_v41  ;;  %1670 = vmatprep.mubr.f32.mxu0 %v1214_v55 }
 0x152   : > { %1090 = vst.msk [vmem:[#allocation2 + $0x60] sm:$0xff] %vm282_vm1, %v1068_v18 }
 0x154   : > { %v955_v22 = vpop.permute.xlu1 %954  ;;  %v1213_v28 = vld [vmem:[#allocation2 + $0x20] sm:$0xff] }
 0x155   : > { %v1116_v58 = vpop.permute.xlu0 %1115  ;;  %v1260_v24 = vld [vmem:[#allocation2 + $0x198] sm:$0xff]  ;;  %977 = vst.msk [vmem:[#allocation2 + $0x58] sm:$0xff] %vm331_vm2, %v955_v22  ;;  %1671 = vmatmul.mubr.f32.vlgmr.msra.gmra.mrb[16].mxu0 %v1213_v28 }
 0x156   : > { %1138 = vst.msk [vmem:[#allocation2 + $0x60] sm:$0xff] %vm331_vm2, %v1116_v58  ;;  %1601 = vmatmul.mubr.f32.gmra.mrb[14].mxu1 %v1260_v24 }
 0x157   : > { %4588 = vmatprep.mubr.msk.f32.mxu1 %vm233_vm0, %v1215_v21 }
 0x158   : > { %v1003_v49 = vpop.permute.xlu1 %1002 }
 0x159   : > { %v1164_v42 = vpop.permute.xlu0 %1163  ;;  %1025 = vst.msk [vmem:[#allocation2 + $0x58] sm:$0xff] %vm380_vm3, %v1003_v49 }
 0x15a   : > { %1186 = vst.msk [vmem:[#allocation2 + $0x60] sm:$0xff] %vm380_vm3, %v1164_v42  ;;  %4589 = vmatmul.mubr.msk.f32.vlgmr.msra.gmra.mrb[16].mxu1 %vm233_vm0, %v1222_v3 }
 0x15b   : > { %4591 = vmatprep.mubr.msk.f32.mxu1 %vm233_vm0, %v1229_v17 }
 0x15c   : > { %v909_v32 = vpop.permute.xlu1 %908 }
 0x15d   : > { %v1070_v46 = vpop.permute.xlu0 %1069  ;;  %930 = vst.msk [vmem:[#allocation2 + $0x90] sm:$0xff] %vm282_vm1, %v909_v32 }
 0x15e   : > { %1091 = vst.msk [vmem:[#allocation2 + $0x98] sm:$0xff] %vm282_vm1, %v1070_v46  ;;  %4592 = vmatmul.mubr.msk.f32.gmra.mrb[18].mxu1 %vm233_vm0, %v1236_v59 }
 0x15f   : > { %4594 = vmatprep.mubr.msk.f32.mxu1 %vm233_vm0, %v1243_v31 }
 0x160   : > { %v957_v25 = vpop.permute.xlu1 %956  ;;  %v1220_v30 = vld [vmem:[#allocation2 + $0x58] sm:$0xff] }
 0x161   : > { %v1118_v39 = vpop.permute.xlu0 %1117  ;;  %v1221_v27 = vld [vmem:[#allocation2 + $0x60] sm:$0xff]  ;;  %978 = vst.msk [vmem:[#allocation2 + $0x90] sm:$0xff] %vm331_vm2, %v957_v25 }
 0x162   : > { %1139 = vst.msk [vmem:[#allocation2 + $0x98] sm:$0xff] %vm331_vm2, %v1118_v39  ;;  %1675 = vmatprep.mubr.f32.mxu0 %v1221_v27  ;;  %4595 = vmatmul.mubr.msk.f32.gmra.mrb[20].mxu1 %vm233_vm0, %v1250_v1 }
 0x163   : > { %1676 = vmatmul.mubr.f32.gmra.mrb[18].mxu0 %v1220_v30  ;;  %4597 = vmatprep.mubr.msk.f32.mxu1 %vm233_vm0, %v1257_v33 }
 0x164   : > { %v1005_v52 = vpop.permute.xlu1 %1004 }
 0x165   : > { %v1166_v8 = vpop.permute.xlu0 %1165  ;;  %1026 = vst.msk [vmem:[#allocation2 + $0x90] sm:$0xff] %vm380_vm3, %v1005_v52 }
 0x166   : > { %1187 = vst.msk [vmem:[#allocation2 + $0x98] sm:$0xff] %vm380_vm3, %v1166_v8  ;;  %4598 = vmatmul.mubr.msk.f32.gmra.mrb[22].mxu1 %vm233_vm0, %v1264_v43 }
 0x168   : > { %v911_v56 = vpop.permute.xlu1 %910 }
 0x169   : > { %v1072_v20 = vpop.permute.xlu0 %1071  ;;  %931 = vst.msk [vmem:[#allocation2 + $0xc8] sm:$0xff] %vm282_vm1, %v911_v56 }
 0x16a   : > { %1092 = vst.msk [vmem:[#allocation2 + $0xd0] sm:$0xff] %vm282_vm1, %v1072_v20  ;;  %v4080_v60 = vpop.f32.mrb[0].mxu0 }
 0x16b   : > { %v4081_v63 = vpop.f32.mrb[1].mxu0 }
 0x16c   : > { %v4082_v47 = vadd.f32 %v4081_v63, %v4080_v60  ;;  %v959_v61 = vpop.permute.xlu1 %958  ;;  %v1227_v0 = vld [vmem:[#allocation2 + $0x90] sm:$0xff] }
 0x16d   : > { %v1120_v38 = vpop.permute.xlu0 %1119  ;;  %v1228_v29 = vld [vmem:[#allocation2 + $0x98] sm:$0xff]  ;;  %979 = vst.msk [vmem:[#allocation2 + $0xc8] sm:$0xff] %vm331_vm2, %v959_v61 }
 0x16e   : > { %1140 = vst.msk [vmem:[#allocation2 + $0xd0] sm:$0xff] %vm331_vm2, %v1120_v38  ;;  %1680 = vmatprep.mubr.f32.mxu0 %v1228_v29  ;;  %v1463_v16 = vadd.f32 %v4082_v47, %v5984_v7 }
 0x16f   : > { %1681 = vmatmul.mubr.f32.gmra.mrb[20].mxu0 %v1227_v0 }
 0x170   : > { %v1007_v23 = vpop.permute.xlu1 %1006 }
 0x171   : > { %v1168_v40 = vpop.permute.xlu0 %1167  ;;  %1027 = vst.msk [vmem:[#allocation2 + $0xc8] sm:$0xff] %vm380_vm3, %v1007_v23 }
 0x172   : > { %1188 = vst.msk [vmem:[#allocation2 + $0xd0] sm:$0xff] %vm380_vm3, %v1168_v40 }
 0x174   : > { %v913_v34 = vpop.permute.xlu1 %912 }
 0x175   : > { %v1074_v2 = vpop.permute.xlu0 %1073  ;;  %932 = vst.msk [vmem:[#allocation2 + $0x100] sm:$0xff] %vm282_vm1, %v913_v34 }
 0x176   : > { %1093 = vst.msk [vmem:[#allocation2 + $0x108] sm:$0xff] %vm282_vm1, %v1074_v2 }
 0x178   : > { %v961_v48 = vpop.permute.xlu1 %960  ;;  %v1234_v37 = vld [vmem:[#allocation2 + $0xc8] sm:$0xff] }
 0x179   : > { %v1122_v4 = vpop.permute.xlu0 %1121  ;;  %v1235_v54 = vld [vmem:[#allocation2 + $0xd0] sm:$0xff]  ;;  %980 = vst.msk [vmem:[#allocation2 + $0x100] sm:$0xff] %vm331_vm2, %v961_v48 }
 0x17a   : > { %1141 = vst.msk [vmem:[#allocation2 + $0x108] sm:$0xff] %vm331_vm2, %v1122_v4  ;;  %1685 = vmatprep.mubr.f32.mxu0 %v1235_v54 }
 0x17b   : > { %1686 = vmatmul.mubr.f32.gmra.mrb[22].mxu0 %v1234_v37 }
 0x17c   : > { %v1009_v44 = vpop.permute.xlu1 %1008 }
 0x17d   : > { %v1170_v6 = vpop.permute.xlu0 %1169  ;;  %1028 = vst.msk [vmem:[#allocation2 + $0x100] sm:$0xff] %vm380_vm3, %v1009_v44 }
 0x17e   : > { %1189 = vst.msk [vmem:[#allocation2 + $0x108] sm:$0xff] %vm380_vm3, %v1170_v6 }
 0x180   : > { %v4136_v45 = vpop.f32.mrb[0].mxu1  ;;  %v915_v26 = vpop.permute.xlu1 %914 }
 0x181   : > { %v1076_v9 = vpop.permute.xlu0 %1075  ;;  %v4083_v10 = vpop.f32.mrb[2].mxu0  ;;  %933 = vst.msk [vmem:[#allocation2 + $0x138] sm:$0xff] %vm282_vm1, %v915_v26 }
 0x182   : > { %1094 = vst.msk [vmem:[#allocation2 + $0x140] sm:$0xff] %vm282_vm1, %v1076_v9  ;;  %v4084_v53 = vpop.f32.mrb[3].mxu0  ;;  %v4137_v35 = vpop.f32.mrb[1].mxu1 }
 0x183   : > { %v4085_v11 = vadd.f32 %v4084_v53, %v4083_v10  ;;  %v4138_v13 = vadd.f32 %v4137_v35, %v4136_v45 }
 0x184   : > { %v1241_v15 = vld [vmem:[#allocation2 + $0x100] sm:$0xff]  ;;  %v963_v5 = vpop.permute.xlu1 %962 }
 0x185   : > { %v1124_v14 = vpop.permute.xlu0 %1123  ;;  %v1242_v50 = vld [vmem:[#allocation2 + $0x108] sm:$0xff]  ;;  %v5989_v12 = vadd.f32 %v4138_v13, %v1463_v16  ;;  %981 = vst.msk [vmem:[#allocation2 + $0x138] sm:$0xff] %vm331_vm2, %v963_v5  ;;  %v1468_v49 = vadd.f32 %v4085_v11, %v5984_v7 }
 0x186   : > { %1142 = vst.msk [vmem:[#allocation2 + $0x140] sm:$0xff] %vm331_vm2, %v1124_v14  ;;  %1690 = vmatprep.mubr.f32.mxu0 %v1242_v50 }
 0x187   : > { %1691 = vmatmul.mubr.f32.gmra.mrb[24].mxu0 %v1241_v15 }
 0x188   : > { %v1011_v36 = vpop.permute.xlu1 %1010 }
 0x189   : > { %v1172_v51 = vpop.permute.xlu0 %1171  ;;  %1029 = vst.msk [vmem:[#allocation2 + $0x138] sm:$0xff] %vm380_vm3, %v1011_v36 }
 0x18a   : > { %1190 = vst.msk [vmem:[#allocation2 + $0x140] sm:$0xff] %vm380_vm3, %v1172_v51 }
 0x18c   : > { %v917_v19 = vpop.permute.xlu1 %916 }
 0x18d   : > { %v1078_v57 = vpop.permute.xlu0 %1077  ;;  %934 = vst.msk [vmem:[#allocation2 + $0x170] sm:$0xff] %vm282_vm1, %v917_v19 }
 0x18e   : > { %1095 = vst.msk [vmem:[#allocation2 + $0x178] sm:$0xff] %vm282_vm1, %v1078_v57 }
 0x190   : > { %v965_v41 = vpop.permute.xlu1 %964  ;;  %v1248_v55 = vld [vmem:[#allocation2 + $0x138] sm:$0xff] }
 0x191   : > { %v1126_v62 = vpop.permute.xlu0 %1125  ;;  %v1249_v18 = vld [vmem:[#allocation2 + $0x140] sm:$0xff]  ;;  %982 = vst.msk [vmem:[#allocation2 + $0x170] sm:$0xff] %vm331_vm2, %v965_v41 }
 0x192   : > { %1143 = vst.msk [vmem:[#allocation2 + $0x178] sm:$0xff] %vm331_vm2, %v1126_v62  ;;  %1695 = vmatprep.mubr.f32.mxu0 %v1249_v18  ;;  %v2877_v41 = vld [vmem:[%s7265_s3 + $0x180] sm:$0xff] }
 0x193   : > { %1696 = vmatmul.mubr.f32.gmra.mrb[26].mxu0 %v1248_v55  ;;  %v2878_v55 = vld [vmem:[%s7265_s3 + $0x188] sm:$0xff] }
 0x194   : > { %v1013_v58 = vpop.permute.xlu1 %1012 }
 0x195   : > { %v1174_v21 = vpop.permute.xlu0 %1173  ;;  %1030 = vst.msk [vmem:[#allocation2 + $0x170] sm:$0xff] %vm380_vm3, %v1013_v58  ;;  %v4764_v58 = vpack.c.bf16 %v2878_v55, %v2877_v41 }
 0x196   : > { %1191 = vst.msk [vmem:[#allocation2 + $0x178] sm:$0xff] %vm380_vm3, %v1174_v21  ;;  %v2861_v21 = vld [vmem:[%s7265_s3 + $0x100] sm:$0xff] }
 0x197   : > { %4765 = vmatprep.subr.bf16.mxu1 %v4764_v58  ;;  %v2852_v58 = vld [vmem:[%s7265_s3 + $0xb8] sm:$0xff] }
 0x198   : > { %v4139_v22 = vpop.f32.mrb[2].mxu1  ;;  %v919_v3 = vpop.permute.xlu1 %918 }
 0x199   : > { %v1080_v24 = vpop.permute.xlu0 %1079  ;;  %v4086_v28 = vpop.f32.mrb[4].mxu0  ;;  %935 = vst.msk [vmem:[#allocation2 + $0x1a8] sm:$0xff] %vm282_vm1, %v919_v3 }
 0x19a   : > { %1096 = vst.msk [vmem:[#allocation2 + $0x1b0] sm:$0xff] %vm282_vm1, %v1080_v24  ;;  %v4087_v17 = vpop.f32.mrb[5].mxu0  ;;  %v4140_v42 = vpop.f32.mrb[3].mxu1 }
 0x19b   : > { %v4088_v59 = vadd.f32 %v4087_v17, %v4086_v28  ;;  %v4141_v31 = vadd.f32 %v4140_v42, %v4139_v22  ;;  %v2862_v22 = vld [vmem:[%s7265_s3 + $0x108] sm:$0xff]  ;;  %v2845_v17 = vld [vmem:[%s7265_s3 + $0x80] sm:$0xff] }
 0x19c   : > { %v967_v33 = vpop.permute.xlu1 %966  ;;  %v1255_v39 = vld [vmem:[#allocation2 + $0x170] sm:$0xff]  ;;  %v4766_v24 = vpack.c.bf16 %v2862_v22, %v2861_v21  ;;  %v2846_v42 = vld [vmem:[%s7265_s3 + $0x88] sm:$0xff]  ;;  %v2885_v22 = vld [vmem:[%s7265_s3 + $0x1c0] sm:$0xff] }
 0x19d   : > { %v1128_v46 = vpop.permute.xlu0 %1127  ;;  %v1256_v32 = vld [vmem:[#allocation2 + $0x178] sm:$0xff]  ;;  %v6004_v1 = vadd.f32 %v4141_v31, %v1468_v49  ;;  %983 = vst.msk [vmem:[#allocation2 + $0x1a8] sm:$0xff] %vm331_vm2, %v967_v33  ;;  %v1473_v60 = vadd.f32 %v4088_v59, %v5984_v7  ;;  %v2879_v49 = vld [vmem:[%s7265_s3 + $0x190] sm:$0xff] }
 0x19e   : > { %1144 = vst.msk [vmem:[#allocation2 + $0x1b0] sm:$0xff] %vm331_vm2, %v1128_v46  ;;  %1700 = vmatprep.mubr.f32.mxu0 %v1256_v32  ;;  %4767 = vmatpush3.bf16.msra.mxu1 %v4766_v24  ;;  %v4732_v32 = vpack.c.bf16 %v2846_v42, %v2845_v17  ;;  %v2880_v33 = vld [vmem:[%s7265_s3 + $0x198] sm:$0xff]  ;;  %v2851_v21 = vld [vmem:[%s7265_s3 + $0xb0] sm:$0xff] }
 0x19f   : > { %1701 = vmatmul.mubr.f32.gmra.mrb[28].mxu0 %v1255_v39  ;;  %v2829_v39 = vld [vmem:[%s7265_s3] sm:$0xff]  ;;  %v2835_v17 = vld [vmem:[%s7265_s3 + $0x30] sm:$0xff]  ;;  %v2836_v42 = vld [vmem:[%s7265_s3 + $0x38] sm:$0xff] }
 0x1a0   : > { %v1015_v27 = vpop.permute.xlu1 %1014  ;;  %4733 = vmatprep.subr.bf16.mxu0 %v4732_v32  ;;  %v2870_v32 = vld [vmem:[%s7265_s3 + $0x148] sm:$0xff] }
 0x1a1   : > { %v1176_v25 = vpop.permute.xlu0 %1175  ;;  %1031 = vst.msk [vmem:[#allocation2 + $0x1a8] sm:$0xff] %vm380_vm3, %v1015_v27 }
 0x1a2   : > { %1192 = vst.msk [vmem:[#allocation2 + $0x1b0] sm:$0xff] %vm380_vm3, %v1176_v25  ;;  %v2830_v25 = vld [vmem:[%s7265_s3 + $0x8] sm:$0xff] }
 0x1a8   : > { %v1262_v43 = vld [vmem:[#allocation2 + $0x1a8] sm:$0xff] }
 0x1a9   : > { %v1263_v30 = vld [vmem:[#allocation2 + $0x1b0] sm:$0xff] }
 0x1aa   : > { %1705 = vmatprep.mubr.f32.mxu0 %v1263_v30 }
 0x1ab   : > { %1706 = vmatmul.mubr.f32.gmra.mrb[30].mxu0 %v1262_v43  ;;  %v4768_v43 = vpack.c.bf16 %v2880_v33, %v2879_v49 }
 0x1ad   : > { %4769 = vmatprep.subr.bf16.mxu1 %v4768_v43 }
 0x1b0   : > { %v4142_v52 = vpop.f32.mrb[4].mxu1 }
 0x1b1   : > { %v4089_v8 = vpop.f32.mrb[6].mxu0  ;;  %v4143_v56 = vpop.f32.mrb[5].mxu1 }
 0x1b2   : > { %v4090_v20 = vpop.f32.mrb[7].mxu0  ;;  %v4144_v47 = vadd.f32 %v4143_v56, %v4142_v52  ;;  %v2864_v52 = vld [vmem:[%s7265_s3 + $0x118] sm:$0xff] }
 0x1b3   : > { %v4091_v63 = vadd.f32 %v4090_v20, %v4089_v8  ;;  %v4734_v8 = vpack.c.bf16 %v2830_v25, %v2829_v39 }
 0x1b4   : > { %v6011_v38 = vadd.f32 %v4144_v47, %v1473_v60 }
 0x1b5   : > { %v1478_v23 = vadd.f32 %v4091_v63, %v5984_v7  ;;  %4735 = vmatpush3.bf16.msra.mxu0 %v4734_v8 }
 0x1c8   : > { %v4145_v29 = vpop.f32.mrb[6].mxu1 }
 0x1c9   : > { %v4092_v61 = vpop.f32.mrb[8].mxu0  ;;  %v4146_v40 = vpop.f32.mrb[7].mxu1 }
 0x1ca   : > { %v4093_v0 = vpop.f32.mrb[9].mxu0  ;;  %v4147_v34 = vadd.f32 %v4146_v40, %v4145_v29  ;;  %v2848_v29 = vld [vmem:[%s7265_s3 + $0x98] sm:$0xff] }
 0x1cb   : > { %v4094_v2 = vadd.f32 %v4093_v0, %v4092_v61  ;;  %v2847_v61 = vld [vmem:[%s7265_s3 + $0x90] sm:$0xff]  ;;  %v2881_v0 = vld [vmem:[%s7265_s3 + $0x1a0] sm:$0xff] }
 0x1cc   : > { %v6014_v4 = vadd.f32 %v4147_v34, %v1478_v23  ;;  %v4736_v23 = vpack.c.bf16 %v2848_v29, %v2847_v61  ;;  %v2832_v34 = vld [vmem:[%s7265_s3 + $0x18] sm:$0xff] }
 0x1cd   : > { %v1483_v44 = vadd.f32 %v4094_v2, %v5984_v7  ;;  %v2831_v2 = vld [vmem:[%s7265_s3 + $0x10] sm:$0xff] }
 0x1ce   : > { %4737 = vmatprep.subr.bf16.mxu0 %v4736_v23 }
 0x1e0   : > { %v4148_v54 = vpop.f32.mrb[8].mxu1 }
 0x1e1   : > { %v4095_v48 = vpop.f32.mrb[10].mxu0  ;;  %v4149_v6 = vpop.f32.mrb[9].mxu1 }
 0x1e2   : > { %v4096_v37 = vpop.f32.mrb[11].mxu0  ;;  %v4150_v9 = vadd.f32 %v4149_v6, %v4148_v54  ;;  %v4738_v54 = vpack.c.bf16 %v2832_v34, %v2831_v2  ;;  %v2866_v6 = vld [vmem:[%s7265_s3 + $0x128] sm:$0xff]  ;;  %v2853_v2 = vld [vmem:[%s7265_s3 + $0xc0] sm:$0xff] }
 0x1e3   : > { %v4097_v45 = vadd.f32 %v4096_v37, %v4095_v48  ;;  %v2865_v37 = vld [vmem:[%s7265_s3 + $0x120] sm:$0xff]  ;;  %v2854_v34 = vld [vmem:[%s7265_s3 + $0xc8] sm:$0xff] }
 0x1e4   : > { %v6017_v10 = vadd.f32 %v4150_v9, %v1483_v44  ;;  %v4774_v9 = vpack.c.bf16 %v2866_v6, %v2865_v37  ;;  %4739 = vmatpush3.bf16.msra.mxu0 %v4738_v54  ;;  %v2888_v54 = vld [vmem:[%s7265_s3 + $0x1d8] sm:$0xff]  ;;  %v4748_v37 = vpack.c.bf16 %v2854_v34, %v2853_v2 }
 0x1e5   : > { %v1488_v11 = vadd.f32 %v4097_v45, %v5984_v7 }
 0x1f8   : > { %v4151_v53 = vpop.f32.mrb[10].mxu1 }
 0x1f9   : > { %v4098_v26 = vpop.f32.mrb[12].mxu0  ;;  %v4152_v16 = vpop.f32.mrb[11].mxu1 }
 0x1fa   : > { %v4099_v35 = vpop.f32.mrb[13].mxu0  ;;  %v4153_v14 = vadd.f32 %v4152_v16, %v4151_v53  ;;  %v2849_v53 = vld [vmem:[%s7265_s3 + $0xa0] sm:$0xff]  ;;  %v2883_v16 = vld [vmem:[%s7265_s3 + $0x1b0] sm:$0xff] }
 0x1fb   : > { %v4100_v13 = vadd.f32 %v4099_v35, %v4098_v26  ;;  %v2850_v35 = vld [vmem:[%s7265_s3 + $0xa8] sm:$0xff] }
 0x1fc   : > { %v6020_v50 = vadd.f32 %v4153_v14, %v1488_v11  ;;  %v4740_v11 = vpack.c.bf16 %v2850_v35, %v2849_v53  ;;  %v2833_v14 = vld [vmem:[%s7265_s3 + $0x20] sm:$0xff]  ;;  %v2871_v53 = vld [vmem:[%s7265_s3 + $0x150] sm:$0xff] }
 0x1fd   : > { %v1493_v57 = vadd.f32 %v4100_v13, %v5984_v7  ;;  %v2884_v13 = vld [vmem:[%s7265_s3 + $0x1b8] sm:$0xff] }
 0x1fe   : > { %4741 = vmatprep.subr.bf16.mxu0 %v4740_v11 }
 0x210   : > { %v4154_v5 = vpop.f32.mrb[12].mxu1 }
 0x211   : > { %v4101_v15 = vpop.f32.mrb[14].mxu0  ;;  %v4155_v36 = vpop.f32.mrb[13].mxu1 }
 0x212   : > { %v4102_v51 = vpop.f32.mrb[15].mxu0  ;;  %v4156_v62 = vadd.f32 %v4155_v36, %v4154_v5  ;;  %v4776_v5 = vpack.c.bf16 %v2884_v13, %v2883_v16  ;;  %v2867_v36 = vld [vmem:[%s7265_s3 + $0x130] sm:$0xff]  ;;  %v2872_v16 = vld [vmem:[%s7265_s3 + $0x158] sm:$0xff] }
 0x213   : > { %v4103_v19 = vadd.f32 %v4102_v51, %v4101_v15  ;;  %v2834_v15 = vld [vmem:[%s7265_s3 + $0x28] sm:$0xff]  ;;  %v2855_v13 = vld [vmem:[%s7265_s3 + $0xd0] sm:$0xff] }
 0x214   : > { %v6023_v18 = vadd.f32 %v4156_v62, %v1493_v57  ;;  %v4742_v51 = vpack.c.bf16 %v2834_v15, %v2833_v14  ;;  %v2868_v57 = vld [vmem:[%s7265_s3 + $0x138] sm:$0xff]  ;;  %v4786_v15 = vpack.c.bf16 %v2872_v16, %v2871_v53  ;;  %v2843_v53 = vld [vmem:[%s7265_s3 + $0x70] sm:$0xff] }
 0x215   : > { %v1498_v59 = vadd.f32 %v4103_v19, %v5984_v7  ;;  %v2863_v7 = vld [vmem:[%s7265_s3 + $0x110] sm:$0xff]  ;;  %v4778_v62 = vpack.c.bf16 %v2868_v57, %v2867_v36  ;;  %v2890_v36 = vld [vmem:[%s7265_s3 + $0x1e8] sm:$0xff] }
 0x216   : > { %v4770_v20 = vpack.c.bf16 %v2864_v52, %v2863_v7  ;;  %4743 = vmatpush3.bf16.msra.mxu0 %v4742_v51  ;;  %v2889_v51 = vld [vmem:[%s7265_s3 + $0x1e0] sm:$0xff] }
 0x218   : > { %4771 = vmatpush3.bf16.msra.mxu1 %v4770_v20 }
 0x228   : > { %v4192_v3 = vpop.f32.mrb[16].mxu0 }
 0x229   : > { %v4157_v28 = vpop.f32.mrb[14].mxu1  ;;  %v4193_v46 = vpop.f32.mrb[17].mxu0 }
 0x22a   : > { %v4158_v31 = vpop.f32.mrb[15].mxu1  ;;  %v4194_v30 = vadd.f32 %v4193_v46, %v4192_v3  ;;  %v2886_v3 = vld [vmem:[%s7265_s3 + $0x1c8] sm:$0xff]  ;;  %v2869_v46 = vld [vmem:[%s7265_s3 + $0x140] sm:$0xff] }
 0x22b   : > { %v4159_v27 = vadd.f32 %v4158_v31, %v4157_v28  ;;  %v4744_v28 = vpack.c.bf16 %v2852_v58, %v2851_v21  ;;  %v4746_v31 = vpack.c.bf16 %v2836_v42, %v2835_v17  ;;  %v4782_v39 = vpack.c.bf16 %v2870_v32, %v2869_v46 }
 0x22c   : > { %v1673_v63 = vadd.f32 %v4194_v30, %v5989_v12  ;;  %v2882_v12 = vld [vmem:[%s7265_s3 + $0x1a8] sm:$0xff]  ;;  %v4788_v21 = vpack.c.bf16 %v2890_v36, %v2889_v51 }
 0x22d   : > { %v6062_v56 = vadd.f32 %v4159_v27, %v1498_v59  ;;  %v6064_v60 = vpop.f32.mrb[16].mxu1  ;;  %v4772_v48 = vpack.c.bf16 %v2882_v12, %v2881_v0  ;;  %v4780_v59 = vpack.c.bf16 %v2886_v3, %v2885_v22  ;;  %4745 = vmatprep.subr.bf16.mxu0 %v4744_v28  ;;  %v2839_v28 = vld [vmem:[%s7265_s3 + $0x50] sm:$0xff] }
 0x22e   : > { %v1777_v47 = vpop.f32.mrb[17].mxu1  ;;  %4747 = vmatpush3.bf16.msra.mxu0 %v4746_v31 }
 0x22f   : > { %v1778_v40 = vadd.f32 %v1777_v47, %v1673_v63  ;;  %4773 = vmatprep.subr.bf16.mxu1 %v4772_v48  ;;  %v2887_v48 = vld [vmem:[%s7265_s3 + $0x1d0] sm:$0xff]  ;;  %4749 = vmatprep.subr.bf16.mxu0 %v4748_v37 }
 0x230   : > { %4775 = vmatpush3.bf16.msra.mxu1 %v4774_v9  ;;  %v4784_v6 = vpack.c.bf16 %v2888_v54, %v2887_v48  ;;  %v2838_v9 = vld [vmem:[%s7265_s3 + $0x48] sm:$0xff]  ;;  %v2875_v48 = vld [vmem:[%s7265_s3 + $0x170] sm:$0xff]  ;;  %v2876_v54 = vld [vmem:[%s7265_s3 + $0x178] sm:$0xff] }
 0x231   : > { %v1816_v44 = vmax.f32 %v1778_v40, 0.0  ;;  %v6091_v45 = vpop.f32.mrb[18].mxu1  ;;  %4777 = vmatprep.subr.bf16.mxu1 %v4776_v5  ;;  %v2856_v5 = vld [vmem:[%s7265_s3 + $0xd8] sm:$0xff] }
 0x232   : > { %v6093_v26 = vpop.f32.mrb[19].mxu1 }
 0x233   : > { %1826 = vst.msk [vmem:[#allocation3 + $0x22] sm:$0xff] %vm1825_vm4, %v1816_v44  ;;  %1834 = vst.msk [vmem:[#allocation3 + $0x2] sm:$0xff] %vm1825_vm4, %v1816_v44 }
 0x234   : > { %1838 = vst.msk [vmem:[#allocation3 + $0x12] sm:$0xff] %vm1825_vm4, %v1816_v44  ;;  %4779 = vmatpush3.bf16.msra.mxu1 %v4778_v62  ;;  %v2837_v44 = vld [vmem:[%s7265_s3 + $0x40] sm:$0xff] }
 0x235   : > { %v6122_v19 = vpop.f32.mrb[20].mxu1  ;;  %4781 = vmatprep.subr.bf16.mxu1 %v4780_v59  ;;  %v4750_v35 = vpack.c.bf16 %v2838_v9, %v2837_v44  ;;  %v2859_v44 = vld [vmem:[%s7265_s3 + $0xf0] sm:$0xff]  ;;  %v2860_v9 = vld [vmem:[%s7265_s3 + $0xf8] sm:$0xff] }
 0x236   : > { %v4195_v41 = vpop.f32.mrb[18].mxu0  ;;  %v6124_v55 = vpop.f32.mrb[21].mxu1  ;;  %v4760_v16 = vpack.c.bf16 %v2860_v9, %v2859_v44 }
 0x237   : > { %v4196_v24 = vpop.f32.mrb[19].mxu0  ;;  %4751 = vmatpush3.bf16.msra.mxu0 %v4750_v35 }
 0x238   : > { %v4197_v49 = vadd.f32 %v4196_v24, %v4195_v41  ;;  %4783 = vmatpush3.bf16.msra.mxu1 %v4782_v39  ;;  %v4752_v41 = vpack.c.bf16 %v2856_v5, %v2855_v13 }
 0x239   : > { %v6150_v33 = vpop.f32.mrb[22].mxu1  ;;  %4785 = vmatprep.subr.bf16.mxu1 %v4784_v6  ;;  %v4794_v6 = vpack.c.bf16 %v2876_v54, %v2875_v48 }
 0x23a   : > { %v1841_v25 = vld [vmem:[#allocation3 + $0x2] sm:$0x1]  ;;  %v1914_v27 = vld [vmem:[#allocation3 + $0x9] sm:$0x1]  ;;  %v1678_v30 = vadd.f32 %v4197_v49, %v6004_v1  ;;  %v6153_v8 = vpop.f32.mrb[23].mxu1  ;;  %4753 = vmatprep.subr.bf16.mxu0 %v4752_v41 }
 0x23b   : > { %v2147_v43 = vld [vmem:[#allocation3 + $0x12] sm:$0xff]  ;;  %v2148_v7 = vld [vmem:[#allocation3 + $0x22] sm:$0xff]  ;;  %1854 = vst.msk [vmem:[#allocation3] sm:$0x1] %vm1853_vm5, %v1841_v25  ;;  %1926 = vst.msk [vmem:[#allocation3 + $0xb] sm:$0x1] %vm1853_vm5, %v1914_v27 }
 0x23c   : > { %2163 = vrot.lane.b32.xlu1 %v2147_v43, %s4968_s29  ;;  %v1866_v52 = vld [vmem:[#allocation3 + $0x9] sm:$0x1]  ;;  %v1842_v20 = vld [vmem:[#allocation3 + $0x12] sm:$0x1]  ;;  %2012 = vst.msk [vmem:[#allocation4 + $0x70] sm:$0xff] %vm1825_vm4, %v2147_v43  ;;  %v1783_v63 = vadd.f32 %v6064_v60, %v1678_v30  ;;  %2331 = vst.msk [vmem:[#allocation4 + $0x30] sm:$0xff] %vm1825_vm4, %v2148_v7  ;;  %4787 = vmatpush3.bf16.msra.mxu1 %v4786_v15 }
 0x23d   : > { %1878 = vst.msk [vmem:[#allocation3 + $0xa] sm:$0x1] %vm1853_vm5, %v1866_v52  ;;  %1855 = vst.msk [vmem:[#allocation3 + $0x10] sm:$0x1] %vm1853_vm5, %v1842_v20  ;;  %v1891_v1 = vld [vmem:[#allocation3 + $0x12] sm:$0x1]  ;;  %4789 = vmatprep.subr.bf16.mxu1 %v4788_v21 }
 0x23e   : > { %v1890_v47 = vld [vmem:[#allocation3 + $0x2] sm:$0x1]  ;;  %2013 = vst.msk [vmem:[#allocation4 + $0xd8] sm:$0xff] %vm1825_vm4, %v2148_v7  ;;  %v1867_v0 = vld [vmem:[#allocation3 + $0x19] sm:$0x1]  ;;  %v1817_v40 = vmax.f32 %v1783_v63, 0.0 }
 0x23f   : > { %v1843_v61 = vld [vmem:[#allocation3 + $0x22] sm:$0x1]  ;;  %1903 = vst.msk [vmem:[#allocation3 + $0x11] sm:$0x1] %vm1853_vm5, %v1891_v1  ;;  %1902 = vst.msk [vmem:[#allocation3 + $0x1] sm:$0x1] %vm1853_vm5, %v1890_v47 }
 0x240   : > { %1856 = vst.msk [vmem:[#allocation3 + $0x20] sm:$0x1] %vm1853_vm5, %v1843_v61  ;;  %v1892_v29 = vld [vmem:[#allocation3 + $0x22] sm:$0x1]  ;;  %v1868_v60 = vld [vmem:[#allocation3 + $0x29] sm:$0x1]  ;;  %2165 = vrot.lane.b32.xlu1 %v2148_v7, %s4968_s29 }
 0x241   : > { %1904 = vst.msk [vmem:[#allocation3 + $0x21] sm:$0x1] %vm1853_vm5, %v1892_v29  ;;  %1879 = vst.msk [vmem:[#allocation3 + $0x1a] sm:$0x1] %vm1853_vm5, %v1867_v0  ;;  %v1915_v23 = vld [vmem:[#allocation3 + $0x19] sm:$0x1] }
 0x242   : > { %1880 = vst.msk [vmem:[#allocation3 + $0x2a] sm:$0x1] %vm1853_vm5, %v1868_v60  ;;  %v1916_v12 = vld [vmem:[#allocation3 + $0x29] sm:$0x1]  ;;  %1927 = vst.msk [vmem:[#allocation3 + $0x1b] sm:$0x1] %vm1853_vm5, %v1915_v23 }
 0x243   : > { %1928 = vst.msk [vmem:[#allocation3 + $0x2b] sm:$0x1] %vm1853_vm5, %v1916_v12  ;;  %v2003_v11 = vld [vmem:[#allocation3 + $0x2] sm:$0xff]  ;;  %v4198_v14 = vpop.f32.mrb[20].mxu0  ;;  %v2840_v43 = vld [vmem:[%s7265_s3 + $0x58] sm:$0xff]  ;;  %v2891_v0 = vld [vmem:[%s7265_s3 + $0x1f0] sm:$0xff] }
 0x244   : > { %1827 = vst.msk [vmem:[#allocation3 + $0x32] sm:$0xff] %vm1825_vm4, %v1817_v40  ;;  %2011 = vst.msk [vmem:[#allocation4 + $0x8] sm:$0xff] %vm1825_vm4, %v2003_v11  ;;  %v4199_v57 = vpop.f32.mrb[21].mxu0  ;;  %v2067_v62 = vld [vmem:[#allocation3 + $0x4] sm:$0xff]  ;;  %v2892_v40 = vld [vmem:[%s7265_s3 + $0x1f8] sm:$0xff] }
 0x245   : > { %v4200_v58 = vadd.f32 %v4199_v57, %v4198_v14  ;;  %2075 = vst.msk [vmem:[#allocation4 + $0x10] sm:$0xff] %vm1825_vm4, %v2067_v62  ;;  %v2019_v7 = vld [vmem:[#allocation3 + $0x3] sm:$0xff]  ;;  %v4792_v2 = vpack.c.bf16 %v2892_v40, %v2891_v0  ;;  %v2844_v11 = vld [vmem:[%s7265_s3 + $0x78] sm:$0xff] }
 0x246   : > { %v2083_v22 = vld [vmem:[#allocation3 + $0x10] sm:$0xff]  ;;  %v2873_v52 = vld [vmem:[%s7265_s3 + $0x160] sm:$0xff]  ;;  %v2874_v20 = vld [vmem:[%s7265_s3 + $0x168] sm:$0xff]  ;;  %v4762_v51 = vpack.c.bf16 %v2844_v11, %v2843_v53 }
 0x247   : > { %v6211_v24 = vld [vmem:[#allocation3 + $0x11] sm:$0xff]  ;;  %1947 = vst.msk [vmem:[#allocation4 + $0x68] sm:$0xff] %vm1825_vm4, %v2083_v22  ;;  %v1683_v49 = vadd.f32 %v4200_v58, %v6011_v38  ;;  %v1938_v63 = vld [vmem:[#allocation3] sm:$0xff]  ;;  %v4790_v47 = vpack.c.bf16 %v2874_v20, %v2873_v52  ;;  %v2858_v29 = vld [vmem:[%s7265_s3 + $0xe8] sm:$0xff] }
 0x248   : > { %v6217_v3 = vld [vmem:[#allocation3 + $0x20] sm:$0xff]  ;;  %v6219_v17 = vld [vmem:[#allocation3 + $0x13] sm:$0xff]  ;;  %2139 = vst.msk [vmem:[#allocation4 + $0x18] sm:$0xff] %vm1825_vm4, %v6211_v24  ;;  %1946 = vst.msk [vmem:[#allocation4] sm:$0xff] %vm1825_vm4, %v1938_v63 }
 0x249   : > { %v6221_v42 = vld [vmem:[#allocation3 + $0x23] sm:$0xff]  ;;  %v6229_v31 = vld [vmem:[#allocation3 + $0x14] sm:$0xff]  ;;  %1948 = vst.msk [vmem:[#allocation4 + $0xd0] sm:$0xff] %vm1825_vm4, %v6217_v3  ;;  %2267 = vst.msk [vmem:[#allocation4 + $0x28] sm:$0xff] %vm1825_vm4, %v6217_v3  ;;  %v1788_v25 = vadd.f32 %v6093_v26, %v1683_v49  ;;  %v4754_v26 = vpack.c.bf16 %v2840_v43, %v2839_v28  ;;  %4791 = vmatpush3.bf16.msra.mxu1 %v4790_v47 }
 0x24a   : > { %v6227_v59 = vld [vmem:[#allocation3 + $0x21] sm:$0xff]  ;;  %2203 = vst.msk [vmem:[#allocation4 + $0x20] sm:$0xff] %vm1825_vm4, %v6219_v17  ;;  %2204 = vst.msk [vmem:[#allocation4 + $0x88] sm:$0xff] %vm1825_vm4, %v6221_v42  ;;  %4793 = vmatprep.subr.bf16.mxu1 %v4792_v2 }
 0x24b   : > { %v6231_v46 = vld [vmem:[#allocation3 + $0x24] sm:$0xff]  ;;  %v2468_v32 = vld [vmem:[#allocation3 + $0x32] sm:$0xff]  ;;  %2140 = vst.msk [vmem:[#allocation4 + $0x80] sm:$0xff] %vm1825_vm4, %v6227_v59  ;;  %2076 = vst.msk [vmem:[#allocation4 + $0x78] sm:$0xff] %vm1825_vm4, %v6229_v31  ;;  %v1818_v1 = vmax.f32 %v1788_v25, 0.0  ;;  %4755 = vmatpush3.bf16.msra.mxu0 %v4754_v26 }
 0x24c   : > { %v1844_v38 = vld [vmem:[#allocation3 + $0x32] sm:$0x1]  ;;  %2077 = vst.msk [vmem:[#allocation4 + $0xe0] sm:$0xff] %vm1825_vm4, %v6231_v46  ;;  %2395 = vst.msk [vmem:[#allocation4 + $0x38] sm:$0xff] %vm1825_vm4, %v6231_v46  ;;  %2484 = vrot.lane.b32.xlu0 %v2468_v32, %s4968_s29  ;;  %2167 = vrot.lane.b32.xlu1 %v2468_v32, %s4968_s29  ;;  %v1869_v27 = vld [vmem:[#allocation3 + $0x39] sm:$0x1] }
 0x24d   : > { %v1893_v39 = vld [vmem:[#allocation3 + $0x32] sm:$0x1]  ;;  %1857 = vst.msk [vmem:[#allocation3 + $0x30] sm:$0x1] %vm1853_vm5, %v1844_v38  ;;  %v1917_v30 = vld [vmem:[#allocation3 + $0x39] sm:$0x1]  ;;  %4795 = vmatpush3.bf16.msra.mxu1 %v4794_v6 }
 0x24e   : > { %1905 = vst.msk [vmem:[#allocation3 + $0x31] sm:$0x1] %vm1853_vm5, %v1893_v39  ;;  %1881 = vst.msk [vmem:[#allocation3 + $0x3a] sm:$0x1] %vm1853_vm5, %v1869_v27  ;;  %v2857_v61 = vld [vmem:[%s7265_s3 + $0xe0] sm:$0xff]  ;;  %v2842_v12 = vld [vmem:[%s7265_s3 + $0x68] sm:$0xff] }
 0x24f   : > { %2332 = vst.msk [vmem:[#allocation4 + $0x98] sm:$0xff] %vm1825_vm4, %v2468_v32  ;;  %v4756_v60 = vpack.c.bf16 %v2858_v29, %v2857_v61  ;;  %v2841_v23 = vld [vmem:[%s7265_s3 + $0x60] sm:$0xff]  ;;  %1828 = vst.msk [vmem:[#allocation3 + $0x42] sm:$0xff] %vm1825_vm4, %v1818_v1  ;;  %v2006_v37 = vld [vmem:[#allocation3 + $0x32] sm:$0xff]  ;;  %v4201_v35 = vpop.f32.mrb[22].mxu0 }
 0x250   : > { %1929 = vst.msk [vmem:[#allocation3 + $0x3b] sm:$0x1] %vm1853_vm5, %v1917_v30  ;;  %2035 = vrot.lane.b32.xlu0 %v2019_v7, %s4968_s29  ;;  %2099 = vrot.lane.b32.xlu1 %v2083_v22, %s4968_s29  ;;  %v4758_v34 = vpack.c.bf16 %v2842_v12, %v2841_v23  ;;  %v4202_v13 = vpop.f32.mrb[23].mxu0  ;;  %v1954_v14 = vld [vmem:[#allocation3 + $0x1] sm:$0xff] }
 0x251   : > { %4757 = vmatprep.subr.bf16.mxu0 %v4756_v60  ;;  %2014 = vst.msk [vmem:[#allocation4 + $0x140] sm:$0xff] %vm1825_vm4, %v2006_v37  ;;  %v4203_v36 = vadd.f32 %v4202_v13, %v4201_v35 }
 0x252   : > { %4759 = vmatpush3.bf16.msra.mxu0 %v4758_v34 }
 0x253   : > { %4761 = vmatprep.subr.bf16.mxu0 %v4760_v16  ;;  %v1688_v41 = vadd.f32 %v4203_v36, %v6014_v4 }
 0x254   : > { %1970 = vrot.lane.b32.xlu0 %v1954_v14, %s4968_s29  ;;  %2101 = vrot.lane.b32.xlu1 %v6217_v3, %s4968_s29 }
 0x255   : > { %v6307_v15 = vld [vmem:[#allocation3 + $0x30] sm:$0xff]  ;;  %v1793_v3 = vadd.f32 %v6091_v45, %v1688_v41 }
 0x256   : > { %v6309_v5 = vld [vmem:[#allocation3 + $0x31] sm:$0xff]  ;;  %1949 = vst.msk [vmem:[#allocation4 + $0x138] sm:$0xff] %vm1825_vm4, %v6307_v15  ;;  %2268 = vst.msk [vmem:[#allocation4 + $0x90] sm:$0xff] %vm1825_vm4, %v6307_v15  ;;  %v1845_v21 = vld [vmem:[#allocation3 + $0x42] sm:$0x1]  ;;  %4763 = vmatpush3.bf16.msra.mxu0 %v4762_v51 }
 0x257   : > { %v6314_v57 = vld [vmem:[#allocation3 + $0x33] sm:$0xff]  ;;  %2460 = vst.msk [vmem:[#allocation4 + $0x40] sm:$0xff] %vm1825_vm4, %v6309_v5  ;;  %2141 = vst.msk [vmem:[#allocation4 + $0xe8] sm:$0xff] %vm1825_vm4, %v6309_v5  ;;  %v1870_v58 = vld [vmem:[#allocation3 + $0x49] sm:$0x1]  ;;  %v1819_v4 = vmax.f32 %v1793_v3, 0.0 }
 0x258   : > { %v6316_v62 = vld [vmem:[#allocation3 + $0x34] sm:$0xff]  ;;  %2205 = vst.msk [vmem:[#allocation4 + $0xf0] sm:$0xff] %vm1825_vm4, %v6314_v57  ;;  %2524 = vst.msk [vmem:[#allocation4 + $0x48] sm:$0xff] %vm1825_vm4, %v6314_v57  ;;  %v1894_v22 = vld [vmem:[#allocation3 + $0x42] sm:$0x1]  ;;  %2037 = vrot.lane.b32.xlu0 %v6219_v17, %s4968_s29 }
 0x259   : > { %2078 = vst.msk [vmem:[#allocation4 + $0x148] sm:$0xff] %vm1825_vm4, %v6316_v62  ;;  %2396 = vst.msk [vmem:[#allocation4 + $0xa0] sm:$0xff] %vm1825_vm4, %v6316_v62  ;;  %v1918_v28 = vld [vmem:[#allocation3 + $0x49] sm:$0x1] }
 0x25a   : > { %1882 = vst.msk [vmem:[#allocation3 + $0x4a] sm:$0x1] %vm1853_vm5, %v1870_v58  ;;  %1858 = vst.msk [vmem:[#allocation3 + $0x40] sm:$0x1] %vm1853_vm5, %v1845_v21  ;;  %v6341_v49 = vld [vmem:[#allocation3 + $0x42] sm:$0xff]  ;;  %v4204_v45 = vpop.f32.mrb[24].mxu0 }
 0x25b   : > { %1906 = vst.msk [vmem:[#allocation3 + $0x41] sm:$0x1] %vm1853_vm5, %v1894_v22  ;;  %v2325_v32 = vld [vmem:[#allocation3 + $0x42] sm:$0xff]  ;;  %1930 = vst.msk [vmem:[#allocation3 + $0x4b] sm:$0x1] %vm1853_vm5, %v1918_v28  ;;  %2169 = vrot.lane.b32.xlu1 %v6341_v49, %s4968_s29  ;;  %v4205_v17 = vpop.f32.mrb[25].mxu0 }
 0x25c   : > { %2333 = vst.msk [vmem:[#allocation4 + $0x100] sm:$0xff] %vm1825_vm4, %v2325_v32  ;;  %2653 = vst.msk [vmem:[#allocation4 + $0x58] sm:$0xff] %vm1825_vm4, %v2325_v32  ;;  %1972 = vrot.lane.b32.xlu0 %v6211_v24, %s4968_s29  ;;  %v4206_v27 = vadd.f32 %v4205_v17, %v4204_v45 }
 0x25d   : > { %2015 = vst.msk [vmem:[#allocation4 + $0x1a8] sm:$0xff] %vm1825_vm4, %v2325_v32  ;;  %1829 = vst.msk [vmem:[#allocation3 + $0x52] sm:$0xff] %vm1825_vm4, %v1819_v4 }
 0x25e   : > { %v1693_v43 = vadd.f32 %v4206_v27, %v6017_v10 }
 0x25f   : > { %2355 = vrot.lane.b32.xlu1 %v6221_v42, %s4968_s29 }
 0x260   : > { %2039 = vrot.lane.b32.xlu0 %v6221_v42, %s4968_s29  ;;  %v1798_v20 = vadd.f32 %v6124_v55, %v1693_v43 }
 0x261   : > { %v2198_v42 = vld [vmem:[#allocation3 + $0x43] sm:$0xff] }
 0x262   : > { %v6354_v38 = vld [vmem:[#allocation3 + $0x40] sm:$0xff]  ;;  %2206 = vst.msk [vmem:[#allocation4 + $0x158] sm:$0xff] %vm1825_vm4, %v2198_v42  ;;  %2525 = vst.msk [vmem:[#allocation4 + $0xb0] sm:$0xff] %vm1825_vm4, %v2198_v42  ;;  %v1820_v55 = vmax.f32 %v1798_v20, 0.0 }
 0x263   : > { %v6356_v39 = vld [vmem:[#allocation3 + $0x41] sm:$0xff]  ;;  %2589 = vst.msk [vmem:[#allocation4 + $0x50] sm:$0xff] %vm1825_vm4, %v6354_v38  ;;  %2103 = vrot.lane.b32.xlu1 %v6307_v15, %s4968_s29 }
 0x264   : > { %v6358_v25 = vld [vmem:[#allocation3 + $0x44] sm:$0xff]  ;;  %2142 = vst.msk [vmem:[#allocation4 + $0x150] sm:$0xff] %vm1825_vm4, %v6356_v39  ;;  %2461 = vst.msk [vmem:[#allocation4 + $0xa8] sm:$0xff] %vm1825_vm4, %v6356_v39  ;;  %v6379_v7 = vld [vmem:[#allocation3 + $0x52] sm:$0xff]  ;;  %1974 = vrot.lane.b32.xlu0 %v6227_v59, %s4968_s29 }
 0x265   : > { %v2071_v24 = vld [vmem:[#allocation3 + $0x44] sm:$0xff]  ;;  %2717 = vst.msk [vmem:[#allocation4 + $0x60] sm:$0xff] %vm1825_vm4, %v6358_v25  ;;  %v1846_v26 = vld [vmem:[#allocation3 + $0x52] sm:$0x1]  ;;  %v1871_v63 = vld [vmem:[#allocation3 + $0x59] sm:$0x1] }
 0x266   : > { %v1942_v30 = vld [vmem:[#allocation3 + $0x40] sm:$0xff]  ;;  %2079 = vst.msk [vmem:[#allocation4 + $0x1b0] sm:$0xff] %vm1825_vm4, %v2071_v24  ;;  %2397 = vst.msk [vmem:[#allocation4 + $0x108] sm:$0xff] %vm1825_vm4, %v2071_v24  ;;  %v1895_v52 = vld [vmem:[#allocation3 + $0x52] sm:$0x1]  ;;  %v4207_v47 = vpop.f32.mrb[26].mxu0 }
 0x267   : > { %1950 = vst.msk [vmem:[#allocation4 + $0x1a0] sm:$0xff] %vm1825_vm4, %v1942_v30  ;;  %2269 = vst.msk [vmem:[#allocation4 + $0xf8] sm:$0xff] %vm1825_vm4, %v1942_v30  ;;  %v1919_v1 = vld [vmem:[#allocation3 + $0x59] sm:$0x1]  ;;  %2171 = vrot.lane.b32.xlu1 %v6379_v7, %s4968_s29  ;;  %v4208_v61 = vpop.f32.mrb[27].mxu0  ;;  %v2341_v36 = vld [vmem:[#allocation3 + $0x43] sm:$0xff] }
 0x268   : > { %1859 = vst.msk [vmem:[#allocation3 + $0x50] sm:$0x1] %vm1853_vm5, %v1846_v26  ;;  %1907 = vst.msk [vmem:[#allocation3 + $0x51] sm:$0x1] %vm1853_vm5, %v1895_v52  ;;  %v2326_v10 = vld [vmem:[#allocation3 + $0x52] sm:$0xff]  ;;  %2291 = vrot.lane.b32.xlu0 %v6227_v59, %s4968_s29  ;;  %v4209_v40 = vadd.f32 %v4208_v61, %v4207_v47 }
 0x269   : > { %1883 = vst.msk [vmem:[#allocation3 + $0x5a] sm:$0x1] %vm1853_vm5, %v1871_v63  ;;  %1931 = vst.msk [vmem:[#allocation3 + $0x5b] sm:$0x1] %vm1853_vm5, %v1919_v1 }
 0x26a   : > { %2334 = vst.msk [vmem:[#allocation4 + $0x168] sm:$0xff] %vm1825_vm4, %v2326_v10  ;;  %2654 = vst.msk [vmem:[#allocation4 + $0xc0] sm:$0xff] %vm1825_vm4, %v2326_v10  ;;  %v1698_v2 = vadd.f32 %v4209_v40, %v6020_v50 }
 0x26b   : > { %2016 = vst.msk [vmem:[#allocation4 + $0x210] sm:$0xff] %vm1825_vm4, %v2326_v10  ;;  %1830 = vst.msk [vmem:[#allocation3 + $0x62] sm:$0xff] %vm1825_vm4, %v1820_v55  ;;  %2420 = vrot.lane.b32.xlu1 %v6307_v15, %s4968_s29 }
 0x26c   : > { %2227 = vrot.lane.b32.xlu0 %v6229_v31, %s4968_s29  ;;  %v1803_v6 = vadd.f32 %v6122_v19, %v1698_v2 }
 0x26e   : > { %v1821_v44 = vmax.f32 %v1803_v6, 0.0 }
 0x26f   : > { %v6398_v29 = vld [vmem:[#allocation3 + $0x50] sm:$0xff]  ;;  %2357 = vrot.lane.b32.xlu1 %v6314_v57, %s4968_s29 }
 0x270   : > { %v6400_v0 = vld [vmem:[#allocation3 + $0x51] sm:$0xff]  ;;  %2590 = vst.msk [vmem:[#allocation4 + $0xb8] sm:$0xff] %vm1825_vm4, %v6398_v29  ;;  %2229 = vrot.lane.b32.xlu0 %v6231_v46, %s4968_s29  ;;  %1831 = vst.msk [vmem:[#allocation3 + $0x72] sm:$0xff] %vm1825_vm4, %v1821_v44 }
 0x271   : > { %v1943_v60 = vld [vmem:[#allocation3 + $0x50] sm:$0xff]  ;;  %2143 = vst.msk [vmem:[#allocation4 + $0x1b8] sm:$0xff] %vm1825_vm4, %v6400_v0 }
 0x272   : > { %v6404_v23 = vld [vmem:[#allocation3 + $0x54] sm:$0xff]  ;;  %1951 = vst.msk [vmem:[#allocation4 + $0x208] sm:$0xff] %vm1825_vm4, %v1943_v60  ;;  %2270 = vst.msk [vmem:[#allocation4 + $0x160] sm:$0xff] %vm1825_vm4, %v1943_v60  ;;  %v1847_v34 = vld [vmem:[#allocation3 + $0x62] sm:$0x1]  ;;  %v4210_v46 = vpop.f32.mrb[28].mxu0 }
 0x273   : > { %v2199_v59 = vld [vmem:[#allocation3 + $0x53] sm:$0xff]  ;;  %2080 = vst.msk [vmem:[#allocation4 + $0x218] sm:$0xff] %vm1825_vm4, %v6404_v23  ;;  %2398 = vst.msk [vmem:[#allocation4 + $0x170] sm:$0xff] %vm1825_vm4, %v6404_v23  ;;  %v1872_v48 = vld [vmem:[#allocation3 + $0x69] sm:$0x1]  ;;  %2105 = vrot.lane.b32.xlu1 %v6354_v38, %s4968_s29  ;;  %v4211_v9 = vpop.f32.mrb[29].mxu0 }
 0x274   : > { %2207 = vst.msk [vmem:[#allocation4 + $0x1c0] sm:$0xff] %vm1825_vm4, %v2199_v59  ;;  %2526 = vst.msk [vmem:[#allocation4 + $0x118] sm:$0xff] %vm1825_vm4, %v2199_v59  ;;  %v2454_v31 = vld [vmem:[#allocation3 + $0x51] sm:$0xff]  ;;  %v1896_v54 = vld [vmem:[#allocation3 + $0x62] sm:$0x1]  ;;  %2486 = vrot.lane.b32.xlu0 %v6341_v49, %s4968_s29  ;;  %v4212_v16 = vadd.f32 %v4211_v9, %v4210_v46 }
 0x275   : > { %v2710_v12 = vld [vmem:[#allocation3 + $0x54] sm:$0xff]  ;;  %2462 = vst.msk [vmem:[#allocation4 + $0x110] sm:$0xff] %vm1825_vm4, %v2454_v31  ;;  %v1920_v37 = vld [vmem:[#allocation3 + $0x69] sm:$0x1] }
 0x276   : > { %2718 = vst.msk [vmem:[#allocation4 + $0xc8] sm:$0xff] %vm1825_vm4, %v2710_v12  ;;  %v2327_v50 = vld [vmem:[#allocation3 + $0x62] sm:$0xff]  ;;  %v1703_v51 = vadd.f32 %v4212_v16, %v6023_v18  ;;  %v2342_v47 = vld [vmem:[#allocation3 + $0x53] sm:$0xff] }
 0x277   : > { %1884 = vst.msk [vmem:[#allocation3 + $0x6a] sm:$0x1] %vm1853_vm5, %v1872_v48  ;;  %1860 = vst.msk [vmem:[#allocation3 + $0x60] sm:$0x1] %vm1853_vm5, %v1847_v34  ;;  %v6438_v19 = vld [vmem:[#allocation3 + $0x62] sm:$0xff]  ;;  %v2328_v22 = vld [vmem:[#allocation3 + $0x72] sm:$0xff] }
 0x278   : > { %1908 = vst.msk [vmem:[#allocation3 + $0x61] sm:$0x1] %vm1853_vm5, %v1896_v54  ;;  %1932 = vst.msk [vmem:[#allocation3 + $0x6b] sm:$0x1] %vm1853_vm5, %v1920_v37  ;;  %2173 = vrot.lane.b32.xlu1 %v6438_v19, %s4968_s29  ;;  %2041 = vrot.lane.b32.xlu0 %v6314_v57, %s4968_s29  ;;  %v1848_v57 = vld [vmem:[#allocation3 + $0x72] sm:$0x1]  ;;  %v1808_v21 = vadd.f32 %v6153_v8, %v1703_v51 }
 0x279   : > { %2335 = vst.msk [vmem:[#allocation4 + $0x1d0] sm:$0xff] %vm1825_vm4, %v2327_v50  ;;  %2017 = vst.msk [vmem:[#allocation4 + $0x278] sm:$0xff] %vm1825_vm4, %v2327_v50  ;;  %v1897_v41 = vld [vmem:[#allocation3 + $0x72] sm:$0x1]  ;;  %v1873_v58 = vld [vmem:[#allocation3 + $0x79] sm:$0x1] }
 0x27a   : > { %2655 = vst.msk [vmem:[#allocation4 + $0x128] sm:$0xff] %vm1825_vm4, %v2327_v50  ;;  %v1921_v18 = vld [vmem:[#allocation3 + $0x79] sm:$0x1]  ;;  %2336 = vst.msk [vmem:[#allocation4 + $0x238] sm:$0xff] %vm1825_vm4, %v2328_v22  ;;  %v1822_v8 = vmax.f32 %v1808_v21, 0.0  ;;  %v2941_v16 = vld [vmem:[%s7265_s3 + $0x380] sm:$0xff] }
 0x27b   : > { %1861 = vst.msk [vmem:[#allocation3 + $0x70] sm:$0x1] %vm1853_vm5, %v1848_v57  ;;  %1909 = vst.msk [vmem:[#allocation3 + $0x71] sm:$0x1] %vm1853_vm5, %v1897_v41 }
 0x27c   : > { %2422 = vrot.lane.b32.xlu1 %v6354_v38, %s4968_s29  ;;  %1976 = vrot.lane.b32.xlu0 %v6309_v5, %s4968_s29  ;;  %1885 = vst.msk [vmem:[#allocation3 + $0x7a] sm:$0x1] %vm1853_vm5, %v1873_v58  ;;  %1933 = vst.msk [vmem:[#allocation3 + $0x7b] sm:$0x1] %vm1853_vm5, %v1921_v18 }
 0x27d   : > { %2018 = vst.msk [vmem:[#allocation4 + $0x2e0] sm:$0xff] %vm1825_vm4, %v2328_v22  ;;  %2656 = vst.msk [vmem:[#allocation4 + $0x190] sm:$0xff] %vm1825_vm4, %v2328_v22  ;;  %v2909_v22 = vld [vmem:[%s7265_s3 + $0x280] sm:$0xff] }
 0x27e   : > { %v2200_v14 = vld [vmem:[#allocation3 + $0x63] sm:$0xff]  ;;  %1832 = vst.msk [vmem:[#allocation3 + $0x82] sm:$0xff] %vm1825_vm4, %v1822_v8  ;;  %v4213_v28 = vpop.f32.mrb[30].mxu0 }
 0x27f   : > { %v6442_v53 = vld [vmem:[#allocation3 + $0x61] sm:$0xff]  ;;  %2208 = vst.msk [vmem:[#allocation4 + $0x228] sm:$0xff] %vm1825_vm4, %v2200_v14  ;;  %2527 = vst.msk [vmem:[#allocation4 + $0x180] sm:$0xff] %vm1825_vm4, %v2200_v14  ;;  %v4214_v3 = vpop.f32.mrb[31].mxu0 }
 0x280   : > { %v6444_v35 = vld [vmem:[#allocation3 + $0x64] sm:$0xff]  ;;  %2144 = vst.msk [vmem:[#allocation4 + $0x220] sm:$0xff] %vm1825_vm4, %v6442_v53  ;;  %2359 = vrot.lane.b32.xlu1 %v2341_v36, %s4968_s29  ;;  %2293 = vrot.lane.b32.xlu0 %v6309_v5, %s4968_s29  ;;  %v4215_v4 = vadd.f32 %v4214_v3, %v4213_v28 }
 0x281   : > { %v2073_v11 = vld [vmem:[#allocation3 + $0x64] sm:$0xff]  ;;  %2719 = vst.msk [vmem:[#allocation4 + $0x130] sm:$0xff] %vm1825_vm4, %v6444_v35 }
 0x282   : > { %v1944_v13 = vld [vmem:[#allocation3 + $0x60] sm:$0xff]  ;;  %2081 = vst.msk [vmem:[#allocation4 + $0x280] sm:$0xff] %vm1825_vm4, %v2073_v11  ;;  %2399 = vst.msk [vmem:[#allocation4 + $0x1d8] sm:$0xff] %vm1825_vm4, %v2073_v11  ;;  %v6478_v49 = vld [vmem:[#allocation3 + $0x71] sm:$0xff]  ;;  %v1708_v27 = vadd.f32 %v4215_v4, %v6062_v56 }
 0x283   : > { %1952 = vst.msk [vmem:[#allocation4 + $0x270] sm:$0xff] %vm1825_vm4, %v1944_v13  ;;  %2271 = vst.msk [vmem:[#allocation4 + $0x1c8] sm:$0xff] %vm1825_vm4, %v1944_v13  ;;  %v2455_v15 = vld [vmem:[#allocation3 + $0x61] sm:$0xff]  ;;  %v1945_v32 = vld [vmem:[#allocation3 + $0x70] sm:$0xff] }
 0x284   : > { %2591 = vst.msk [vmem:[#allocation4 + $0x120] sm:$0xff] %vm1825_vm4, %v1944_v13  ;;  %2463 = vst.msk [vmem:[#allocation4 + $0x178] sm:$0xff] %vm1825_vm4, %v2455_v15  ;;  %2677 = vrot.lane.b32.xlu1 %v2341_v36, %s4968_s29  ;;  %2231 = vrot.lane.b32.xlu0 %v6316_v62, %s4968_s29  ;;  %v6482_v45 = vld [vmem:[#allocation3 + $0x74] sm:$0xff]  ;;  %v1813_v26 = vadd.f32 %v6150_v33, %v1708_v27  ;;  %v2088_v11 = vld [vmem:[#allocation3 + $0x60] sm:$0xff] }
 0x285   : > { %2145 = vst.msk [vmem:[#allocation4 + $0x288] sm:$0xff] %vm1825_vm4, %v6478_v49  ;;  %1953 = vst.msk [vmem:[#allocation4 + $0x2d8] sm:$0xff] %vm1825_vm4, %v1945_v32  ;;  %v2201_v5 = vld [vmem:[#allocation3 + $0x73] sm:$0xff]  ;;  %v1849_v24 = vld [vmem:[#allocation3 + $0x82] sm:$0x1] }
 0x286   : > { %2272 = vst.msk [vmem:[#allocation4 + $0x230] sm:$0xff] %vm1825_vm4, %v1945_v32  ;;  %2592 = vst.msk [vmem:[#allocation4 + $0x188] sm:$0xff] %vm1825_vm4, %v1945_v32  ;;  %v2456_v17 = vld [vmem:[#allocation3 + $0x71] sm:$0xff]  ;;  %v1874_v30 = vld [vmem:[#allocation3 + $0x89] sm:$0x1]  ;;  %v1823_v52 = vmax.f32 %v1813_v26, 0.0 }
 0x287   : > { %2082 = vst.msk [vmem:[#allocation4 + $0x2e8] sm:$0xff] %vm1825_vm4, %v6482_v45  ;;  %2400 = vst.msk [vmem:[#allocation4 + $0x240] sm:$0xff] %vm1825_vm4, %v6482_v45  ;;  %v2712_v38 = vld [vmem:[#allocation3 + $0x74] sm:$0xff]  ;;  %v1898_v42 = vld [vmem:[#allocation3 + $0x82] sm:$0x1] }
 0x288   : > { %2613 = vrot.lane.b32.xlu1 %v6356_v39, %s4968_s29  ;;  %2209 = vst.msk [vmem:[#allocation4 + $0x290] sm:$0xff] %vm1825_vm4, %v2201_v5  ;;  %2528 = vst.msk [vmem:[#allocation4 + $0x1e8] sm:$0xff] %vm1825_vm4, %v2201_v5  ;;  %v1922_v43 = vld [vmem:[#allocation3 + $0x89] sm:$0x1]  ;;  %2548 = vrot.lane.b32.xlu0 %v6316_v62, %s4968_s29  ;;  %v6515_v33 = vld [vmem:[#allocation3 + $0x72] sm:$0xff] }
 0x289   : > { %2464 = vst.msk [vmem:[#allocation4 + $0x1e0] sm:$0xff] %vm1825_vm4, %v2456_v17  ;;  %2720 = vst.msk [vmem:[#allocation4 + $0x198] sm:$0xff] %vm1825_vm4, %v2712_v38  ;;  %v2329_v56 = vld [vmem:[#allocation3 + $0x82] sm:$0xff]  ;;  %v2089_v4 = vld [vmem:[#allocation3 + $0x70] sm:$0xff] }
 0x28a   : > { %1886 = vst.msk [vmem:[#allocation3 + $0x8a] sm:$0x1] %vm1853_vm5, %v1874_v30  ;;  %1862 = vst.msk [vmem:[#allocation3 + $0x80] sm:$0x1] %vm1853_vm5, %v1849_v24  ;;  %v6587_v18 = vld [vmem:[#allocation3 + $0x82] sm:$0xff]  ;;  %v6620_v17 = vld [vmem:[#allocation3 + $0x73] sm:$0xff] }
 0x28b   : > { %1910 = vst.msk [vmem:[#allocation3 + $0x81] sm:$0x1] %vm1853_vm5, %v1898_v42  ;;  %1934 = vst.msk [vmem:[#allocation3 + $0x8b] sm:$0x1] %vm1853_vm5, %v1922_v43  ;;  %v2910_v8 = vld [vmem:[%s7265_s3 + $0x288] sm:$0xff] }
 0x28c   : > { %2107 = vrot.lane.b32.xlu1 %v6398_v29, %s4968_s29  ;;  %2337 = vst.msk [vmem:[#allocation4 + $0x2a0] sm:$0xff] %vm1825_vm4, %v2329_v56  ;;  %2657 = vst.msk [vmem:[#allocation4 + $0x1f8] sm:$0xff] %vm1825_vm4, %v2329_v56  ;;  %2043 = vrot.lane.b32.xlu0 %v2341_v36, %s4968_s29  ;;  %v4796_v28 = vpack.c.bf16 %v2910_v8, %v2909_v22  ;;  %v6606_v32 = vld [vmem:[#allocation3 + $0x63] sm:$0xff]  ;;  %v2895_v8 = vld [vmem:[%s7265_s3 + $0x210] sm:$0xff] }
 0x28d   : > { %1833 = vst.msk [vmem:[#allocation3 + $0x92] sm:$0xff] %vm1825_vm4, %v1823_v52  ;;  %1836 = vst.msk [vmem:[#allocation3 + $0xa2] sm:$0xff] %vm1825_vm4, %v1823_v52 }
 0x28e   : > { %1840 = vst.msk [vmem:[#allocation3 + $0xb2] sm:$0xff] %vm1825_vm4, %v1823_v52  ;;  %4797 = vmatprep.subr.bf16.mxu0 %v4796_v28  ;;  %v2896_v28 = vld [vmem:[%s7265_s3 + $0x218] sm:$0xff] }
 0x290   : > { %2175 = vrot.lane.b32.xlu1 %v6515_v33, %s4968_s29  ;;  %1978 = vrot.lane.b32.xlu0 %v6356_v39, %s4968_s29 }
 0x291   : > { %v2202_v10 = vld [vmem:[#allocation3 + $0x83] sm:$0xff] }
 0x292   : > { %v6519_v62 = vld [vmem:[#allocation3 + $0x81] sm:$0xff]  ;;  %2210 = vst.msk [vmem:[#allocation4 + $0x2f8] sm:$0xff] %vm1825_vm4, %v2202_v10  ;;  %2529 = vst.msk [vmem:[#allocation4 + $0x250] sm:$0xff] %vm1825_vm4, %v2202_v10  ;;  %v2943_v10 = vld [vmem:[%s7265_s3 + $0x390] sm:$0xff] }
 0x293   : > { %v6521_v20 = vld [vmem:[#allocation3 + $0x84] sm:$0xff]  ;;  %2146 = vst.msk [vmem:[#allocation4 + $0x2f0] sm:$0xff] %vm1825_vm4, %v6519_v62 }
 0x294   : > { %v2393_v63 = vld [vmem:[#allocation3 + $0x84] sm:$0xff]  ;;  %2721 = vst.msk [vmem:[#allocation4 + $0x200] sm:$0xff] %vm1825_vm4, %v6521_v20  ;;  %2424 = vrot.lane.b32.xlu1 %v6398_v29, %s4968_s29  ;;  %v1850_v60 = vld [vmem:[#allocation3 + $0x92] sm:$0x1]  ;;  %2295 = vrot.lane.b32.xlu0 %v6356_v39, %s4968_s29  ;;  %v1851_v29 = vld [vmem:[#allocation3 + $0xa2] sm:$0x1] }
 0x295   : > { %v2265_v1 = vld [vmem:[#allocation3 + $0x80] sm:$0xff]  ;;  %2401 = vst.msk [vmem:[#allocation4 + $0x2a8] sm:$0xff] %vm1825_vm4, %v2393_v63  ;;  %v1925_v61 = vld [vmem:[#allocation3 + $0xb9] sm:$0x1]  ;;  %v1899_v40 = vld [vmem:[#allocation3 + $0x92] sm:$0x1] }
 0x296   : > { %2273 = vst.msk [vmem:[#allocation4 + $0x298] sm:$0xff] %vm1825_vm4, %v2265_v1  ;;  %2593 = vst.msk [vmem:[#allocation4 + $0x1f0] sm:$0xff] %vm1825_vm4, %v2265_v1  ;;  %v2457_v55 = vld [vmem:[#allocation3 + $0x81] sm:$0xff]  ;;  %v1875_v31 = vld [vmem:[#allocation3 + $0x99] sm:$0x1] }
 0x297   : > { %2465 = vst.msk [vmem:[#allocation4 + $0x248] sm:$0xff] %vm1825_vm4, %v2457_v55  ;;  %v1900_v59 = vld [vmem:[#allocation3 + $0xa2] sm:$0x1]  ;;  %v1876_v12 = vld [vmem:[#allocation3 + $0xa9] sm:$0x1]  ;;  %v6549_v39 = vld [vmem:[#allocation3 + $0x92] sm:$0xff] }
 0x298   : > { %1937 = vst.msk [vmem:[#allocation3 + $0xbb] sm:$0x1] %vm1853_vm5, %v1925_v61  ;;  %1863 = vst.msk [vmem:[#allocation3 + $0x90] sm:$0x1] %vm1853_vm5, %v1850_v60  ;;  %2361 = vrot.lane.b32.xlu1 %v2342_v47, %s4968_s29  ;;  %v1923_v2 = vld [vmem:[#allocation3 + $0x99] sm:$0x1]  ;;  %2233 = vrot.lane.b32.xlu0 %v6358_v25, %s4968_s29 }
 0x299   : > { %1911 = vst.msk [vmem:[#allocation3 + $0x91] sm:$0x1] %vm1853_vm5, %v1899_v40  ;;  %1864 = vst.msk [vmem:[#allocation3 + $0xa0] sm:$0x1] %vm1853_vm5, %v1851_v29  ;;  %v1877_v34 = vld [vmem:[#allocation3 + $0xb9] sm:$0x1] }
 0x29a   : > { %1912 = vst.msk [vmem:[#allocation3 + $0xa1] sm:$0x1] %vm1853_vm5, %v1900_v59  ;;  %1887 = vst.msk [vmem:[#allocation3 + $0x9a] sm:$0x1] %vm1853_vm5, %v1875_v31  ;;  %v1901_v48 = vld [vmem:[#allocation3 + $0xb2] sm:$0x1] }
 0x29b   : > { %1888 = vst.msk [vmem:[#allocation3 + $0xaa] sm:$0x1] %vm1853_vm5, %v1876_v12  ;;  %1935 = vst.msk [vmem:[#allocation3 + $0x9b] sm:$0x1] %vm1853_vm5, %v1923_v2  ;;  %v1924_v54 = vld [vmem:[#allocation3 + $0xa9] sm:$0x1] }
 0x29c   : > { %1889 = vst.msk [vmem:[#allocation3 + $0xba] sm:$0x1] %vm1853_vm5, %v1877_v34  ;;  %1913 = vst.msk [vmem:[#allocation3 + $0xb1] sm:$0x1] %vm1853_vm5, %v1901_v48  ;;  %v2650_v37 = vld [vmem:[#allocation3 + $0x92] sm:$0xff]  ;;  %v2651_v6 = vld [vmem:[#allocation3 + $0xa2] sm:$0xff]  ;;  %2679 = vrot.lane.b32.xlu1 %v2342_v47, %s4968_s29  ;;  %2550 = vrot.lane.b32.xlu0 %v6358_v25, %s4968_s29 }
 0x29d   : > { %1936 = vst.msk [vmem:[#allocation3 + $0xab] sm:$0x1] %vm1853_vm5, %v1924_v54  ;;  %v2652_v50 = vld [vmem:[#allocation3 + $0xb2] sm:$0xff]  ;;  %v2942_v25 = vld [vmem:[%s7265_s3 + $0x388] sm:$0xff]  ;;  %v2090_v27 = vld [vmem:[#allocation3 + $0x80] sm:$0xff] }
 0x29e   : > { %2338 = vst.msk [vmem:[#allocation4 + $0x308] sm:$0xff] %vm1825_vm4, %v6549_v39  ;;  %2658 = vst.msk [vmem:[#allocation4 + $0x260] sm:$0xff] %vm1825_vm4, %v2650_v37  ;;  %v1852_v44 = vld [vmem:[#allocation3 + $0xb2] sm:$0x1]  ;;  %v4828_v13 = vpack.c.bf16 %v2942_v25, %v2941_v16  ;;  %v6636_v26 = vld [vmem:[#allocation3 + $0x83] sm:$0xff] }
 0x29f   : > { %2659 = vst.msk [vmem:[#allocation4 + $0x2c8] sm:$0xff] %vm1825_vm4, %v2651_v6  ;;  %2660 = vst.msk [vmem:[#allocation4 + $0x330] sm:$0xff] %vm1825_vm4, %v2652_v50  ;;  %v2925_v63 = vld [vmem:[%s7265_s3 + $0x300] sm:$0xff]  ;;  %v2926_v1 = vld [vmem:[%s7265_s3 + $0x308] sm:$0xff] }
 0x2a0   : > { %1865 = vst.msk [vmem:[#allocation3 + $0xb0] sm:$0x1] %vm1853_vm5, %v1852_v44  ;;  %v2266_v46 = vld [vmem:[#allocation3 + $0x90] sm:$0xff]  ;;  %2615 = vrot.lane.b32.xlu1 %v6400_v0, %s4968_s29  ;;  %2045 = vrot.lane.b32.xlu0 %v2342_v47, %s4968_s29  ;;  %v2944_v55 = vld [vmem:[%s7265_s3 + $0x398] sm:$0xff]  ;;  %v4830_v61 = vpack.c.bf16 %v2926_v1, %v2925_v63  ;;  %v2945_v29 = vld [vmem:[%s7265_s3 + $0x3a0] sm:$0xff] }
 0x2a1   : > { %2274 = vst.msk [vmem:[#allocation4 + $0x300] sm:$0xff] %vm1825_vm4, %v2266_v46  ;;  %2594 = vst.msk [vmem:[#allocation4 + $0x258] sm:$0xff] %vm1825_vm4, %v2266_v46  ;;  %v2587_v14 = vld [vmem:[#allocation3 + $0xa0] sm:$0xff]  ;;  %v2522_v15 = vld [vmem:[#allocation3 + $0x93] sm:$0xff]  ;;  %4829 = vmatprep.subr.bf16.mxu1 %v4828_v13  ;;  %v4832_v2 = vpack.c.bf16 %v2944_v55, %v2943_v10 }
 0x2a2   : > { %v6568_v9 = vld [vmem:[#allocation3 + $0x94] sm:$0xff]  ;;  %2595 = vst.msk [vmem:[#allocation4 + $0x2c0] sm:$0xff] %vm1825_vm4, %v2587_v14  ;;  %2530 = vst.msk [vmem:[#allocation4 + $0x2b8] sm:$0xff] %vm1825_vm4, %v2522_v15  ;;  %v2523_v57 = vld [vmem:[#allocation3 + $0xa3] sm:$0xff] }
 0x2a3   : > { %2402 = vst.msk [vmem:[#allocation4 + $0x310] sm:$0xff] %vm1825_vm4, %v6568_v9  ;;  %v2458_v51 = vld [vmem:[#allocation3 + $0x91] sm:$0xff]  ;;  %2531 = vst.msk [vmem:[#allocation4 + $0x320] sm:$0xff] %vm1825_vm4, %v2523_v57  ;;  %v2459_v41 = vld [vmem:[#allocation3 + $0xa1] sm:$0xff] }
 0x2a4   : > { %2109 = vrot.lane.b32.xlu1 %v2088_v11, %s4968_s29  ;;  %2466 = vst.msk [vmem:[#allocation4 + $0x2b0] sm:$0xff] %vm1825_vm4, %v2458_v51  ;;  %v2714_v21 = vld [vmem:[#allocation3 + $0x94] sm:$0xff]  ;;  %v2715_v58 = vld [vmem:[#allocation3 + $0xa4] sm:$0xff]  ;;  %1980 = vrot.lane.b32.xlu0 %v6400_v0, %s4968_s29  ;;  %2467 = vst.msk [vmem:[#allocation4 + $0x318] sm:$0xff] %vm1825_vm4, %v2459_v41 }
 0x2a5   : > { %2722 = vst.msk [vmem:[#allocation4 + $0x268] sm:$0xff] %vm1825_vm4, %v2714_v21  ;;  %2723 = vst.msk [vmem:[#allocation4 + $0x2d0] sm:$0xff] %vm1825_vm4, %v2715_v58  ;;  %v2716_v3 = vld [vmem:[#allocation3 + $0xb4] sm:$0xff]  ;;  %v2946_v34 = vld [vmem:[%s7265_s3 + $0x3a8] sm:$0xff] }
 0x2a6   : > { %2724 = vst.msk [vmem:[#allocation4 + $0x338] sm:$0xff] %vm1825_vm4, %v2716_v3  ;;  %v2410_v47 = vld [vmem:[#allocation3 + $0x90] sm:$0xff]  ;;  %v2928_v40 = vld [vmem:[%s7265_s3 + $0x318] sm:$0xff]  ;;  %v2893_v37 = vld [vmem:[%s7265_s3 + $0x200] sm:$0xff] }
 0x2a7   : > { %v2588_v36 = vld [vmem:[#allocation3 + $0xb0] sm:$0xff]  ;;  %v2894_v6 = vld [vmem:[%s7265_s3 + $0x208] sm:$0xff]  ;;  %v2411_v50 = vld [vmem:[#allocation3 + $0xa0] sm:$0xff] }
 0x2a8   : > { %2596 = vst.msk [vmem:[#allocation4 + $0x328] sm:$0xff] %vm1825_vm4, %v2588_v36  ;;  %2177 = vrot.lane.b32.xlu1 %v6587_v18, %s4968_s29  ;;  %2297 = vrot.lane.b32.xlu0 %v6400_v0, %s4968_s29  ;;  %v2927_v60 = vld [vmem:[%s7265_s3 + $0x310] sm:$0xff]  ;;  %v2912_v46 = vld [vmem:[%s7265_s3 + $0x298] sm:$0xff]  ;;  %v4836_v36 = vpack.c.bf16 %v2946_v34, %v2945_v29  ;;  %v4798_v57 = vpack.c.bf16 %v2894_v6, %v2893_v37 }
 0x2a9   : > { %v2911_v44 = vld [vmem:[%s7265_s3 + $0x290] sm:$0xff]  ;;  %v4834_v16 = vpack.c.bf16 %v2928_v40, %v2927_v60  ;;  %v2929_v25 = vld [vmem:[%s7265_s3 + $0x320] sm:$0xff]  ;;  %v2948_v41 = vld [vmem:[%s7265_s3 + $0x3b8] sm:$0xff] }
 0x2aa   : > { %v2947_v13 = vld [vmem:[%s7265_s3 + $0x3b0] sm:$0xff]  ;;  %v4800_v22 = vpack.c.bf16 %v2912_v46, %v2911_v44  ;;  %v2950_v1 = vld [vmem:[%s7265_s3 + $0x3c8] sm:$0xff]  ;;  %v2897_v10 = vld [vmem:[%s7265_s3 + $0x220] sm:$0xff] }
 0x2ab   : > { %v6708_v3 = vld [vmem:[#allocation3 + $0x93] sm:$0xff]  ;;  %v2898_v55 = vld [vmem:[%s7265_s3 + $0x228] sm:$0xff] }
 0x2ac   : > { %2426 = vrot.lane.b32.xlu1 %v2088_v11, %s4968_s29  ;;  %2235 = vrot.lane.b32.xlu0 %v6404_v23, %s4968_s29  ;;  %v2930_v11 = vld [vmem:[%s7265_s3 + $0x328] sm:$0xff]  ;;  %v2900_v37 = vld [vmem:[%s7265_s3 + $0x238] sm:$0xff] }
 0x2ad   : > { %v2951_v6 = vld [vmem:[%s7265_s3 + $0x3d0] sm:$0xff]  ;;  %v2936_v46 = vld [vmem:[%s7265_s3 + $0x358] sm:$0xff] }
 0x2ae   : > { %v2164_v5 = vpop.permute.xlu1 %2163  ;;  %v2935_v44 = vld [vmem:[%s7265_s3 + $0x350] sm:$0xff] }
 0x2af   : > { %2187 = vst.msk [vmem:[#allocation4 + $0x18] sm:$0xff] %vm1994_vm6, %v2164_v5  ;;  %v2914_v5 = vld [vmem:[%s7265_s3 + $0x2a8] sm:$0xff] }
 0x2b0   : > { %2363 = vrot.lane.b32.xlu1 %v6606_v32, %s4968_s29  ;;  %2047 = vrot.lane.b32.xlu0 %v6606_v32, %s4968_s29 }
 0x2b2   : > { %v2166_v0 = vpop.permute.xlu1 %2165 }
 0x2b3   : > { %2188 = vst.msk [vmem:[#allocation4 + $0x80] sm:$0xff] %vm1994_vm6, %v2166_v0  ;;  %v4838_v0 = vpack.c.bf16 %v2930_v11, %v2929_v25  ;;  %v2918_v25 = vld [vmem:[%s7265_s3 + $0x2c8] sm:$0xff] }
 0x2b4   : > { %2111 = vrot.lane.b32.xlu1 %v2089_v4, %s4968_s29  ;;  %1982 = vrot.lane.b32.xlu0 %v6442_v53, %s4968_s29 }
 0x2b6   : > { %v2728_v38 = vld [vmem:[#allocation4 + $0x18] sm:$0xff] }
 0x2b7   : > { %3229 = vmatprep.mubr.f32.mxu1 %v2728_v38  ;;  %v2931_v38 = vld [vmem:[%s7265_s3 + $0x330] sm:$0xff] }
 0x2b8   : > { %2428 = vrot.lane.b32.xlu1 %v2089_v4, %s4968_s29  ;;  %2299 = vrot.lane.b32.xlu0 %v6442_v53, %s4968_s29  ;;  %v2913_v4 = vld [vmem:[%s7265_s3 + $0x2a0] sm:$0xff] }
 0x2b9   : > { %v4804_v63 = vpack.c.bf16 %v2914_v5, %v2913_v4  ;;  %v2920_v4 = vld [vmem:[%s7265_s3 + $0x2d8] sm:$0xff] }
 0x2ba   : > { %v2741_v54 = vld [vmem:[#allocation4 + $0x80] sm:$0xff] }
 0x2bc   : > { %2365 = vrot.lane.b32.xlu1 %v6620_v17, %s4968_s29  ;;  %2237 = vrot.lane.b32.xlu0 %v6444_v35, %s4968_s29 }
 0x2be   : > { %v2485_v24 = vpop.permute.xlu0 %2484  ;;  %v2168_v30 = vpop.permute.xlu1 %2167 }
 0x2bf   : > { %2508 = vst.msk [vmem:[#allocation4 + $0x40] sm:$0xff] %vm1994_vm6, %v2485_v24  ;;  %2189 = vst.msk [vmem:[#allocation4 + $0xe8] sm:$0xff] %vm1994_vm6, %v2168_v30  ;;  %v4840_v30 = vpack.c.bf16 %v2948_v41, %v2947_v13 }
 0x2c0   : > { %2113 = vrot.lane.b32.xlu1 %v2090_v27, %s4968_s29  ;;  %2049 = vrot.lane.b32.xlu0 %v6620_v17, %s4968_s29 }
 0x2c2   : > { %v2036_v42 = vpop.permute.xlu0 %2035  ;;  %v2100_v43 = vpop.permute.xlu1 %2099 }
 0x2c3   : > { %2059 = vst.msk [vmem:[#allocation4 + $0x8] sm:$0xff] %vm1994_vm6, %v2036_v42  ;;  %2123 = vst.msk [vmem:[#allocation4 + $0x10] sm:$0xff] %vm1994_vm6, %v2100_v43  ;;  %v4802_v42 = vpack.c.bf16 %v2896_v28, %v2895_v8  ;;  %v2932_v43 = vld [vmem:[%s7265_s3 + $0x338] sm:$0xff]  ;;  %v2919_v28 = vld [vmem:[%s7265_s3 + $0x2d0] sm:$0xff] }
 0x2c4   : > { %2430 = vrot.lane.b32.xlu1 %v2090_v27, %s4968_s29  ;;  %1984 = vrot.lane.b32.xlu0 %v6478_v49, %s4968_s29  ;;  %v4842_v60 = vpack.c.bf16 %v2932_v43, %v2931_v38  ;;  %v4850_v38 = vpack.c.bf16 %v2936_v46, %v2935_v44  ;;  %v2955_v43 = vld [vmem:[%s7265_s3 + $0x3f0] sm:$0xff] }
 0x2c5   : > { %v2907_v46 = vld [vmem:[%s7265_s3 + $0x270] sm:$0xff] }
 0x2c6   : > { %v1971_v56 = vpop.permute.xlu0 %1970  ;;  %v2102_v52 = vpop.permute.xlu1 %2101  ;;  %v2754_v58 = vld [vmem:[#allocation4 + $0xe8] sm:$0xff] }
 0x2c7   : > { %1995 = vst.msk [vmem:[#allocation4] sm:$0xff] %vm1994_vm6, %v1971_v56  ;;  %2124 = vst.msk [vmem:[#allocation4 + $0x78] sm:$0xff] %vm1994_vm6, %v2102_v52  ;;  %v2949_v56 = vld [vmem:[%s7265_s3 + $0x3c0] sm:$0xff] }
 0x2c8   : > { %2367 = vrot.lane.b32.xlu1 %v6636_v26, %s4968_s29  ;;  %2301 = vrot.lane.b32.xlu0 %v6478_v49, %s4968_s29 }
 0x2ca   : > { %v2038_v59 = vpop.permute.xlu0 %2037  ;;  %v2726_v31 = vld [vmem:[#allocation4 + $0x8] sm:$0xff]  ;;  %v2727_v12 = vld [vmem:[#allocation4 + $0x10] sm:$0xff] }
 0x2cb   : > { %2060 = vst.msk [vmem:[#allocation4 + $0x70] sm:$0xff] %vm1994_vm6, %v2038_v59  ;;  %3124 = vmatprep.mubr.f32.mxu0 %v2726_v31  ;;  %3230 = vmatmul.mubr.f32.vlgmr.msra.gmra.mrb[24].mxu1 %v2727_v12  ;;  %v6748_v59 = vld [vmem:[#allocation3 + $0x91] sm:$0xff]  ;;  %v4844_v31 = vpack.c.bf16 %v2950_v1, %v2949_v56  ;;  %v4806_v12 = vpack.c.bf16 %v2898_v55, %v2897_v10  ;;  %v2921_v1 = vld [vmem:[%s7265_s3 + $0x2e0] sm:$0xff]  ;;  %v2922_v10 = vld [vmem:[%s7265_s3 + $0x2e8] sm:$0xff] }
 0x2cc   : > { %2432 = vrot.lane.b32.xlu1 %v2410_v47, %s4968_s29  ;;  %3234 = vmatprep.mubr.f32.mxu1 %v2741_v54  ;;  %v2915_v47 = vld [vmem:[%s7265_s3 + $0x2b0] sm:$0xff] }
 0x2cd   : > { %v2170_v48 = vpop.permute.xlu1 %2169  ;;  %2239 = vrot.lane.b32.xlu0 %v6482_v45, %s4968_s29  ;;  %4831 = vmatpush3.bf16.msra.mxu1 %v4830_v61  ;;  %v2916_v61 = vld [vmem:[%s7265_s3 + $0x2b8] sm:$0xff]  ;;  %v2899_v54 = vld [vmem:[%s7265_s3 + $0x230] sm:$0xff] }
 0x2ce   : > { %2190 = vst.msk [vmem:[#allocation4 + $0x150] sm:$0xff] %vm1994_vm6, %v2170_v48  ;;  %v1973_v14 = vpop.permute.xlu0 %1972  ;;  %v2725_v15 = vld [vmem:[#allocation4] sm:$0xff]  ;;  %v2740_v51 = vld [vmem:[#allocation4 + $0x78] sm:$0xff]  ;;  %4833 = vmatprep.subr.bf16.mxu1 %v4832_v2  ;;  %v4808_v48 = vpack.c.bf16 %v2916_v61, %v2915_v47  ;;  %v2903_v56 = vld [vmem:[%s7265_s3 + $0x250] sm:$0xff] }
 0x2cf   : > { %1996 = vst.msk [vmem:[#allocation4 + $0x68] sm:$0xff] %vm1994_vm6, %v1973_v14  ;;  %3125 = vmatmul.mubr.f32.vlgmr.msra.gmra.mrb[32].mxu0 %v2725_v15  ;;  %3235 = vmatmul.mubr.f32.gmra.mrb[26].mxu1 %v2740_v51  ;;  %v2933_v2 = vld [vmem:[%s7265_s3 + $0x340] sm:$0xff]  ;;  %v4810_v14 = vpack.c.bf16 %v2900_v37, %v2899_v54  ;;  %v2954_v51 = vld [vmem:[%s7265_s3 + $0x3e8] sm:$0xff]  ;;  %v2939_v61 = vld [vmem:[%s7265_s3 + $0x370] sm:$0xff] }
 0x2d0   : > { %2434 = vrot.lane.b32.xlu1 %v2411_v50, %s4968_s29  ;;  %3239 = vmatprep.mubr.f32.mxu1 %v2754_v58  ;;  %v2952_v50 = vld [vmem:[%s7265_s3 + $0x3d8] sm:$0xff]  ;;  %v2953_v15 = vld [vmem:[%s7265_s3 + $0x3e0] sm:$0xff]  ;;  %v2902_v58 = vld [vmem:[%s7265_s3 + $0x248] sm:$0xff] }
 0x2d1   : > { %v2356_v21 = vpop.permute.xlu1 %2355  ;;  %2303 = vrot.lane.b32.xlu0 %v6519_v62, %s4968_s29  ;;  %4835 = vmatpush3.bf16.msra.mxu1 %v4834_v16  ;;  %v2917_v16 = vld [vmem:[%s7265_s3 + $0x2c0] sm:$0xff]  ;;  %v4848_v41 = vpack.c.bf16 %v2952_v50, %v2951_v6 }
 0x2d2   : > { %2379 = vst.msk [vmem:[#allocation4 + $0x30] sm:$0xff] %vm1994_vm6, %v2356_v21  ;;  %v2040_v27 = vpop.permute.xlu0 %2039  ;;  %v2739_v24 = vld [vmem:[#allocation4 + $0x70] sm:$0xff]  ;;  %4837 = vmatprep.subr.bf16.mxu1 %v4836_v36  ;;  %4799 = vmatpush3.bf16.msra.mxu0 %v4798_v57  ;;  %v2901_v21 = vld [vmem:[%s7265_s3 + $0x240] sm:$0xff]  ;;  %v4812_v8 = vpack.c.bf16 %v2918_v25, %v2917_v16  ;;  %v2974_v25 = vld [vmem:[%s7265_s3 + $0x488] sm:$0xff] }
 0x2d3   : > { %2061 = vst.msk [vmem:[#allocation4 + $0xd8] sm:$0xff] %vm1994_vm6, %v2040_v27  ;;  %3129 = vmatprep.mubr.f32.mxu0 %v2739_v24  ;;  %4801 = vmatprep.subr.bf16.mxu0 %v4800_v22  ;;  %v2937_v27 = vld [vmem:[%s7265_s3 + $0x360] sm:$0xff]  ;;  %v2938_v24 = vld [vmem:[%s7265_s3 + $0x368] sm:$0xff] }
 0x2d4   : > { %2369 = vrot.lane.b32.xlu1 %v6708_v3, %s4968_s29  ;;  %v2973_v16 = vld [vmem:[%s7265_s3 + $0x480] sm:$0xff] }
 0x2d5   : > { %v2104_v52 = vpop.permute.xlu1 %2103  ;;  %2241 = vrot.lane.b32.xlu0 %v6521_v20, %s4968_s29  ;;  %4839 = vmatpush3.bf16.msra.mxu1 %v4838_v0  ;;  %v2767_v22 = vld [vmem:[#allocation4 + $0x150] sm:$0xff] }
 0x2d6   : > { %2125 = vst.msk [vmem:[#allocation4 + $0xe0] sm:$0xff] %vm1994_vm6, %v2104_v52  ;;  %v1975_v40 = vpop.permute.xlu0 %1974  ;;  %v2738_v29 = vld [vmem:[#allocation4 + $0x68] sm:$0xff]  ;;  %4841 = vmatprep.subr.bf16.mxu1 %v4840_v30  ;;  %4803 = vmatpush3.bf16.msra.mxu0 %v4802_v42  ;;  %v4816_v42 = vpack.c.bf16 %v2920_v4, %v2919_v28  ;;  %v2904_v52 = vld [vmem:[%s7265_s3 + $0x258] sm:$0xff] }
 0x2d7   : > { %1997 = vst.msk [vmem:[#allocation4 + $0xd0] sm:$0xff] %vm1994_vm6, %v1975_v40  ;;  %3130 = vmatmul.mubr.f32.gmra.mrb[34].mxu0 %v2738_v29  ;;  %4805 = vmatprep.subr.bf16.mxu0 %v4804_v63  ;;  %v2956_v63 = vld [vmem:[%s7265_s3 + $0x3f8] sm:$0xff]  ;;  %v4818_v47 = vpack.c.bf16 %v2904_v52, %v2903_v56 }
 0x2d8   : > { %2681 = vrot.lane.b32.xlu1 %v6606_v32, %s4968_s29  ;;  %v2934_v32 = vld [vmem:[%s7265_s3 + $0x348] sm:$0xff]  ;;  %v4856_v29 = vpack.c.bf16 %v2956_v63, %v2955_v43 }
 0x2d9   : > { %v2172_v34 = vpop.permute.xlu1 %2171  ;;  %2305 = vrot.lane.b32.xlu0 %v6748_v59, %s4968_s29  ;;  %4843 = vmatpush3.bf16.msra.mxu1 %v4842_v60  ;;  %v2940_v60 = vld [vmem:[%s7265_s3 + $0x378] sm:$0xff] }
 0x2da   : > { %2191 = vst.msk [vmem:[#allocation4 + $0x1b8] sm:$0xff] %vm1994_vm6, %v2172_v34  ;;  %v2292_v11 = vpop.permute.xlu0 %2291  ;;  %v2752_v13 = vld [vmem:[#allocation4 + $0xd8] sm:$0xff]  ;;  %4845 = vmatprep.subr.bf16.mxu1 %v4844_v31  ;;  %4807 = vmatpush3.bf16.msra.mxu0 %v4806_v12  ;;  %v3005_v31 = vld [vmem:[%s7265_s3 + $0x580] sm:$0xff]  ;;  %v3006_v34 = vld [vmem:[%s7265_s3 + $0x588] sm:$0xff]  ;;  %v4858_v37 = vpack.c.bf16 %v2940_v60, %v2939_v61 }
 0x2db   : > { %2315 = vst.msk [vmem:[#allocation4 + $0x28] sm:$0xff] %vm1994_vm6, %v2292_v11  ;;  %3134 = vmatprep.mubr.f32.mxu0 %v2752_v13  ;;  %4809 = vmatprep.subr.bf16.mxu0 %v4808_v48  ;;  %v2905_v12 = vld [vmem:[%s7265_s3 + $0x260] sm:$0xff]  ;;  %v2924_v48 = vld [vmem:[%s7265_s3 + $0x2f8] sm:$0xff]  ;;  %v4892_v50 = vpack.c.bf16 %v3006_v34, %v3005_v31 }
 0x2dc   : > { %2617 = vrot.lane.b32.xlu1 %v6442_v53, %s4968_s29  ;;  %v4846_v53 = vpack.c.bf16 %v2934_v32, %v2933_v2  ;;  %v2906_v2 = vld [vmem:[%s7265_s3 + $0x268] sm:$0xff]  ;;  %v2923_v32 = vld [vmem:[%s7265_s3 + $0x2f0] sm:$0xff] }
 0x2dd   : > { %v2421_v36 = vpop.permute.xlu1 %2420  ;;  %v2753_v57 = vld [vmem:[#allocation4 + $0xe0] sm:$0xff]  ;;  %2552 = vrot.lane.b32.xlu0 %v6404_v23, %s4968_s29  ;;  %v4814_v23 = vpack.c.bf16 %v2902_v58, %v2901_v21  ;;  %v4824_v44 = vpack.c.bf16 %v2924_v48, %v2923_v32 }
 0x2de   : > { %2444 = vst.msk [vmem:[#allocation4 + $0x38] sm:$0xff] %vm1994_vm6, %v2421_v36  ;;  %3240 = vmatmul.mubr.f32.gmra.mrb[28].mxu1 %v2753_v57  ;;  %v2228_v5 = vpop.permute.xlu0 %2227  ;;  %v2751_v0 = vld [vmem:[#allocation4 + $0xd0] sm:$0xff]  ;;  %4811 = vmatpush3.bf16.msra.mxu0 %v4810_v14  ;;  %v2667_v57 = vld [vmem:[#allocation3 + $0xa3] sm:$0xff] }
 0x2df   : > { %3244 = vmatprep.mubr.f32.mxu1 %v2767_v22  ;;  %4847 = vmatpush3.bf16.msra.mxu1 %v4846_v53  ;;  %2251 = vst.msk [vmem:[#allocation4 + $0x20] sm:$0xff] %vm1994_vm6, %v2228_v5  ;;  %v2668_v22 = vld [vmem:[#allocation3 + $0xb3] sm:$0xff] }
 0x2e0   : > { %2683 = vrot.lane.b32.xlu1 %v6620_v17, %s4968_s29  ;;  %3135 = vmatmul.mubr.f32.gmra.mrb[36].mxu0 %v2751_v0  ;;  %v4852_v17 = vpack.c.bf16 %v2954_v51, %v2953_v15  ;;  %v2539_v0 = vld [vmem:[#allocation3 + $0xa4] sm:$0xff] }
 0x2e1   : > { %v2358_v30 = vpop.permute.xlu1 %2357  ;;  %4849 = vmatprep.subr.bf16.mxu1 %v4848_v41  ;;  %2488 = vrot.lane.b32.xlu0 %v6379_v7, %s4968_s29  ;;  %v4854_v7 = vpack.c.bf16 %v2938_v24, %v2937_v27  ;;  %v2780_v15 = vld [vmem:[#allocation4 + $0x1b8] sm:$0xff]  ;;  %v2475_v24 = vld [vmem:[#allocation3 + $0xa2] sm:$0xff] }
 0x2e2   : > { %2380 = vst.msk [vmem:[#allocation4 + $0x98] sm:$0xff] %vm1994_vm6, %v2358_v30  ;;  %4813 = vmatprep.subr.bf16.mxu0 %v4812_v8  ;;  %v2230_v55 = vpop.permute.xlu0 %2229 }
 0x2e3   : > { %4851 = vmatpush3.bf16.msra.mxu1 %v4850_v38  ;;  %4815 = vmatpush3.bf16.msra.mxu0 %v4814_v23  ;;  %2252 = vst.msk [vmem:[#allocation4 + $0x88] sm:$0xff] %vm1994_vm6, %v2230_v55 }
 0x2e4   : > { %2619 = vrot.lane.b32.xlu1 %v6478_v49, %s4968_s29  ;;  %4853 = vmatprep.subr.bf16.mxu1 %v4852_v17  ;;  %v4820_v49 = vpack.c.bf16 %v2922_v10, %v2921_v1 }
 0x2e5   : > { %v2106_v40 = vpop.permute.xlu1 %2105  ;;  %4817 = vmatprep.subr.bf16.mxu0 %v4816_v42  ;;  %2554 = vrot.lane.b32.xlu0 %v6444_v35, %s4968_s29  ;;  %v4822_v35 = vpack.c.bf16 %v2906_v2, %v2905_v12 }
 0x2e6   : > { %2126 = vst.msk [vmem:[#allocation4 + $0x148] sm:$0xff] %vm1994_vm6, %v2106_v40  ;;  %v2487_v54 = vpop.permute.xlu0 %2486 }
 0x2e7   : > { %4855 = vmatpush3.bf16.msra.mxu1 %v4854_v7  ;;  %4819 = vmatpush3.bf16.msra.mxu0 %v4818_v47  ;;  %2509 = vst.msk [vmem:[#allocation4 + $0xa8] sm:$0xff] %vm1994_vm6, %v2487_v54 }
 0x2e8   : > { %2685 = vrot.lane.b32.xlu1 %v6636_v26, %s4968_s29  ;;  %4857 = vmatprep.subr.bf16.mxu1 %v4856_v29  ;;  %v2908_v26 = vld [vmem:[%s7265_s3 + $0x278] sm:$0xff] }
 0x2e9   : > { %4821 = vmatprep.subr.bf16.mxu0 %v4820_v49  ;;  %2490 = vrot.lane.b32.xlu0 %v6438_v19, %s4968_s29  ;;  %v4826_v13 = vpack.c.bf16 %v2908_v26, %v2907_v46  ;;  %v4860_v19 = vpack.c.bf16 %v2974_v25, %v2973_v16  ;;  %v2989_v25 = vld [vmem:[%s7265_s3 + $0x500] sm:$0xff] }
 0x2ea   : > { %v2174_v6 = vpop.permute.xlu1 %2173  ;;  %v2042_v11 = vpop.permute.xlu0 %2041 }
 0x2eb   : > { %2192 = vst.msk [vmem:[#allocation4 + $0x220] sm:$0xff] %vm1994_vm6, %v2174_v6  ;;  %4859 = vmatpush3.bf16.msra.mxu1 %v4858_v37  ;;  %4823 = vmatpush3.bf16.msra.mxu0 %v4822_v35  ;;  %2062 = vst.msk [vmem:[#allocation4 + $0x140] sm:$0xff] %vm1994_vm6, %v2042_v11  ;;  %v2990_v11 = vld [vmem:[%s7265_s3 + $0x508] sm:$0xff] }
 0x2ec   : > { %2621 = vrot.lane.b32.xlu1 %v6519_v62, %s4968_s29  ;;  %4893 = vmatprep.subr.bf16.mxu1 %v4892_v50 }
 0x2ed   : > { %v2766_v14 = vld [vmem:[#allocation4 + $0x148] sm:$0xff]  ;;  %4825 = vmatprep.subr.bf16.mxu0 %v4824_v44  ;;  %2556 = vrot.lane.b32.xlu0 %v6482_v45, %s4968_s29 }
 0x2ee   : > { %v2423_v53 = vpop.permute.xlu1 %2422  ;;  %3245 = vmatmul.mubr.f32.gmra.mrb[30].mxu1 %v2766_v14  ;;  %v1977_v62 = vpop.permute.xlu0 %1976  ;;  %v3007_v14 = vld [vmem:[%s7265_s3 + $0x590] sm:$0xff] }
 0x2ef   : > { %2445 = vst.msk [vmem:[#allocation4 + $0xa0] sm:$0xff] %vm1994_vm6, %v2423_v53  ;;  %3249 = vmatprep.mubr.f32.mxu1 %v2780_v15  ;;  %4827 = vmatpush3.bf16.msra.mxu0 %v4826_v13  ;;  %1998 = vst.msk [vmem:[#allocation4 + $0x138] sm:$0xff] %vm1994_vm6, %v1977_v62  ;;  %v2732_v15 = vld [vmem:[#allocation4 + $0x38] sm:$0xff]  ;;  %v4894_v62 = vpack.c.bf16 %v2990_v11, %v2989_v25 }
 0x2f0   : > { %2687 = vrot.lane.b32.xlu1 %v6708_v3, %s4968_s29  ;;  %4861 = vmatprep.subr.bf16.mxu0 %v4860_v19  ;;  %v3008_v19 = vld [vmem:[%s7265_s3 + $0x598] sm:$0xff] }
 0x2f1   : > { %2492 = vrot.lane.b32.xlu0 %v6515_v33, %s4968_s29 }
 0x2f2   : > { %v2360_v51 = vpop.permute.xlu1 %2359  ;;  %v2294_v45 = vpop.permute.xlu0 %2293  ;;  %v2765_v36 = vld [vmem:[#allocation4 + $0x140] sm:$0xff] }
 0x2f3   : > { %2381 = vst.msk [vmem:[#allocation4 + $0x100] sm:$0xff] %vm1994_vm6, %v2360_v51  ;;  %2316 = vst.msk [vmem:[#allocation4 + $0x90] sm:$0xff] %vm1994_vm6, %v2294_v45  ;;  %3139 = vmatprep.mubr.f32.mxu0 %v2765_v36  ;;  %v2793_v38 = vld [vmem:[#allocation4 + $0x220] sm:$0xff]  ;;  %v4896_v36 = vpack.c.bf16 %v3008_v19, %v3007_v14  ;;  %v3015_v14 = vld [vmem:[%s7265_s3 + $0x5d0] sm:$0xff] }
 0x2f4   : > { %2623 = vrot.lane.b32.xlu1 %v6748_v59, %s4968_s29  ;;  %v2603_v59 = vld [vmem:[#allocation3 + $0xa1] sm:$0xff]  ;;  %v3016_v19 = vld [vmem:[%s7265_s3 + $0x5d8] sm:$0xff] }
 0x2f5   : > { %2558 = vrot.lane.b32.xlu0 %v6521_v20, %s4968_s29 }
 0x2f6   : > { %v2678_v3 = vpop.permute.xlu1 %2677  ;;  %v2232_v41 = vpop.permute.xlu0 %2231  ;;  %v2764_v21 = vld [vmem:[#allocation4 + $0x138] sm:$0xff] }
 0x2f7   : > { %2701 = vst.msk [vmem:[#allocation4 + $0x58] sm:$0xff] %vm1994_vm6, %v2678_v3  ;;  %2253 = vst.msk [vmem:[#allocation4 + $0xf0] sm:$0xff] %vm1994_vm6, %v2232_v41  ;;  %3140 = vmatmul.mubr.f32.gmra.mrb[38].mxu0 %v2764_v21  ;;  %v2991_v3 = vld [vmem:[%s7265_s3 + $0x510] sm:$0xff] }
 0x2f8   : > { %2689 = vrot.lane.b32.xlu1 %v2667_v57, %s4968_s29  ;;  %v2992_v57 = vld [vmem:[%s7265_s3 + $0x518] sm:$0xff]  ;;  %v2731_v21 = vld [vmem:[#allocation4 + $0x30] sm:$0xff] }
 0x2f9   : > { %2494 = vrot.lane.b32.xlu0 %v6587_v18, %s4968_s29  ;;  %v2604_v18 = vld [vmem:[#allocation3 + $0xb1] sm:$0xff] }
 0x2fa   : > { %v2614_v33 = vpop.permute.xlu1 %2613  ;;  %v2549_v58 = vpop.permute.xlu0 %2548 }
 0x2fb   : > { %2637 = vst.msk [vmem:[#allocation4 + $0x50] sm:$0xff] %vm1994_vm6, %v2614_v33  ;;  %2572 = vst.msk [vmem:[#allocation4 + $0x48] sm:$0xff] %vm1994_vm6, %v2549_v58  ;;  %v3009_v33 = vld [vmem:[%s7265_s3 + $0x5a0] sm:$0xff] }
 0x2fc   : > { %2625 = vrot.lane.b32.xlu1 %v2603_v59, %s4968_s29  ;;  %v3010_v59 = vld [vmem:[%s7265_s3 + $0x5a8] sm:$0xff]  ;;  %v2745_v58 = vld [vmem:[#allocation4 + $0xa0] sm:$0xff] }
 0x2fd   : > { %2560 = vrot.lane.b32.xlu0 %v6568_v9, %s4968_s29 }
 0x2fe   : > { %v2108_v20 = vpop.permute.xlu1 %2107  ;;  %v2044_v8 = vpop.permute.xlu0 %2043 }
 0x2ff   : > { %2127 = vst.msk [vmem:[#allocation4 + $0x1b0] sm:$0xff] %vm1994_vm6, %v2108_v20  ;;  %2063 = vst.msk [vmem:[#allocation4 + $0x1a8] sm:$0xff] %vm1994_vm6, %v2044_v8  ;;  %v4898_v20 = vpack.c.bf16 %v2992_v57, %v2991_v3  ;;  %v2958_v8 = vld [vmem:[%s7265_s3 + $0x408] sm:$0xff]  ;;  %v2755_v3 = vld [vmem:[#allocation4 + $0xf0] sm:$0xff] }
 0x300   : > { %2691 = vrot.lane.b32.xlu1 %v2668_v22, %s4968_s29  ;;  %v2957_v22 = vld [vmem:[%s7265_s3 + $0x400] sm:$0xff] }
 0x301   : > { %2496 = vrot.lane.b32.xlu0 %v6549_v39, %s4968_s29 }
 0x302   : > { %v2176_v28 = vpop.permute.xlu1 %2175  ;;  %v1979_v4 = vpop.permute.xlu0 %1978 }
 0x303   : > { %2193 = vst.msk [vmem:[#allocation4 + $0x288] sm:$0xff] %vm1994_vm6, %v2176_v28  ;;  %1999 = vst.msk [vmem:[#allocation4 + $0x1a0] sm:$0xff] %vm1994_vm6, %v1979_v4  ;;  %v2993_v28 = vld [vmem:[%s7265_s3 + $0x520] sm:$0xff] }
 0x304   : > { %2627 = vrot.lane.b32.xlu1 %v2604_v18, %s4968_s29 }
 0x305   : > { %2562 = vrot.lane.b32.xlu0 %v2539_v0, %s4968_s29  ;;  %v2975_v0 = vld [vmem:[%s7265_s3 + $0x490] sm:$0xff] }
 0x306   : > { %v2425_v5 = vpop.permute.xlu1 %2424  ;;  %v2779_v9 = vld [vmem:[#allocation4 + $0x1b0] sm:$0xff]  ;;  %v2296_v23 = vpop.permute.xlu0 %2295  ;;  %v2778_v27 = vld [vmem:[#allocation4 + $0x1a8] sm:$0xff] }
 0x307   : > { %2446 = vst.msk [vmem:[#allocation4 + $0x108] sm:$0xff] %vm1994_vm6, %v2425_v5  ;;  %3250 = vmatmul.mubr.f32.gmra.mrb[32].mxu1 %v2779_v9  ;;  %2317 = vst.msk [vmem:[#allocation4 + $0xf8] sm:$0xff] %vm1994_vm6, %v2296_v23  ;;  %3144 = vmatprep.mubr.f32.mxu0 %v2778_v27  ;;  %v4900_v5 = vpack.c.bf16 %v3010_v59, %v3009_v33  ;;  %v2994_v9 = vld [vmem:[%s7265_s3 + $0x528] sm:$0xff]  ;;  %v2744_v23 = vld [vmem:[#allocation4 + $0x98] sm:$0xff] }
 0x308   : > { %3254 = vmatprep.mubr.f32.mxu1 %v2793_v38  ;;  %v2730_v27 = vld [vmem:[#allocation4 + $0x28] sm:$0xff]  ;;  %v2981_v33 = vld [vmem:[%s7265_s3 + $0x4c0] sm:$0xff] }
 0x309   : > { %2498 = vrot.lane.b32.xlu0 %v2475_v24, %s4968_s29  ;;  %s4047_s29 = sshll.u32 %s7269_s19, 6 }
 0x30a   : > { %v2362_v39 = vpop.permute.xlu1 %2361  ;;  %v2234_v30 = vpop.permute.xlu0 %2233  ;;  %v2777_v17 = vld [vmem:[#allocation4 + $0x1a0] sm:$0xff]  ;;  %v2806_v60 = vld [vmem:[#allocation4 + $0x288] sm:$0xff]  ;;  %s7240_s8 = scalar_lea.vmem %s7267_s5, %s4047_s29 }
 0x30b   : > { %2382 = vst.msk [vmem:[#allocation4 + $0x168] sm:$0xff] %vm1994_vm6, %v2362_v39  ;;  %2254 = vst.msk [vmem:[#allocation4 + $0x158] sm:$0xff] %vm1994_vm6, %v2234_v30  ;;  %3145 = vmatmul.mubr.f32.gmra.mrb[40].mxu0 %v2777_v17  ;;  %v2976_v39 = vld [vmem:[%s7265_s3 + $0x498] sm:$0xff]  ;;  %v3011_v30 = vld [vmem:[%s7265_s3 + $0x5b0] sm:$0xff] }
 0x30c   : > { %v3012_v17 = vld [vmem:[%s7265_s3 + $0x5b8] sm:$0xff] }
 0x30e   : > { %v2680_v42 = vpop.permute.xlu1 %2679  ;;  %v2551_v43 = vpop.permute.xlu0 %2550  ;;  %v2758_v24 = vld [vmem:[#allocation4 + $0x108] sm:$0xff]  ;;  %v2756_v25 = vld [vmem:[#allocation4 + $0xf8] sm:$0xff] }
 0x30f   : > { %2702 = vst.msk [vmem:[#allocation4 + $0xc0] sm:$0xff] %vm1994_vm6, %v2680_v42  ;;  %2573 = vst.msk [vmem:[#allocation4 + $0xb0] sm:$0xff] %vm1994_vm6, %v2551_v43  ;;  %v4862_v42 = vpack.c.bf16 %v2958_v8, %v2957_v22  ;;  %v2959_v43 = vld [vmem:[%s7265_s3 + $0x410] sm:$0xff]  ;;  %v4912_v22 = vpack.c.bf16 %v3016_v19, %v3015_v14  ;;  %v2982_v8 = vld [vmem:[%s7265_s3 + $0x4c8] sm:$0xff] }
 0x312   : > { %v2616_v56 = vpop.permute.xlu1 %2615  ;;  %v2046_v52 = vpop.permute.xlu0 %2045 }
 0x313   : > { %2638 = vst.msk [vmem:[#allocation4 + $0xb8] sm:$0xff] %vm1994_vm6, %v2616_v56  ;;  %2064 = vst.msk [vmem:[#allocation4 + $0x210] sm:$0xff] %vm1994_vm6, %v2046_v52  ;;  %v2960_v56 = vld [vmem:[%s7265_s3 + $0x418] sm:$0xff]  ;;  %v2995_v52 = vld [vmem:[%s7265_s3 + $0x530] sm:$0xff] }
 0x316   : > { %v2110_v63 = vpop.permute.xlu1 %2109  ;;  %v1981_v1 = vpop.permute.xlu0 %1980 }
 0x317   : > { %2128 = vst.msk [vmem:[#allocation4 + $0x218] sm:$0xff] %vm1994_vm6, %v2110_v63  ;;  %2000 = vst.msk [vmem:[#allocation4 + $0x208] sm:$0xff] %vm1994_vm6, %v1981_v1  ;;  %v2729_v1 = vld [vmem:[#allocation4 + $0x20] sm:$0xff] }
 0x31a   : > { %v2178_v10 = vpop.permute.xlu1 %2177  ;;  %v2298_v55 = vpop.permute.xlu0 %2297  ;;  %v2791_v7 = vld [vmem:[#allocation4 + $0x210] sm:$0xff] }
 0x31b   : > { %2194 = vst.msk [vmem:[#allocation4 + $0x2f0] sm:$0xff] %vm1994_vm6, %v2178_v10  ;;  %2318 = vst.msk [vmem:[#allocation4 + $0x160] sm:$0xff] %vm1994_vm6, %v2298_v55  ;;  %3149 = vmatprep.mubr.f32.mxu0 %v2791_v7  ;;  %v4902_v10 = vpack.c.bf16 %v2994_v9, %v2993_v28  ;;  %v4864_v55 = vpack.c.bf16 %v2976_v39, %v2975_v0  ;;  %v2996_v7 = vld [vmem:[%s7265_s3 + $0x538] sm:$0xff]  ;;  %v2965_v9 = vld [vmem:[%s7265_s3 + $0x440] sm:$0xff] }
 0x31c   : > { %v2966_v0 = vld [vmem:[%s7265_s3 + $0x448] sm:$0xff] }
 0x31e   : > { %v2427_v47 = vpop.permute.xlu1 %2426  ;;  %v2792_v61 = vld [vmem:[#allocation4 + $0x218] sm:$0xff]  ;;  %v2236_v40 = vpop.permute.xlu0 %2235  ;;  %v2790_v29 = vld [vmem:[#allocation4 + $0x208] sm:$0xff] }
 0x31f   : > { %2447 = vst.msk [vmem:[#allocation4 + $0x170] sm:$0xff] %vm1994_vm6, %v2427_v47  ;;  %3255 = vmatmul.mubr.f32.gmra.mrb[34].mxu1 %v2792_v61  ;;  %2255 = vst.msk [vmem:[#allocation4 + $0x1c0] sm:$0xff] %vm1994_vm6, %v2236_v40  ;;  %3150 = vmatmul.mubr.f32.gmra.mrb[42].mxu0 %v2790_v29  ;;  %v2977_v47 = vld [vmem:[%s7265_s3 + $0x4a0] sm:$0xff]  ;;  %v2743_v40 = vld [vmem:[#allocation4 + $0x90] sm:$0xff]  ;;  %v4904_v29 = vpack.c.bf16 %v3012_v17, %v3011_v30 }
 0x320   : > { %3259 = vmatprep.mubr.f32.mxu1 %v2806_v60  ;;  %v2757_v60 = vld [vmem:[#allocation4 + $0x100] sm:$0xff]  ;;  %v3002_v30 = vld [vmem:[%s7265_s3 + $0x568] sm:$0xff]  ;;  %v2983_v17 = vld [vmem:[%s7265_s3 + $0x4d0] sm:$0xff] }
 0x322   : > { %v2364_v49 = vpop.permute.xlu1 %2363  ;;  %v2048_v31 = vpop.permute.xlu0 %2047  ;;  %v2819_v35 = vld [vmem:[#allocation4 + $0x2f0] sm:$0xff] }
 0x323   : > { %2383 = vst.msk [vmem:[#allocation4 + $0x1d0] sm:$0xff] %vm1994_vm6, %v2364_v49  ;;  %2065 = vst.msk [vmem:[#allocation4 + $0x278] sm:$0xff] %vm1994_vm6, %v2048_v31  ;;  %v2978_v49 = vld [vmem:[%s7265_s3 + $0x4a8] sm:$0xff] }
 0x326   : > { %v2112_v12 = vpop.permute.xlu1 %2111  ;;  %v1983_v2 = vpop.permute.xlu0 %1982  ;;  %v2771_v31 = vld [vmem:[#allocation4 + $0x170] sm:$0xff] }
 0x327   : > { %2129 = vst.msk [vmem:[#allocation4 + $0x280] sm:$0xff] %vm1994_vm6, %v2112_v12  ;;  %2001 = vst.msk [vmem:[#allocation4 + $0x270] sm:$0xff] %vm1994_vm6, %v1983_v2  ;;  %v3013_v12 = vld [vmem:[%s7265_s3 + $0x5c0] sm:$0xff]  ;;  %v3014_v2 = vld [vmem:[%s7265_s3 + $0x5c8] sm:$0xff] }
 0x328   : > { %v4908_v11 = vpack.c.bf16 %v3014_v2, %v3013_v12  ;;  %v3004_v12 = vld [vmem:[%s7265_s3 + $0x578] sm:$0xff]  ;;  %v2985_v2 = vld [vmem:[%s7265_s3 + $0x4e0] sm:$0xff] }
 0x32a   : > { %v2429_v34 = vpop.permute.xlu1 %2428  ;;  %v2300_v32 = vpop.permute.xlu0 %2299  ;;  %v2804_v48 = vld [vmem:[#allocation4 + $0x278] sm:$0xff] }
 0x32b   : > { %2448 = vst.msk [vmem:[#allocation4 + $0x1d8] sm:$0xff] %vm1994_vm6, %v2429_v34  ;;  %2319 = vst.msk [vmem:[#allocation4 + $0x1c8] sm:$0xff] %vm1994_vm6, %v2300_v32  ;;  %3154 = vmatprep.mubr.f32.mxu0 %v2804_v48  ;;  %v4866_v34 = vpack.c.bf16 %v2960_v56, %v2959_v43  ;;  %v2961_v32 = vld [vmem:[%s7265_s3 + $0x420] sm:$0xff]  ;;  %v2962_v48 = vld [vmem:[%s7265_s3 + $0x428] sm:$0xff] }
 0x32e   : > { %v2366_v54 = vpop.permute.xlu1 %2365  ;;  %v2805_v37 = vld [vmem:[#allocation4 + $0x280] sm:$0xff]  ;;  %v2238_v6 = vpop.permute.xlu0 %2237  ;;  %v2803_v50 = vld [vmem:[#allocation4 + $0x270] sm:$0xff] }
 0x32f   : > { %2384 = vst.msk [vmem:[#allocation4 + $0x238] sm:$0xff] %vm1994_vm6, %v2366_v54  ;;  %3260 = vmatmul.mubr.f32.gmra.mrb[36].mxu1 %v2805_v37  ;;  %2256 = vst.msk [vmem:[#allocation4 + $0x228] sm:$0xff] %vm1994_vm6, %v2238_v6  ;;  %3155 = vmatmul.mubr.f32.gmra.mrb[44].mxu0 %v2803_v50  ;;  %v2997_v54 = vld [vmem:[%s7265_s3 + $0x540] sm:$0xff]  ;;  %v4906_v6 = vpack.c.bf16 %v2996_v7, %v2995_v52  ;;  %v4868_v50 = vpack.c.bf16 %v2978_v49, %v2977_v47  ;;  %v2967_v47 = vld [vmem:[%s7265_s3 + $0x450] sm:$0xff] }
 0x330   : > { %3264 = vmatprep.mubr.f32.mxu1 %v2819_v35  ;;  %v2742_v35 = vld [vmem:[#allocation4 + $0x88] sm:$0xff]  ;;  %v4878_v7 = vpack.c.bf16 %v2966_v0, %v2965_v9 }
 0x331   : > { %v3026_v9 = vld [vmem:[%s7265_s3 + $0x628] sm:$0xff] }
 0x332   : > { %v2114_v44 = vpop.permute.xlu1 %2113  ;;  %v2050_v46 = vpop.permute.xlu0 %2049  ;;  %v2782_v56 = vld [vmem:[#allocation4 + $0x1c8] sm:$0xff] }
 0x333   : > { %2130 = vst.msk [vmem:[#allocation4 + $0x2e8] sm:$0xff] %vm1994_vm6, %v2114_v44  ;;  %2066 = vst.msk [vmem:[#allocation4 + $0x2e0] sm:$0xff] %vm1994_vm6, %v2050_v46  ;;  %v2998_v44 = vld [vmem:[%s7265_s3 + $0x548] sm:$0xff]  ;;  %v2979_v46 = vld [vmem:[%s7265_s3 + $0x4b0] sm:$0xff] }
 0x334   : > { %v4910_v57 = vpack.c.bf16 %v2998_v44, %v2997_v54 }
 0x336   : > { %v2431_v26 = vpop.permute.xlu1 %2430  ;;  %v1985_v16 = vpop.permute.xlu0 %1984  ;;  %v2796_v43 = vld [vmem:[#allocation4 + $0x238] sm:$0xff] }
 0x337   : > { %2449 = vst.msk [vmem:[#allocation4 + $0x240] sm:$0xff] %vm1994_vm6, %v2431_v26  ;;  %2002 = vst.msk [vmem:[#allocation4 + $0x2d8] sm:$0xff] %vm1994_vm6, %v1985_v16  ;;  %v2770_v16 = vld [vmem:[#allocation4 + $0x168] sm:$0xff] }
 0x33a   : > { %v2368_v13 = vpop.permute.xlu1 %2367  ;;  %v2818_v53 = vld [vmem:[#allocation4 + $0x2e8] sm:$0xff]  ;;  %v2302_v51 = vpop.permute.xlu0 %2301  ;;  %v2817_v45 = vld [vmem:[#allocation4 + $0x2e0] sm:$0xff] }
 0x33b   : > { %2385 = vst.msk [vmem:[#allocation4 + $0x2a0] sm:$0xff] %vm1994_vm6, %v2368_v13  ;;  %3265 = vmatmul.mubr.f32.gmra.mrb[38].mxu1 %v2818_v53  ;;  %2320 = vst.msk [vmem:[#allocation4 + $0x230] sm:$0xff] %vm1994_vm6, %v2302_v51  ;;  %3159 = vmatprep.mubr.f32.mxu0 %v2817_v45  ;;  %v2980_v13 = vld [vmem:[%s7265_s3 + $0x4b8] sm:$0xff]  ;;  %v2999_v45 = vld [vmem:[%s7265_s3 + $0x550] sm:$0xff] }
 0x33c   : > { %3439 = vmatprep.mubr.f32.mxu1 %v2732_v15  ;;  %v2784_v53 = vld [vmem:[#allocation4 + $0x1d8] sm:$0xff]  ;;  %v4870_v15 = vpack.c.bf16 %v2962_v48, %v2961_v32 }
 0x33d   : > { %v2964_v51 = vld [vmem:[%s7265_s3 + $0x438] sm:$0xff] }
 0x33e   : > { %v2433_v41 = vpop.permute.xlu1 %2432  ;;  %v2816_v4 = vld [vmem:[#allocation4 + $0x2d8] sm:$0xff]  ;;  %v2797_v28 = vld [vmem:[#allocation4 + $0x240] sm:$0xff] }
 0x33f   : > { %2450 = vst.msk [vmem:[#allocation4 + $0x2a8] sm:$0xff] %vm1994_vm6, %v2433_v41  ;;  %3440 = vmatmul.mubr.f32.vlgmr.msra.gmra.mrb[40].mxu1 %v2731_v21  ;;  %v2240_v18 = vpop.permute.xlu0 %2239  ;;  %3160 = vmatmul.mubr.f32.gmra.mrb[46].mxu0 %v2816_v4  ;;  %v4872_v41 = vpack.c.bf16 %v2980_v13, %v2979_v46  ;;  %v3000_v21 = vld [vmem:[%s7265_s3 + $0x558] sm:$0xff]  ;;  %v3018_v4 = vld [vmem:[%s7265_s3 + $0x5e8] sm:$0xff]  ;;  %v2969_v46 = vld [vmem:[%s7265_s3 + $0x460] sm:$0xff] }
 0x340   : > { %3444 = vmatprep.mubr.f32.mxu1 %v2745_v58  ;;  %4895 = vmatpush3.bf16.msra.mxu1 %v4894_v62  ;;  %2257 = vst.msk [vmem:[#allocation4 + $0x290] sm:$0xff] %vm1994_vm6, %v2240_v18  ;;  %v2963_v62 = vld [vmem:[%s7265_s3 + $0x430] sm:$0xff]  ;;  %v3017_v18 = vld [vmem:[%s7265_s3 + $0x5e0] sm:$0xff]  ;;  %v4914_v39 = vpack.c.bf16 %v3000_v21, %v2999_v45  ;;  %v2970_v13 = vld [vmem:[%s7265_s3 + $0x468] sm:$0xff] }
 0x341   : > { %4897 = vmatprep.subr.bf16.mxu1 %v4896_v36  ;;  %3334 = vmatprep.mubr.f32.mxu0 %v2730_v27  ;;  %v2783_v58 = vld [vmem:[#allocation4 + $0x1d0] sm:$0xff]  ;;  %v2768_v27 = vld [vmem:[#allocation4 + $0x158] sm:$0xff]  ;;  %v4916_v52 = vpack.c.bf16 %v3018_v4, %v3017_v18  ;;  %v2749_v18 = vld [vmem:[#allocation4 + $0xc0] sm:$0xff] }
 0x342   : > { %v2435_v38 = vpop.permute.xlu1 %2434  ;;  %v2809_v32 = vld [vmem:[#allocation4 + $0x2a0] sm:$0xff]  ;;  %v2795_v48 = vld [vmem:[#allocation4 + $0x230] sm:$0xff]  ;;  %v2736_v45 = vld [vmem:[#allocation4 + $0x58] sm:$0xff] }
 0x343   : > { %2451 = vst.msk [vmem:[#allocation4 + $0x310] sm:$0xff] %vm1994_vm6, %v2435_v38  ;;  %3445 = vmatmul.mubr.f32.gmra.mrb[42].mxu1 %v2744_v23  ;;  %v2304_v63 = vpop.permute.xlu0 %2303  ;;  %3335 = vmatmul.mubr.f32.vlgmr.msra.gmra.mrb[48].mxu0 %v2729_v1  ;;  %v3001_v38 = vld [vmem:[%s7265_s3 + $0x560] sm:$0xff] }
 0x344   : > { %3449 = vmatprep.mubr.f32.mxu1 %v2758_v24  ;;  %4899 = vmatpush3.bf16.msra.mxu1 %v4898_v20  ;;  %2321 = vst.msk [vmem:[#allocation4 + $0x298] sm:$0xff] %vm1994_vm6, %v2304_v63  ;;  %v2769_v20 = vld [vmem:[#allocation4 + $0x160] sm:$0xff]  ;;  %v4876_v24 = vpack.c.bf16 %v2982_v8, %v2981_v33  ;;  %v2984_v63 = vld [vmem:[%s7265_s3 + $0x4d8] sm:$0xff]  ;;  %v4918_v49 = vpack.c.bf16 %v3002_v30, %v3001_v38  ;;  %v2735_v8 = vld [vmem:[#allocation4 + $0x50] sm:$0xff] }
 0x345   : > { %4901 = vmatprep.subr.bf16.mxu1 %v4900_v5  ;;  %3339 = vmatprep.mubr.f32.mxu0 %v2743_v40  ;;  %v4874_v5 = vpack.c.bf16 %v2964_v51, %v2963_v62  ;;  %v2988_v62 = vld [vmem:[%s7265_s3 + $0x4f8] sm:$0xff] }
 0x346   : > { %v2370_v61 = vpop.permute.xlu1 %2369  ;;  %4863 = vmatpush3.bf16.msra.mxu0 %v4862_v42  ;;  %v2810_v1 = vld [vmem:[#allocation4 + $0x2a8] sm:$0xff] }
 0x347   : > { %2386 = vst.msk [vmem:[#allocation4 + $0x308] sm:$0xff] %vm1994_vm6, %v2370_v61  ;;  %3450 = vmatmul.mubr.f32.gmra.mrb[44].mxu1 %v2757_v60  ;;  %v2242_v37 = vpop.permute.xlu0 %2241  ;;  %4865 = vmatprep.subr.bf16.mxu0 %v4864_v55  ;;  %v3020_v55 = vld [vmem:[%s7265_s3 + $0x5f8] sm:$0xff]  ;;  %v3003_v60 = vld [vmem:[%s7265_s3 + $0x570] sm:$0xff] }
 0x348   : > { %3454 = vmatprep.mubr.f32.mxu1 %v2771_v31  ;;  %4903 = vmatpush3.bf16.msra.mxu1 %v4902_v10  ;;  %2258 = vst.msk [vmem:[#allocation4 + $0x2f8] sm:$0xff] %vm1994_vm6, %v2242_v37  ;;  %v3019_v10 = vld [vmem:[%s7265_s3 + $0x5f0] sm:$0xff]  ;;  %v2968_v61 = vld [vmem:[%s7265_s3 + $0x458] sm:$0xff]  ;;  %v4880_v31 = vpack.c.bf16 %v2984_v63, %v2983_v17  ;;  %v2986_v37 = vld [vmem:[%s7265_s3 + $0x4e8] sm:$0xff] }
 0x349   : > { %3340 = vmatmul.mubr.f32.gmra.mrb[50].mxu0 %v2742_v35  ;;  %4905 = vmatprep.subr.bf16.mxu1 %v4904_v29  ;;  %v2781_v29 = vld [vmem:[#allocation4 + $0x1c0] sm:$0xff]  ;;  %v4920_v54 = vpack.c.bf16 %v3020_v55, %v3019_v10  ;;  %v4882_v44 = vpack.c.bf16 %v2968_v61, %v2967_v47  ;;  %v2807_v21 = vld [vmem:[#allocation4 + $0x290] sm:$0xff]  ;;  %v2746_v61 = vld [vmem:[#allocation4 + $0xa8] sm:$0xff] }
 0x34a   : > { %v2682_v26 = vpop.permute.xlu1 %2681  ;;  %3344 = vmatprep.mubr.f32.mxu0 %v2756_v25  ;;  %4867 = vmatpush3.bf16.msra.mxu0 %v4866_v34  ;;  %v2823_v35 = vld [vmem:[#allocation4 + $0x310] sm:$0xff]  ;;  %v4922_v25 = vpack.c.bf16 %v3004_v12, %v3003_v60 }
 0x34b   : > { %2703 = vst.msk [vmem:[#allocation4 + $0x128] sm:$0xff] %vm1994_vm6, %v2682_v26  ;;  %3455 = vmatmul.mubr.f32.gmra.mrb[46].mxu1 %v2770_v16  ;;  %v2306_v36 = vpop.permute.xlu0 %2305  ;;  %4869 = vmatprep.subr.bf16.mxu0 %v4868_v50  ;;  %v3022_v50 = vld [vmem:[%s7265_s3 + $0x608] sm:$0xff]  ;;  %v3027_v17 = vld [vmem:[%s7265_s3 + $0x630] sm:$0xff] }
 0x34c   : > { %3459 = vmatprep.mubr.f32.mxu1 %v2784_v53  ;;  %4907 = vmatpush3.bf16.msra.mxu1 %v4906_v6  ;;  %2322 = vst.msk [vmem:[#allocation4 + $0x300] sm:$0xff] %vm1994_vm6, %v2306_v36  ;;  %v3021_v6 = vld [vmem:[%s7265_s3 + $0x600] sm:$0xff]  ;;  %v2794_v16 = vld [vmem:[#allocation4 + $0x228] sm:$0xff]  ;;  %v2987_v53 = vld [vmem:[%s7265_s3 + $0x4f0] sm:$0xff]  ;;  %v4886_v36 = vpack.c.bf16 %v2970_v13, %v2969_v46 }
 0x34d   : > { %3345 = vmatmul.mubr.f32.gmra.mrb[52].mxu0 %v2755_v3  ;;  %4909 = vmatprep.subr.bf16.mxu1 %v4908_v11  ;;  %v4884_v11 = vpack.c.bf16 %v2986_v37, %v2985_v2  ;;  %v7145_v51 = vpack.c.bf16 %v3022_v50, %v3021_v6  ;;  %v3023_v3 = vld [vmem:[%s7265_s3 + $0x610] sm:$0xff]  ;;  %v4888_v33 = vpack.c.bf16 %v2988_v62, %v2987_v53 }
 0x34e   : > { %v2618_v59 = vpop.permute.xlu1 %2617  ;;  %3349 = vmatprep.mubr.f32.mxu0 %v2769_v20  ;;  %4871 = vmatpush3.bf16.msra.mxu0 %v4870_v15  ;;  %v2822_v19 = vld [vmem:[#allocation4 + $0x308] sm:$0xff]  ;;  %v2808_v15 = vld [vmem:[#allocation4 + $0x298] sm:$0xff] }
 0x34f   : > { %2639 = vst.msk [vmem:[#allocation4 + $0x120] sm:$0xff] %vm1994_vm6, %v2618_v59  ;;  %3460 = vmatmul.mubr.f32.gmra.mrb[48].mxu1 %v2783_v58  ;;  %v2553_v23 = vpop.permute.xlu0 %2552  ;;  %4873 = vmatprep.subr.bf16.mxu0 %v4872_v41  ;;  %v2971_v59 = vld [vmem:[%s7265_s3 + $0x470] sm:$0xff]  ;;  %v2972_v58 = vld [vmem:[%s7265_s3 + $0x478] sm:$0xff] }
 0x350   : > { %3464 = vmatprep.mubr.f32.mxu1 %v2797_v28  ;;  %4911 = vmatpush3.bf16.msra.mxu1 %v4910_v57  ;;  %2574 = vst.msk [vmem:[#allocation4 + $0x118] sm:$0xff] %vm1994_vm6, %v2553_v23  ;;  %v3024_v57 = vld [vmem:[%s7265_s3 + $0x618] sm:$0xff]  ;;  %v4890_v4 = vpack.c.bf16 %v2972_v58, %v2971_v59  ;;  %v2763_v59 = vld [vmem:[#allocation4 + $0x130] sm:$0xff] }
 0x351   : > { %3350 = vmatmul.mubr.f32.gmra.mrb[54].mxu0 %v2768_v27  ;;  %4913 = vmatprep.subr.bf16.mxu1 %v4912_v22  ;;  %v4928_v28 = vpack.c.bf16 %v3024_v57, %v3023_v3  ;;  %v2820_v38 = vld [vmem:[#allocation4 + $0x2f8] sm:$0xff]  ;;  %v2734_v27 = vld [vmem:[#allocation4 + $0x48] sm:$0xff]  ;;  %v2815_v3 = vld [vmem:[#allocation4 + $0x2d0] sm:$0xff] }
 0x352   : > { %v2684_v42 = vpop.permute.xlu1 %2683  ;;  %3354 = vmatprep.mubr.f32.mxu0 %v2782_v56  ;;  %4875 = vmatpush3.bf16.msra.mxu0 %v4874_v5  ;;  %v3025_v5 = vld [vmem:[%s7265_s3 + $0x620] sm:$0xff]  ;;  %v2762_v30 = vld [vmem:[#allocation4 + $0x128] sm:$0xff]  ;;  %v2776_v58 = vld [vmem:[#allocation4 + $0x198] sm:$0xff] }
 0x353   : > { %2704 = vst.msk [vmem:[#allocation4 + $0x190] sm:$0xff] %vm1994_vm6, %v2684_v42  ;;  %3465 = vmatmul.mubr.f32.gmra.mrb[50].mxu1 %v2796_v43  ;;  %v2489_v40 = vpop.permute.xlu0 %2488  ;;  %4877 = vmatprep.subr.bf16.mxu0 %v4876_v24  ;;  %v2821_v22 = vld [vmem:[#allocation4 + $0x300] sm:$0xff]  ;;  %v4932_v24 = vpack.c.bf16 %v3026_v9, %v3025_v5  ;;  %v3028_v42 = vld [vmem:[%s7265_s3 + $0x638] sm:$0xff] }
 0x354   : > { %3469 = vmatprep.mubr.f32.mxu1 %v2810_v1  ;;  %4915 = vmatpush3.bf16.msra.mxu1 %v4914_v39  ;;  %2510 = vst.msk [vmem:[#allocation4 + $0x110] sm:$0xff] %vm1994_vm6, %v2489_v40  ;;  %v2748_v39 = vld [vmem:[#allocation4 + $0xb8] sm:$0xff]  ;;  %v2747_v1 = vld [vmem:[#allocation4 + $0xb0] sm:$0xff]  ;;  %v4936_v10 = vpack.c.bf16 %v3028_v42, %v3027_v17 }
 0x355   : > { %3355 = vmatmul.mubr.f32.gmra.mrb[56].mxu0 %v2781_v29  ;;  %4917 = vmatprep.subr.bf16.mxu1 %v4916_v52  ;;  %v2733_v52 = vld [vmem:[#allocation4 + $0x40] sm:$0xff] }
 0x356   : > { %v2620_v34 = vpop.permute.xlu1 %2619  ;;  %3359 = vmatprep.mubr.f32.mxu0 %v2795_v48  ;;  %4879 = vmatpush3.bf16.msra.mxu0 %v4878_v7  ;;  %v2761_v63 = vld [vmem:[#allocation4 + $0x120] sm:$0xff] }
 0x357   : > { %2640 = vst.msk [vmem:[#allocation4 + $0x188] sm:$0xff] %vm1994_vm6, %v2620_v34  ;;  %3470 = vmatmul.mubr.f32.gmra.mrb[52].mxu1 %v2809_v32  ;;  %v2555_v26 = vpop.permute.xlu0 %2554  ;;  %4881 = vmatprep.subr.bf16.mxu0 %v4880_v31  ;;  %v2760_v40 = vld [vmem:[#allocation4 + $0x118] sm:$0xff] }
 0x358   : > { %3474 = vmatprep.mubr.f32.mxu1 %v2823_v35  ;;  %4919 = vmatpush3.bf16.msra.mxu1 %v4918_v49  ;;  %2575 = vst.msk [vmem:[#allocation4 + $0x180] sm:$0xff] %vm1994_vm6, %v2555_v26 }
 0x359   : > { %3360 = vmatmul.mubr.f32.gmra.mrb[58].mxu0 %v2794_v16  ;;  %4921 = vmatprep.subr.bf16.mxu1 %v4920_v54 }
 0x35a   : > { %v2686_v14 = vpop.permute.xlu1 %2685  ;;  %3364 = vmatprep.mubr.f32.mxu0 %v2808_v15  ;;  %4883 = vmatpush3.bf16.msra.mxu0 %v4882_v44  ;;  %v2775_v55 = vld [vmem:[#allocation4 + $0x190] sm:$0xff] }
 0x35b   : > { %2705 = vst.msk [vmem:[#allocation4 + $0x1f8] sm:$0xff] %vm1994_vm6, %v2686_v14  ;;  %3475 = vmatmul.mubr.f32.gmra.mrb[54].mxu1 %v2822_v19  ;;  %v2491_v41 = vpop.permute.xlu0 %2490  ;;  %4885 = vmatprep.subr.bf16.mxu0 %v4884_v11  ;;  %v2759_v12 = vld [vmem:[#allocation4 + $0x110] sm:$0xff] }
 0x35c   : > { %3649 = vmatprep.mubr.f32.mxu1 %v2736_v45  ;;  %4923 = vmatpush3.bf16.msra.mxu1 %v4922_v25  ;;  %2511 = vst.msk [vmem:[#allocation4 + $0x178] sm:$0xff] %vm1994_vm6, %v2491_v41  ;;  %v2828_v41 = vld [vmem:[#allocation4 + $0x338] sm:$0xff] }
 0x35d   : > { %3365 = vmatmul.mubr.f32.gmra.mrb[60].mxu0 %v2807_v21  ;;  %4940 = vmatprep.subr.bf16.mxu1 %v7145_v51  ;;  %v2737_v21 = vld [vmem:[#allocation4 + $0x60] sm:$0xff] }
 0x35e   : > { %v2622_v20 = vpop.permute.xlu1 %2621  ;;  %3369 = vmatprep.mubr.f32.mxu0 %v2821_v22  ;;  %4887 = vmatpush3.bf16.msra.mxu0 %v4886_v36  ;;  %v2774_v60 = vld [vmem:[#allocation4 + $0x188] sm:$0xff] }
 0x35f   : > { %2641 = vst.msk [vmem:[#allocation4 + $0x1f0] sm:$0xff] %vm1994_vm6, %v2622_v20  ;;  %3650 = vmatmul.mubr.f32.vlgmr.msra.gmra.mrb[56].mxu1 %v2735_v8  ;;  %v2557_v0 = vpop.permute.xlu0 %2556  ;;  %4889 = vmatprep.subr.bf16.mxu0 %v4888_v33  ;;  %v2773_v34 = vld [vmem:[#allocation4 + $0x180] sm:$0xff]  ;;  %v2802_v36 = vld [vmem:[#allocation4 + $0x268] sm:$0xff] }
 0x360   : > { %3654 = vmatprep.mubr.f32.mxu1 %v2749_v18  ;;  %2576 = vst.msk [vmem:[#allocation4 + $0x1e8] sm:$0xff] %vm1994_vm6, %v2557_v0  ;;  %4944 = vmatpush3.bf16.msra.mxu1 %v7145_v51  ;;  %v2750_v33 = vld [vmem:[#allocation4 + $0xc8] sm:$0xff] }
 0x361   : > { %3370 = vmatmul.mubr.f32.gmra.mrb[62].mxu0 %v2820_v38  ;;  %4941 = vmatprep.subr.bf16.mxu1 %v4928_v28 }
 0x362   : > { %v2688_v23 = vpop.permute.xlu1 %2687  ;;  %3544 = vmatprep.mubr.f32.mxu0 %v2734_v27  ;;  %4891 = vmatpush3.bf16.msra.mxu0 %v4890_v4  ;;  %v2788_v29 = vld [vmem:[#allocation4 + $0x1f8] sm:$0xff]  ;;  %v7203_v4 = vld [vmem:[%s7266_s4] ss:$0 sm:$0xff] }
 0x363   : > { %2706 = vst.msk [vmem:[#allocation4 + $0x260] sm:$0xff] %vm1994_vm6, %v2688_v23  ;;  %3655 = vmatmul.mubr.f32.gmra.mrb[58].mxu1 %v2748_v39  ;;  %v2493_v43 = vpop.permute.xlu0 %2492  ;;  %4925 = vmatprep.subr.bf16.mxu0 %v7145_v51  ;;  %v2772_v37 = vld [vmem:[#allocation4 + $0x178] sm:$0xff] }
 0x364   : > { %3659 = vmatprep.mubr.f32.mxu1 %v2762_v30  ;;  %2512 = vst.msk [vmem:[#allocation4 + $0x1e0] sm:$0xff] %vm1994_vm6, %v2493_v43  ;;  %4945 = vmatpush3.bf16.msra.mxu1 %v4928_v28 }
 0x365   : > { %3545 = vmatmul.mubr.f32.vlgmr.msra.gmra.mrb[64].mxu0 %v2733_v52  ;;  %4942 = vmatprep.subr.bf16.mxu1 %v4932_v24 }
 0x366   : > { %v2624_v56 = vpop.permute.xlu1 %2623  ;;  %3549 = vmatprep.mubr.f32.mxu0 %v2747_v1  ;;  %4927 = vmatpush3.bf16.msra.mxu0 %v7145_v51  ;;  %v2787_v2 = vld [vmem:[#allocation4 + $0x1f0] sm:$0xff]  ;;  %v2789_v51 = vld [vmem:[#allocation4 + $0x200] sm:$0xff] }
 0x367   : > { %2642 = vst.msk [vmem:[#allocation4 + $0x258] sm:$0xff] %vm1994_vm6, %v2624_v56  ;;  %3660 = vmatmul.mubr.f32.gmra.mrb[60].mxu1 %v2761_v63  ;;  %v2559_v7 = vpop.permute.xlu0 %2558  ;;  %4929 = vmatprep.subr.bf16.mxu0 %v4928_v28  ;;  %v2786_v50 = vld [vmem:[#allocation4 + $0x1e8] sm:$0xff] }
 0x368   : > { %3664 = vmatprep.mubr.f32.mxu1 %v2775_v55  ;;  %2577 = vst.msk [vmem:[#allocation4 + $0x250] sm:$0xff] %vm1994_vm6, %v2559_v7  ;;  %4946 = vmatpush3.bf16.msra.mxu1 %v4932_v24 }
 0x369   : > { %3550 = vmatmul.mubr.f32.gmra.mrb[66].mxu0 %v2746_v61  ;;  %4943 = vmatprep.subr.bf16.mxu1 %v4936_v10 }
 0x36a   : > { %v2690_v47 = vpop.permute.xlu1 %2689  ;;  %3554 = vmatprep.mubr.f32.mxu0 %v2760_v40  ;;  %4931 = vmatpush3.bf16.msra.mxu0 %v4928_v28  ;;  %v2801_v32 = vld [vmem:[#allocation4 + $0x260] sm:$0xff] }
 0x36b   : > { %2707 = vst.msk [vmem:[#allocation4 + $0x2c8] sm:$0xff] %vm1994_vm6, %v2690_v47  ;;  %3665 = vmatmul.mubr.f32.gmra.mrb[62].mxu1 %v2774_v60  ;;  %v2495_v49 = vpop.permute.xlu0 %2494  ;;  %4933 = vmatprep.subr.bf16.mxu0 %v4932_v24  ;;  %v2785_v26 = vld [vmem:[#allocation4 + $0x1e0] sm:$0xff] }
 0x36c   : > { %3669 = vmatprep.mubr.f32.mxu1 %v2788_v29  ;;  %2513 = vst.msk [vmem:[#allocation4 + $0x248] sm:$0xff] %vm1994_vm6, %v2495_v49  ;;  %4947 = vmatpush3.bf16.msra.mxu1 %v4936_v10 }
 0x36d   : > { %3555 = vmatmul.mubr.f32.gmra.mrb[68].mxu0 %v2759_v12 }
 0x36e   : > { %v2626_v31 = vpop.permute.xlu1 %2625  ;;  %3559 = vmatprep.mubr.f32.mxu0 %v2773_v34  ;;  %4935 = vmatpush3.bf16.msra.mxu0 %v4932_v24  ;;  %v2800_v6 = vld [vmem:[#allocation4 + $0x258] sm:$0xff] }
 0x36f   : > { %2643 = vst.msk [vmem:[#allocation4 + $0x2c0] sm:$0xff] %vm1994_vm6, %v2626_v31  ;;  %3670 = vmatmul.mubr.f32.gmra.mrb[64].mxu1 %v2787_v2  ;;  %v2561_v48 = vpop.permute.xlu0 %2560  ;;  %4937 = vmatprep.subr.bf16.mxu0 %v4936_v10  ;;  %v2799_v25 = vld [vmem:[#allocation4 + $0x250] sm:$0xff] }
 0x370   : > { %3674 = vmatprep.mubr.f32.mxu1 %v2801_v32  ;;  %2578 = vst.msk [vmem:[#allocation4 + $0x2b8] sm:$0xff] %vm1994_vm6, %v2561_v48 }
 0x371   : > { %3560 = vmatmul.mubr.f32.gmra.mrb[70].mxu0 %v2772_v37 }
 0x372   : > { %v2692_v54 = vpop.permute.xlu1 %2691  ;;  %v2814_v35 = vld [vmem:[#allocation4 + $0x2c8] sm:$0xff]  ;;  %3564 = vmatprep.mubr.f32.mxu0 %v2786_v50  ;;  %4939 = vmatpush3.bf16.msra.mxu0 %v4936_v10 }
 0x373   : > { %2708 = vst.msk [vmem:[#allocation4 + $0x330] sm:$0xff] %vm1994_vm6, %v2692_v54  ;;  %3675 = vmatmul.mubr.f32.gmra.mrb[66].mxu1 %v2800_v6  ;;  %v2497_v44 = vpop.permute.xlu0 %2496  ;;  %v2798_v53 = vld [vmem:[#allocation4 + $0x248] sm:$0xff] }
 0x374   : > { %3679 = vmatprep.mubr.f32.mxu1 %v2814_v35  ;;  %2514 = vst.msk [vmem:[#allocation4 + $0x2b0] sm:$0xff] %vm1994_vm6, %v2497_v44 }
 0x375   : > { %3565 = vmatmul.mubr.f32.gmra.mrb[72].mxu0 %v2785_v26 }
 0x376   : > { %v2628_v46 = vpop.permute.xlu1 %2627  ;;  %v2813_v16 = vld [vmem:[#allocation4 + $0x2c0] sm:$0xff]  ;;  %3569 = vmatprep.mubr.f32.mxu0 %v2799_v25 }
 0x377   : > { %2644 = vst.msk [vmem:[#allocation4 + $0x328] sm:$0xff] %vm1994_vm6, %v2628_v46  ;;  %3680 = vmatmul.mubr.f32.gmra.mrb[68].mxu1 %v2813_v16  ;;  %v2563_v11 = vpop.permute.xlu0 %2562  ;;  %v2812_v13 = vld [vmem:[#allocation4 + $0x2b8] sm:$0xff] }
 0x378   : > { %2579 = vst.msk [vmem:[#allocation4 + $0x320] sm:$0xff] %vm1994_vm6, %v2563_v11 }
 0x379   : > { %3570 = vmatmul.mubr.f32.gmra.mrb[74].mxu0 %v2798_v53 }
 0x37a   : > { %v2827_v14 = vld [vmem:[#allocation4 + $0x330] sm:$0xff]  ;;  %3574 = vmatprep.mubr.f32.mxu0 %v2812_v13 }
 0x37b   : > { %3684 = vmatprep.mubr.f32.mxu1 %v2827_v14  ;;  %v2499_v19 = vpop.permute.xlu0 %2498  ;;  %v2811_v15 = vld [vmem:[#allocation4 + $0x2b0] sm:$0xff] }
 0x37c   : > { %2515 = vst.msk [vmem:[#allocation4 + $0x318] sm:$0xff] %vm1994_vm6, %v2499_v19 }
 0x37d   : > { %3575 = vmatmul.mubr.f32.gmra.mrb[76].mxu0 %v2811_v15 }
 0x37e   : > { %v2826_v62 = vld [vmem:[#allocation4 + $0x328] sm:$0xff] }
 0x37f   : > { %3685 = vmatmul.mubr.f32.gmra.mrb[70].mxu1 %v2826_v62  ;;  %v2825_v45 = vld [vmem:[#allocation4 + $0x320] sm:$0xff] }
 0x380   : > { %4622 = vmatprep.mubr.msk.f32.mxu1 %vm1825_vm4, %v2789_v51  ;;  %3579 = vmatprep.mubr.f32.mxu0 %v2825_v45 }
 0x383   : > { %4623 = vmatmul.mubr.msk.f32.vlgmr.msra.gmra.mrb[72].mxu1 %vm1825_vm4, %v2802_v36  ;;  %v2824_v57 = vld [vmem:[#allocation4 + $0x318] sm:$0xff] }
 0x384   : > { %4625 = vmatprep.mubr.msk.f32.mxu1 %vm1825_vm4, %v2815_v3  ;;  %3580 = vmatmul.mubr.f32.gmra.mrb[78].mxu0 %v2824_v57 }
 0x385   : > { %4616 = vmatprep.mubr.msk.f32.mxu0 %vm1825_vm4, %v2737_v21 }
 0x387   : > { %4626 = vmatmul.mubr.msk.f32.gmra.mrb[74].mxu1 %vm1825_vm4, %v2828_v41 }
 0x388   : > { %4617 = vmatmul.mubr.msk.f32.vlgmr.msra.gmra.mrb[80].mxu0 %vm1825_vm4, %v2750_v33 }
 0x389   : > { %4619 = vmatprep.mubr.msk.f32.mxu0 %vm1825_vm4, %v2763_v59 }
 0x38c   : > { %4620 = vmatmul.mubr.msk.f32.gmra.mrb[82].mxu0 %vm1825_vm4, %v2776_v58 }
 0x39e   : > { %v4316_v20 = vpop.f32.mrb[24].mxu1 }
 0x39f   : > { %v4317_v22 = vpop.f32.mrb[25].mxu1 }
 0x3a0   : > { %v4318_v8 = vadd.f32 %v4317_v22, %v4316_v20 }
 0x3a2   : > { %v4260_v28 = vpop.f32.mrb[32].mxu0  ;;  %v4319_v18 = vpop.f32.mrb[26].mxu1 }
 0x3a3   : > { %v4261_v5 = vpop.f32.mrb[33].mxu0  ;;  %v4320_v9 = vpop.f32.mrb[27].mxu1 }
 0x3a4   : > { %v4262_v0 = vadd.f32 %v4261_v5, %v4260_v28  ;;  %v4321_v38 = vadd.f32 %v4320_v9, %v4319_v18 }
 0x3a6   : > { %v3127_v23 = vadd.f32 %v4262_v0, %v7203_v4 }
 0x3a8   : > { %v7206_v27 = vadd.f32 %v4318_v8, %v3127_v23 }
 0x3aa   : > { %v4263_v39 = vpop.f32.mrb[34].mxu0 }
 0x3ab   : > { %v4264_v24 = vpop.f32.mrb[35].mxu0 }
 0x3ac   : > { %v4265_v30 = vadd.f32 %v4264_v24, %v4263_v39 }
 0x3ae   : > { %v3132_v17 = vadd.f32 %v4265_v30, %v7203_v4 }
 0x3b0   : > { %v7209_v56 = vadd.f32 %v4321_v38, %v3132_v17 }
 0x3b1   : > { %v4322_v42 = vpop.f32.mrb[28].mxu1 }
 0x3b2   : > { %v4323_v43 = vpop.f32.mrb[29].mxu1 }
 0x3b3   : > { %v4324_v52 = vadd.f32 %v4323_v43, %v4322_v42  ;;  %v4266_v63 = vpop.f32.mrb[36].mxu0 }
 0x3b4   : > { %v4267_v1 = vpop.f32.mrb[37].mxu0 }
 0x3b5   : > { %v4268_v10 = vadd.f32 %v4267_v1, %v4266_v63 }
 0x3b7   : > { %v3137_v55 = vadd.f32 %v4268_v10, %v7203_v4 }
 0x3b9   : > { %v7212_v7 = vadd.f32 %v4324_v52, %v3137_v55 }
 0x3c1   : > { %v4325_v47 = vpop.f32.mrb[30].mxu1 }
 0x3c2   : > { %v4326_v61 = vpop.f32.mrb[31].mxu1 }
 0x3c3   : > { %v4327_v60 = vadd.f32 %v4326_v61, %v4325_v47 }
 0x3ca   : > { %v4269_v40 = vpop.f32.mrb[38].mxu0 }
 0x3cb   : > { %v4270_v29 = vpop.f32.mrb[39].mxu0 }
 0x3cc   : > { %v4271_v49 = vadd.f32 %v4270_v29, %v4269_v40 }
 0x3ce   : > { %v3142_v31 = vadd.f32 %v4271_v49, %v7203_v4 }
 0x3d0   : > { %v7215_v12 = vadd.f32 %v4327_v60, %v3142_v31 }
 0x3da   : > { %v4328_v2 = vpop.f32.mrb[32].mxu1 }
 0x3db   : > { %v4329_v34 = vpop.f32.mrb[33].mxu1 }
 0x3dc   : > { %v4330_v32 = vadd.f32 %v4329_v34, %v4328_v2 }
 0x3de   : > { %v4272_v48 = vpop.f32.mrb[40].mxu0 }
 0x3df   : > { %v4273_v54 = vpop.f32.mrb[41].mxu0 }
 0x3e0   : > { %v4274_v37 = vadd.f32 %v4273_v54, %v4272_v48 }
 0x3e2   : > { %v3147_v35 = vadd.f32 %v4274_v37, %v7203_v4 }
 0x3e4   : > { %v7218_v6 = vadd.f32 %v4330_v32, %v3147_v35 }
 0x3f2   : > { %v4331_v50 = vpop.f32.mrb[34].mxu1  ;;  %v4275_v26 = vpop.f32.mrb[42].mxu0 }
 0x3f3   : > { %v4332_v44 = vpop.f32.mrb[35].mxu1  ;;  %v4276_v16 = vpop.f32.mrb[43].mxu0 }
 0x3f4   : > { %v4333_v46 = vadd.f32 %v4332_v44, %v4331_v50  ;;  %v4277_v25 = vadd.f32 %v4276_v16, %v4275_v26 }
 0x3f6   : > { %v3152_v11 = vadd.f32 %v4277_v25, %v7203_v4 }
 0x3f8   : > { %v7221_v13 = vadd.f32 %v4333_v46, %v3152_v11 }
 0x402   : > { %v4334_v53 = vpop.f32.mrb[36].mxu1  ;;  %v4278_v15 = vpop.f32.mrb[44].mxu0 }
 0x403   : > { %v4335_v14 = vpop.f32.mrb[37].mxu1  ;;  %v4279_v62 = vpop.f32.mrb[45].mxu0 }
 0x404   : > { %v4336_v19 = vadd.f32 %v4335_v14, %v4334_v53  ;;  %v4280_v51 = vadd.f32 %v4279_v62, %v4278_v15 }
 0x406   : > { %v3157_v45 = vadd.f32 %v4280_v51, %v7203_v4 }
 0x408   : > { %v7224_v36 = vadd.f32 %v4336_v19, %v3157_v45 }
 0x40e   : > { %v4337_v3 = vpop.f32.mrb[38].mxu1 }
 0x40f   : > { %v4338_v57 = vpop.f32.mrb[39].mxu1 }
 0x410   : > { %v4339_v41 = vadd.f32 %v4338_v57, %v4337_v3 }
 0x412   : > { %v4428_v21 = vpop.f32.mrb[40].mxu1  ;;  %v4281_v58 = vpop.f32.mrb[46].mxu0 }
 0x413   : > { %v4429_v33 = vpop.f32.mrb[41].mxu1  ;;  %v4282_v22 = vpop.f32.mrb[47].mxu0 }
 0x414   : > { %v4430_v59 = vadd.f32 %v4429_v33, %v4428_v21  ;;  %v4283_v8 = vadd.f32 %v4282_v22, %v4281_v58 }
 0x416   : > { %v4431_v20 = vpop.f32.mrb[42].mxu1  ;;  %v3162_v5 = vadd.f32 %v4283_v8, %v7203_v4  ;;  %v4372_v9 = vpop.f32.mrb[48].mxu0 }
 0x417   : > { %v4432_v28 = vpop.f32.mrb[43].mxu1  ;;  %v4373_v38 = vpop.f32.mrb[49].mxu0 }
 0x418   : > { %v4433_v18 = vadd.f32 %v4432_v28, %v4431_v20  ;;  %v4374_v23 = vadd.f32 %v4373_v38, %v4372_v9  ;;  %v3267_v24 = vadd.f32 %v4339_v41, %v3162_v5 }
 0x41a   : > { %v4434_v0 = vpop.f32.mrb[44].mxu1  ;;  %v3337_v17 = vadd.f32 %v4374_v23, %v7206_v27 }
 0x41b   : > { %v4435_v39 = vpop.f32.mrb[45].mxu1 }
 0x41c   : > { %v4436_v30 = vadd.f32 %v4435_v39, %v4434_v0  ;;  %v4375_v42 = vpop.f32.mrb[50].mxu0  ;;  %v3442_v10 = vadd.f32 %v4430_v59, %v3337_v17 }
 0x41d   : > { %v4376_v52 = vpop.f32.mrb[51].mxu0 }
 0x41e   : > { %v4437_v43 = vpop.f32.mrb[46].mxu1  ;;  %v4377_v63 = vadd.f32 %v4376_v52, %v4375_v42 }
 0x41f   : > { %v4438_v1 = vpop.f32.mrb[47].mxu1 }
 0x420   : > { %v4439_v55 = vadd.f32 %v4438_v1, %v4437_v43  ;;  %v3342_v47 = vadd.f32 %v4377_v63, %v7209_v56  ;;  %v4378_v61 = vpop.f32.mrb[52].mxu0 }
 0x421   : > { %v4379_v60 = vpop.f32.mrb[53].mxu0 }
 0x422   : > { %v4440_v4 = vpop.f32.mrb[48].mxu1  ;;  %v4380_v40 = vadd.f32 %v4379_v60, %v4378_v61  ;;  %v3447_v49 = vadd.f32 %v4433_v18, %v3342_v47 }
 0x423   : > { %v4441_v29 = vpop.f32.mrb[49].mxu1 }
 0x424   : > { %v4442_v31 = vadd.f32 %v4441_v29, %v4440_v4  ;;  %v3347_v2 = vadd.f32 %v4380_v40, %v7212_v7  ;;  %v4381_v34 = vpop.f32.mrb[54].mxu0 }
 0x425   : > { %v4382_v32 = vpop.f32.mrb[55].mxu0 }
 0x426   : > { %v4443_v27 = vpop.f32.mrb[50].mxu1  ;;  %v4383_v48 = vadd.f32 %v4382_v32, %v4381_v34  ;;  %v3452_v37 = vadd.f32 %v4436_v30, %v3347_v2 }
 0x427   : > { %v4444_v54 = vpop.f32.mrb[51].mxu1 }
 0x428   : > { %v4445_v35 = vadd.f32 %v4444_v54, %v4443_v27  ;;  %v3352_v50 = vadd.f32 %v4383_v48, %v7215_v12  ;;  %v4384_v44 = vpop.f32.mrb[56].mxu0 }
 0x429   : > { %v4385_v46 = vpop.f32.mrb[57].mxu0 }
 0x42a   : > { %v4446_v56 = vpop.f32.mrb[52].mxu1  ;;  %v4386_v26 = vadd.f32 %v4385_v46, %v4384_v44  ;;  %v3457_v25 = vadd.f32 %v4439_v55, %v3352_v50 }
 0x42b   : > { %v4447_v16 = vpop.f32.mrb[53].mxu1 }
 0x42c   : > { %v4448_v11 = vadd.f32 %v4447_v16, %v4446_v56  ;;  %v3357_v53 = vadd.f32 %v4386_v26, %v7218_v6  ;;  %v4387_v14 = vpop.f32.mrb[58].mxu0 }
 0x42d   : > { %v4388_v19 = vpop.f32.mrb[59].mxu0 }
 0x42e   : > { %v4449_v7 = vpop.f32.mrb[54].mxu1  ;;  %v4389_v15 = vadd.f32 %v4388_v19, %v4387_v14  ;;  %v3462_v51 = vadd.f32 %v4442_v31, %v3357_v53 }
 0x42f   : > { %v4450_v62 = vpop.f32.mrb[55].mxu1 }
 0x430   : > { %v4451_v45 = vadd.f32 %v4450_v62, %v4449_v7  ;;  %v3362_v3 = vadd.f32 %v4389_v15, %v7221_v13  ;;  %v4390_v57 = vpop.f32.mrb[60].mxu0 }
 0x431   : > { %v4391_v12 = vpop.f32.mrb[61].mxu0 }
 0x432   : > { %v4540_v41 = vpop.f32.mrb[56].mxu1  ;;  %v4392_v21 = vadd.f32 %v4391_v12, %v4390_v57  ;;  %v3467_v33 = vadd.f32 %v4445_v35, %v3362_v3 }
 0x433   : > { %v4541_v59 = vpop.f32.mrb[57].mxu1 }
 0x434   : > { %v3367_v58 = vadd.f32 %v4392_v21, %v7224_v36  ;;  %v4542_v20 = vadd.f32 %v4541_v59, %v4540_v41  ;;  %v4393_v22 = vpop.f32.mrb[62].mxu0 }
 0x435   : > { %v4394_v6 = vpop.f32.mrb[63].mxu0 }
 0x436   : > { %v4543_v8 = vpop.f32.mrb[58].mxu1  ;;  %v4395_v28 = vadd.f32 %v4394_v6, %v4393_v22  ;;  %v3472_v18 = vadd.f32 %v4448_v11, %v3367_v58 }
 0x437   : > { %v4544_v5 = vpop.f32.mrb[59].mxu1 }
 0x438   : > { %v3372_v9 = vadd.f32 %v4395_v28, %v3267_v24  ;;  %v4545_v0 = vadd.f32 %v4544_v5, %v4543_v8  ;;  %v4484_v38 = vpop.f32.mrb[64].mxu0 }
 0x439   : > { %v4485_v13 = vpop.f32.mrb[65].mxu0 }
 0x43a   : > { %v4546_v23 = vpop.f32.mrb[60].mxu1  ;;  %v7234_v39 = vadd.f32 %v4451_v45, %v3372_v9  ;;  %v4486_v30 = vadd.f32 %v4485_v13, %v4484_v38 }
 0x43b   : > { %v4547_v17 = vpop.f32.mrb[61].mxu1 }
 0x43c   : > { %v4548_v42 = vadd.f32 %v4547_v17, %v4546_v23  ;;  %v3547_v43 = vadd.f32 %v4486_v30, %v3442_v10  ;;  %v4487_v52 = vpop.f32.mrb[66].mxu0 }
 0x43d   : > { %v4488_v63 = vpop.f32.mrb[67].mxu0 }
 0x43e   : > { %v4549_v36 = vpop.f32.mrb[62].mxu1  ;;  %v4489_v1 = vadd.f32 %v4488_v63, %v4487_v52  ;;  %v3652_v47 = vadd.f32 %v4542_v20, %v3547_v43 }
 0x43f   : > { %v4550_v55 = vpop.f32.mrb[63].mxu1 }
 0x440   : > { %v4551_v61 = vadd.f32 %v4550_v55, %v4549_v36  ;;  %v3552_v4 = vadd.f32 %v4489_v1, %v3447_v49  ;;  %v4490_v60 = vpop.f32.mrb[68].mxu0 }
 0x441   : > { %v4491_v40 = vpop.f32.mrb[69].mxu0 }
 0x442   : > { %v4552_v24 = vpop.f32.mrb[64].mxu1  ;;  %v4492_v29 = vadd.f32 %v4491_v40, %v4490_v60  ;;  %v3657_v2 = vadd.f32 %v4545_v0, %v3552_v4 }
 0x443   : > { %v4553_v31 = vpop.f32.mrb[65].mxu1 }
 0x444   : > { %v4554_v34 = vadd.f32 %v4553_v31, %v4552_v24  ;;  %v3557_v27 = vadd.f32 %v4492_v29, %v3452_v37  ;;  %v4493_v32 = vpop.f32.mrb[70].mxu0 }
 0x445   : > { %v4494_v54 = vpop.f32.mrb[71].mxu0 }
 0x446   : > { %v4555_v48 = vpop.f32.mrb[66].mxu1  ;;  %v4495_v10 = vadd.f32 %v4494_v54, %v4493_v32  ;;  %v3662_v50 = vadd.f32 %v4548_v42, %v3557_v27 }
 0x447   : > { %v4556_v35 = vpop.f32.mrb[67].mxu1 }
 0x448   : > { %v4557_v44 = vadd.f32 %v4556_v35, %v4555_v48  ;;  %v3562_v56 = vadd.f32 %v4495_v10, %v3457_v25  ;;  %v4496_v46 = vpop.f32.mrb[72].mxu0 }
 0x449   : > { %v4497_v49 = vpop.f32.mrb[73].mxu0 }
 0x44a   : > { %v4558_v26 = vpop.f32.mrb[68].mxu1  ;;  %v4498_v16 = vadd.f32 %v4497_v49, %v4496_v46  ;;  %v3667_v53 = vadd.f32 %v4551_v61, %v3562_v56 }
 0x44b   : > { %v4559_v11 = vpop.f32.mrb[69].mxu1 }
 0x44c   : > { %v4560_v14 = vadd.f32 %v4559_v11, %v4558_v26  ;;  %v3567_v7 = vadd.f32 %v4498_v16, %v3462_v51  ;;  %v4499_v19 = vpop.f32.mrb[74].mxu0 }
 0x44d   : > { %v4500_v15 = vpop.f32.mrb[75].mxu0 }
 0x44e   : > { %v4501_v37 = vadd.f32 %v4500_v15, %v4499_v19  ;;  %v3672_v62 = vadd.f32 %v4554_v34, %v3567_v7 }
 0x450   : > { %v3572_v45 = vadd.f32 %v4501_v37, %v3467_v33  ;;  %v4502_v3 = vpop.f32.mrb[76].mxu0 }
 0x451   : > { %v4503_v12 = vpop.f32.mrb[77].mxu0 }
 0x452   : > { %v4561_v57 = vpop.f32.mrb[70].mxu1  ;;  %v4504_v25 = vadd.f32 %v4503_v12, %v4502_v3  ;;  %v3677_v59 = vadd.f32 %v4557_v44, %v3572_v45 }
 0x453   : > { %v4562_v41 = vpop.f32.mrb[71].mxu1 }
 0x454   : > { %v4563_v21 = vadd.f32 %v4562_v41, %v4561_v57  ;;  %v3577_v58 = vadd.f32 %v4504_v25, %v3472_v18 }
 0x456   : > { %v4624_v51 = vpop.f32.mrb[72].mxu1  ;;  %v3682_v6 = vadd.f32 %v4560_v14, %v3577_v58 }
 0x457   : > { %v3782_v33 = vadd.f32 %v4624_v51, %v3677_v59  ;;  %v3776_v20 = vpop.f32.mrb[73].mxu1  ;;  %v4505_v8 = vpop.f32.mrb[78].mxu0 }
 0x458   : > { %v3777_v22 = vadd.f32 %v3776_v20, %v3672_v62  ;;  %v4506_v18 = vpop.f32.mrb[79].mxu0 }
 0x459   : > { %3801 = vst.msk [vmem:[%s7240_s8 + $0x28] sm:$0xff] %vm3795_vm7, %v3782_v33  ;;  %v4507_v5 = vadd.f32 %v4506_v18, %v4505_v8 }
 0x45a   : > { %3800 = vst.msk [vmem:[%s7240_s8 + $0x20] sm:$0xff] %vm3795_vm7, %v3777_v22  ;;  %v4627_v28 = vpop.f32.mrb[74].mxu1 }
 0x45b   : > { %v3786_v9 = vpop.f32.mrb[75].mxu1  ;;  %v3582_v38 = vadd.f32 %v4507_v5, %v7234_v39  ;;  %v4618_v23 = vpop.f32.mrb[80].mxu0 }
 0x45c   : > { %v3787_v0 = vadd.f32 %v3786_v9, %v3682_v6  ;;  %v3762_v13 = vadd.f32 %v4618_v23, %v3657_v2  ;;  %v3756_v30 = vpop.f32.mrb[81].mxu0 }
 0x45d   : > { %v3687_v17 = vadd.f32 %v4563_v21, %v3582_v38  ;;  %v3757_v42 = vadd.f32 %v3756_v30, %v3652_v47 }
 0x45e   : > { %3802 = vst.msk [vmem:[%s7240_s8 + $0x30] sm:$0xff] %vm3795_vm7, %v3787_v0  ;;  %3797 = vst.msk [vmem:[%s7240_s8 + $0x8] sm:$0xff] %vm3795_vm7, %v3762_v13 }
 0x45f   : > { %v3792_v43 = vadd.f32 %v4627_v28, %v3687_v17  ;;  %3796 = vst.msk [vmem:[%s7240_s8] sm:$0xff] %vm3795_vm7, %v3757_v42  ;;  %v4621_v52 = vpop.f32.mrb[82].mxu0 }
 0x460   : > { %v3772_v36 = vadd.f32 %v4621_v52, %v3667_v53  ;;  %v3766_v63 = vpop.f32.mrb[83].mxu0 }
 0x461   : > { %3803 = vst.msk [vmem:[%s7240_s8 + $0x38] sm:$0xff] %vm3795_vm7, %v3792_v43  ;;  %v3767_v1 = vadd.f32 %v3766_v63, %v3662_v50 }
 0x462   : > { %3799 = vst.msk [vmem:[%s7240_s8 + $0x18] sm:$0xff] %vm3795_vm7, %v3772_v36 }
 0x463   : > { %3798 = vst.msk [vmem:[%s7240_s8 + $0x10] sm:$0xff] %vm3795_vm7, %v3767_v1 }
 0x464 PF: > { %s15_s18 = sadd.s32 1, %s4966_s18  }
 0x465   : > { %p12_p4 = scmp.ge.s32.totalorder %s15_s18, 4  }
 0x467   :  { %14 = sbr.rel (!%p12_p4) target bundleno = 1 (0x1), region = 80 }

</bundles_post_ra>
